<compile_context>
chip_gen: v7x
topology: tpu7x:2x2x1
jax: 0.10.0
libtpu: 0.0.40
codegen_flags: <defaults>
</compile_context>

<pallas_src>
import functools

import numpy as np
import jax
import jax.numpy as jnp
from jax.experimental import pallas as pl
from jax.experimental.pallas import tpu as pltpu

HIDDEN_DIMS = [1000, 500, 100, 50, 4]
_LANE = 128
_SUBLANE = 8


def _round_up(n, m):
    return ((n + m - 1) // m) * m


def _pad2d(a, rows, cols):
    r, c = a.shape
    return jnp.pad(a, ((0, rows - r), (0, cols - c)))


def _pick_block_k(d_pad, cap=1024):
    """Largest multiple of 128 that divides d_pad, capped at `cap` lanes."""
    n = d_pad // _LANE
    cap_n = max(1, cap // _LANE)
    best = 1
    for d in range(1, min(n, cap_n) + 1):
        if n % d == 0:
            best = d
    return best * _LANE


# ----------------------------------------------------------------------------
# Kernel: whole MLP hot path.  Grid axis 0 tiles the layer-1 reduction (K).
# ----------------------------------------------------------------------------
def encoder_kernel(x_ref, w1_ref, b1_ref, w2_ref, b2_ref, w3_ref, b3_ref,
                   w4_ref, b4_ref, w5_ref, b5_ref, eps_ref,
                   out_ref, se_ref, h1_acc,
                   *, half, out_dim, compute_dtype):
    k = pl.program_id(0)

    @pl.when(k == 0)
    def _init():
        h1_acc[...] = jnp.zeros_like(h1_acc)

    # Layer-1 partial matmul over this K tile (bf16 operands, f32 accumulation).
    h1_acc[...] += jnp.dot(x_ref[...].astype(compute_dtype), w1_ref[...],
                           preferred_element_type=jnp.float32)

    @pl.when(k == pl.num_programs(0) - 1)
    def _finalize():
        h = jax.nn.silu(h1_acc[...] + b1_ref[...])
        h = jax.nn.silu(jnp.dot(h.astype(compute_dtype), w2_ref[...],
                                preferred_element_type=jnp.float32) + b2_ref[...])
        h = jax.nn.silu(jnp.dot(h.astype(compute_dtype), w3_ref[...],
                                preferred_element_type=jnp.float32) + b3_ref[...])
        h = jax.nn.silu(jnp.dot(h.astype(compute_dtype), w4_ref[...],
                                preferred_element_type=jnp.float32) + b4_ref[...])
        out = jnp.dot(h.astype(compute_dtype), w5_ref[...],
                      preferred_element_type=jnp.float32) + b5_ref[...]
        out_ref[...] = out
        # Reparam scale exp(logstd) * eps on the logstd lanes only.  Mask the
        # non-logstd lanes *before* exp so a large mu can never overflow to
        # inf and then give inf * 0 = NaN.
        lane = jax.lax.broadcasted_iota(jnp.int32, out.shape, 1)
        is_logstd = (lane >= half) & (lane < out_dim)
        se_ref[...] = jnp.exp(jnp.where(is_logstd, out, 0.0)) * eps_ref[...]


# ----------------------------------------------------------------------------
# One-time parameter preparation (hoisted out of the per-call path).
# ----------------------------------------------------------------------------
def init_params(key, unrolled_dim, hidden_dims=HIDDEN_DIMS):
    """Deterministic init mimicking torch.nn.Linear default U(-1/sqrt(fan_in), .)."""
    dims = [unrolled_dim] + list(hidden_dims)
    params = []
    for i in range(len(hidden_dims)):
        key, k_w, k_b = jax.random.split(key, 3)
        bound = 1.0 / np.sqrt(dims[i])
        W = jax.random.uniform(k_w, (dims[i], dims[i + 1]), jnp.float32, -bound, bound)
        b = jax.random.uniform(k_b, (dims[i + 1],), jnp.float32, -bound, bound)
        params.append((W, b))
    return params


def prepare_params(params, weight_dtype=jnp.bfloat16):
    """Pad to lane-aligned shapes and cast weights to bf16 ONCE; cache result."""
    padded = []
    for W, b in params:
        in_p = _round_up(W.shape[0], _LANE)
        out_p = _round_up(W.shape[1], _LANE)
        padded.append(_pad2d(W.astype(weight_dtype), in_p, out_p))
        padded.append(_pad2d(b.astype(jnp.float32)[None, :], 1, out_p))
    return tuple(jax.device_put(p) for p in padded)


# ----------------------------------------------------------------------------
# Forward
# ----------------------------------------------------------------------------
@functools.partial(jax.jit, static_argnames=("block_k",))
def _encoder_forward_jit(x, eps, padded, *, block_k):
    w1, b1, w2, b2, w3, b3, w4, b4, w5, b5 = padded

    B = x.shape[0]
    x_flat = x.reshape(B, -1).astype(jnp.float32)
    D_in = x_flat.shape[1]

    B_pad = _round_up(B, _SUBLANE)
    D_in_pad, H1_pad = w1.shape
    out_pad = w5.shape[1]
    out_dim = HIDDEN_DIMS[-1]
    half = out_dim // 2

    x_p = jnp.pad(x_flat, ((0, B_pad - B), (0, D_in_pad - D_in)))
    # eps lives on the logstd lanes (columns half:out_dim); zeros elsewhere.
    eps_p = jnp.zeros((B_pad, out_pad), jnp.float32).at[:B, half:out_dim].set(eps)

    n_k = D_in_pad // block_k

    kernel = functools.partial(encoder_kernel, half=half, out_dim=out_dim,
                               compute_dtype=w1.dtype)

    def _resident(arr):  # full-array block, constant index -> DMA'd once
        return pl.BlockSpec(arr.shape, lambda k: (0, 0))

    grid_spec = pltpu.PrefetchScalarGridSpec(
        num_scalar_prefetch=0,
        grid=(n_k,),
        in_specs=[
            pl.BlockSpec((B_pad, block_k), lambda k: (0, k)),    # x  (K-tiled)
            pl.BlockSpec((block_k, H1_pad), lambda k: (k, 0)),   # W1 (K-tiled)
            _resident(b1), _resident(w2), _resident(b2),
            _resident(w3), _resident(b3), _resident(w4), _resident(b4),
            _resident(w5), _resident(b5), _resident(eps_p),
        ],
        out_specs=(pl.BlockSpec((B_pad, out_pad), lambda k: (0, 0)),
                   pl.BlockSpec((B_pad, out_pad), lambda k: (0, 0))),
        scratch_shapes=[pltpu.VMEM((B_pad, H1_pad), jnp.float32)],
    )

    out, se = pl.pallas_call(
        kernel,
        out_shape=(jax.ShapeDtypeStruct((B_pad, out_pad), jnp.float32),
                   jax.ShapeDtypeStruct((B_pad, out_pad), jnp.float32)),
        grid_spec=grid_spec,
        compiler_params=pltpu.CompilerParams(
            dimension_semantics=("arbitrary",),     # K is a reduction axis
            vmem_limit_bytes=32 << 20),             # v7x-safe (64 MiB physical)
    )(x_p, w1, b1, w2, b2, w3, b3, w4, b4, w5, b5, eps_p)

    mu = out[:B, :half]
    logstd = out[:B, half:out_dim]
    z = mu + se[:B, half:out_dim]          # mu + exp(logstd) * eps
    return z, mu, logstd


def encoder_forward(x, padded_params, eps, *, block_k=None):
    """Returns (z, mu, logstd), matching Encoder.forward semantics."""
    d_in_pad = padded_params[0].shape[0]
    if block_k is None:
        block_k = _pick_block_k(d_in_pad, cap=1024)
    assert d_in_pad % block_k == 0 and block_k % _LANE == 0
    return _encoder_forward_jit(x, eps, padded_params, block_k=block_k)


# ----------------------------------------------------------------------------
# Pure-JAX reference (f32 master weights)
# ----------------------------------------------------------------------------
def _reference_forward(x, params, eps):
    B = x.shape[0]
    h = x.reshape(B, -1).astype(jnp.float32)
    n = len(params)
    for i, (W, b) in enumerate(params):
        h = h @ W + b
        if i < n - 1:
            h = jax.nn.silu(h)
    half = HIDDEN_DIMS[-1] // 2
    mu, logstd = h[:, :half], h[:, half:]
    z = mu + jnp.exp(logstd) * eps
    return z, mu, logstd


if __name__ == "__main__":
    key = jax.random.PRNGKey(0)
    k_x, k_p, k_eps = jax.random.split(key, 3)

    # Small, module-consistent shapes: batch=2, NCHW (2,4,16,16) -> unrolled_dim=1024.
    x = jax.random.normal(k_x, (2, 4, 16, 16), dtype=jnp.float32)
    unrolled_dim = int(np.prod(x.shape[1:]))
    params = init_params(k_p, unrolled_dim)

    # TODO(synk): torch.distributions.Normal(0, 0.1).rsample is drawn with JAX
    # RNG here (outside the kernel) -- semantically equivalent reparam noise.
    eps = 0.1 * jax.random.normal(k_eps, (x.shape[0], HIDDEN_DIMS[-1] // 2),
                                  dtype=jnp.float32)

    # One-time pad + bf16 cast (hoisted out of the per-call path).
    padded = prepare_params(params)

    # Default path (single K step at this size).
    z, mu, logstd = encoder_forward(x, padded, eps)
    jax.block_until_ready((z, mu, logstd))

    # Force a multi-step K grid to exercise the layer-1 accumulator path.
    z2, mu2, ls2 = encoder_forward(x, padded, eps, block_k=256)
    jax.block_until_ready((z2, mu2, ls2))

    z_r, mu_r, ls_r = _reference_forward(x, params, eps)
    for got, want in [(mu, mu_r), (logstd, ls_r), (z, z_r),
                      (mu2, mu_r), (ls2, ls_r), (z2, z_r)]:
        assert np.allclose(np.asarray(got), np.asarray(want),
                           rtol=2e-2, atol=2e-2), (
            np.max(np.abs(np.asarray(got) - np.asarray(want))))

    print("KERNEL_OK")
</pallas_src>

<mosaic_0001>
module attributes {stable_mosaic.version = 11 : i64} {
  func.func @encoder_kernel(%arg0: i32, %arg1: memref<8x1024xf32, #tpu.memory_space<vmem>>, %arg2: memref<1024x1024xbf16, #tpu.memory_space<vmem>>, %arg3: memref<1x1024xf32, #tpu.memory_space<vmem>>, %arg4: memref<1024x512xbf16, #tpu.memory_space<vmem>>, %arg5: memref<1x512xf32, #tpu.memory_space<vmem>>, %arg6: memref<512x128xbf16, #tpu.memory_space<vmem>>, %arg7: memref<1x128xf32, #tpu.memory_space<vmem>>, %arg8: memref<128x128xbf16, #tpu.memory_space<vmem>>, %arg9: memref<1x128xf32, #tpu.memory_space<vmem>>, %arg10: memref<128x128xbf16, #tpu.memory_space<vmem>>, %arg11: memref<1x128xf32, #tpu.memory_space<vmem>>, %arg12: memref<8x128xf32, #tpu.memory_space<vmem>>, %arg13: memref<8x128xf32, #tpu.memory_space<vmem>>, %arg14: memref<8x128xf32, #tpu.memory_space<vmem>>, %arg15: memref<8x1024xf32, #tpu.memory_space<vmem>>) attributes {dimension_semantics = [#tpu.dimension_semantics<arbitrary>], iteration_bounds = array<i64: 1>, scalar_prefetch = 0 : i64, scratch_operands = 1 : i64, tpu.core_type = #tpu.core_type<tc>, window_params = [{transform_indices = @transform_0, window_bounds = array<i64: 8, 1024>}, {transform_indices = @transform_1, window_bounds = array<i64: 1024, 1024>}, {pipeline_mode = #tpu.pipeline_mode<synchronous>, transform_indices = @transform_2, window_bounds = array<i64: 1, 1024>}, {pipeline_mode = #tpu.pipeline_mode<synchronous>, transform_indices = @transform_3, window_bounds = array<i64: 1024, 512>}, {pipeline_mode = #tpu.pipeline_mode<synchronous>, transform_indices = @transform_4, window_bounds = array<i64: 1, 512>}, {pipeline_mode = #tpu.pipeline_mode<synchronous>, transform_indices = @transform_5, window_bounds = array<i64: 512, 128>}, {pipeline_mode = #tpu.pipeline_mode<synchronous>, transform_indices = @transform_6, window_bounds = array<i64: 1, 128>}, {pipeline_mode = #tpu.pipeline_mode<synchronous>, transform_indices = @transform_7, window_bounds = array<i64: 128, 128>}, {pipeline_mode = #tpu.pipeline_mode<synchronous>, transform_indices = @transform_8, window_bounds = array<i64: 1, 128>}, {pipeline_mode = #tpu.pipeline_mode<synchronous>, transform_indices = @transform_9, window_bounds = array<i64: 128, 128>}, {pipeline_mode = #tpu.pipeline_mode<synchronous>, transform_indices = @transform_10, window_bounds = array<i64: 1, 128>}, {pipeline_mode = #tpu.pipeline_mode<synchronous>, transform_indices = @transform_11, window_bounds = array<i64: 8, 128>}, {pipeline_mode = #tpu.pipeline_mode<synchronous>, transform_indices = @transform_12, window_bounds = array<i64: 8, 128>}, {pipeline_mode = #tpu.pipeline_mode<synchronous>, transform_indices = @transform_13, window_bounds = array<i64: 8, 128>}]} {
    %c0_i32 = arith.constant 0 : i32
    %0 = arith.cmpi eq, %arg0, %c0_i32 : i32
    %1 = arith.extui %0 : i1 to i32
    %c0_i32_0 = arith.constant 0 : i32
    %2 = arith.cmpi ne, %1, %c0_i32_0 : i32
    scf.if %2 {
      %cst_10 = arith.constant 0.000000e+00 : f32
      %13 = vector.broadcast %cst_10 : f32 to vector<8x1024xf32>
      %c0_11 = arith.constant 0 : index
      %c0_12 = arith.constant 0 : index
      %14 = vector.load %arg15[%c0_11, %c0_12] : memref<8x1024xf32, #tpu.memory_space<vmem>>, vector<8x1024xf32>
      tpu.vector_store %arg15[%c0_11, %c0_12], %13 {strides = array<i32>} : memref<8x1024xf32, #tpu.memory_space<vmem>>, vector<8x1024xf32>,
    } else {
    }
    %c0 = arith.constant 0 : index
    %c0_1 = arith.constant 0 : index
    %3 = vector.load %arg15[%c0, %c0_1] : memref<8x1024xf32, #tpu.memory_space<vmem>>, vector<8x1024xf32>
    %c0_2 = arith.constant 0 : index
    %c0_3 = arith.constant 0 : index
    %4 = vector.load %arg1[%c0_2, %c0_3] : memref<8x1024xf32, #tpu.memory_space<vmem>>, vector<8x1024xf32>
    %5 = arith.truncf %4 : vector<8x1024xf32> to vector<8x1024xbf16>
    %c0_4 = arith.constant 0 : index
    %c0_5 = arith.constant 0 : index
    %6 = vector.load %arg2[%c0_4, %c0_5] : memref<1024x1024xbf16, #tpu.memory_space<vmem>>, vector<1024x1024xbf16>
    %cst = arith.constant dense<0.000000e+00> : vector<8x1024xf32>
    %7 = tpu.matmul %5, %6, %cst {dimension_numbers = #tpu.dot_dimension_numbers<[1], [0], [0], [1], [0, 0, 1, 1], [], []>} : vector<8x1024xbf16>, vector<1024x1024xbf16>, vector<8x1024xf32> -> vector<8x1024xf32>
    %8 = arith.addf %3, %7 : vector<8x1024xf32>
    %c0_6 = arith.constant 0 : index
    %c0_7 = arith.constant 0 : index
    %9 = vector.load %arg15[%c0_6, %c0_7] : memref<8x1024xf32, #tpu.memory_space<vmem>>, vector<8x1024xf32>
    tpu.vector_store %arg15[%c0_6, %c0_7], %8 {strides = array<i32>} : memref<8x1024xf32, #tpu.memory_space<vmem>>, vector<8x1024xf32>,
    %c0_i32_8 = arith.constant 0 : i32
    %10 = arith.cmpi eq, %arg0, %c0_i32_8 : i32
    %11 = arith.extui %10 : i1 to i32
    %c0_i32_9 = arith.constant 0 : i32
    %12 = arith.cmpi ne, %11, %c0_i32_9 : i32
    scf.if %12 {
      %c0_10 = arith.constant 0 : index
      %c0_11 = arith.constant 0 : index
      %13 = vector.load %arg15[%c0_10, %c0_11] : memref<8x1024xf32, #tpu.memory_space<vmem>>, vector<8x1024xf32>
      %c0_12 = arith.constant 0 : index
      %c0_13 = arith.constant 0 : index
      %14 = vector.load %arg3[%c0_12, %c0_13] : memref<1x1024xf32, #tpu.memory_space<vmem>>, vector<1x1024xf32>
      %15 = vector.broadcast %14 : vector<1x1024xf32> to vector<8x1024xf32>
      %16 = arith.addf %13, %15 : vector<8x1024xf32>
      %17 = arith.negf %16 : vector<8x1024xf32>
      %18 = math.exp %17 : vector<8x1024xf32>
      %cst_14 = arith.constant 1.000000e+00 : f32
      %19 = vector.broadcast %cst_14 : f32 to vector<8x1024xf32>
      %20 = arith.addf %19, %18 : vector<8x1024xf32>
      %21 = arith.divf %19, %20 : vector<8x1024xf32>
      %22 = arith.mulf %16, %21 : vector<8x1024xf32>
      %23 = arith.truncf %22 : vector<8x1024xf32> to vector<8x1024xbf16>
      %c0_15 = arith.constant 0 : index
      %c0_16 = arith.constant 0 : index
      %24 = vector.load %arg4[%c0_15, %c0_16] : memref<1024x512xbf16, #tpu.memory_space<vmem>>, vector<1024x512xbf16>
      %cst_17 = arith.constant dense<0.000000e+00> : vector<8x512xf32>
      %25 = tpu.matmul %23, %24, %cst_17 {dimension_numbers = #tpu.dot_dimension_numbers<[1], [0], [0], [1], [0, 0, 1, 1], [], []>} : vector<8x1024xbf16>, vector<1024x512xbf16>, vector<8x512xf32> -> vector<8x512xf32>
      %c0_18 = arith.constant 0 : index
      %c0_19 = arith.constant 0 : index
      %26 = vector.load %arg5[%c0_18, %c0_19] : memref<1x512xf32, #tpu.memory_space<vmem>>, vector<1x512xf32>
      %27 = vector.broadcast %26 : vector<1x512xf32> to vector<8x512xf32>
      %28 = arith.addf %25, %27 : vector<8x512xf32>
      %29 = arith.negf %28 : vector<8x512xf32>
      %30 = math.exp %29 : vector<8x512xf32>
      %cst_20 = arith.constant 1.000000e+00 : f32
      %31 = vector.broadcast %cst_20 : f32 to vector<8x512xf32>
      %32 = arith.addf %31, %30 : vector<8x512xf32>
      %33 = arith.divf %31, %32 : vector<8x512xf32>
      %34 = arith.mulf %28, %33 : vector<8x512xf32>
      %35 = arith.truncf %34 : vector<8x512xf32> to vector<8x512xbf16>
      %c0_21 = arith.constant 0 : index
      %c0_22 = arith.constant 0 : index
      %36 = vector.load %arg6[%c0_21, %c0_22] : memref<512x128xbf16, #tpu.memory_space<vmem>>, vector<512x128xbf16>
      %cst_23 = arith.constant dense<0.000000e+00> : vector<8x128xf32>
      %37 = tpu.matmul %35, %36, %cst_23 {dimension_numbers = #tpu.dot_dimension_numbers<[1], [0], [0], [1], [0, 0, 1, 1], [], []>} : vector<8x512xbf16>, vector<512x128xbf16>, vector<8x128xf32> -> vector<8x128xf32>
      %c0_24 = arith.constant 0 : index
      %c0_25 = arith.constant 0 : index
      %38 = vector.load %arg7[%c0_24, %c0_25] : memref<1x128xf32, #tpu.memory_space<vmem>>, vector<1x128xf32>
      %39 = vector.broadcast %38 : vector<1x128xf32> to vector<8x128xf32>
      %40 = arith.addf %37, %39 : vector<8x128xf32>
      %41 = arith.negf %40 : vector<8x128xf32>
      %42 = math.exp %41 : vector<8x128xf32>
      %cst_26 = arith.constant 1.000000e+00 : f32
      %43 = vector.broadcast %cst_26 : f32 to vector<8x128xf32>
      %44 = arith.addf %43, %42 : vector<8x128xf32>
      %45 = arith.divf %43, %44 : vector<8x128xf32>
      %46 = arith.mulf %40, %45 : vector<8x128xf32>
      %47 = arith.truncf %46 : vector<8x128xf32> to vector<8x128xbf16>
      %c0_27 = arith.constant 0 : index
      %c0_28 = arith.constant 0 : index
      %48 = vector.load %arg8[%c0_27, %c0_28] : memref<128x128xbf16, #tpu.memory_space<vmem>>, vector<128x128xbf16>
      %cst_29 = arith.constant dense<0.000000e+00> : vector<8x128xf32>
      %49 = tpu.matmul %47, %48, %cst_29 {dimension_numbers = #tpu.dot_dimension_numbers<[1], [0], [0], [1], [0, 0, 1, 1], [], []>} : vector<8x128xbf16>, vector<128x128xbf16>, vector<8x128xf32> -> vector<8x128xf32>
      %c0_30 = arith.constant 0 : index
      %c0_31 = arith.constant 0 : index
      %50 = vector.load %arg9[%c0_30, %c0_31] : memref<1x128xf32, #tpu.memory_space<vmem>>, vector<1x128xf32>
      %51 = vector.broadcast %50 : vector<1x128xf32> to vector<8x128xf32>
      %52 = arith.addf %49, %51 : vector<8x128xf32>
      %53 = arith.negf %52 : vector<8x128xf32>
      %54 = math.exp %53 : vector<8x128xf32>
      %cst_32 = arith.constant 1.000000e+00 : f32
      %55 = vector.broadcast %cst_32 : f32 to vector<8x128xf32>
      %56 = arith.addf %55, %54 : vector<8x128xf32>
      %57 = arith.divf %55, %56 : vector<8x128xf32>
      %58 = arith.mulf %52, %57 : vector<8x128xf32>
      %59 = arith.truncf %58 : vector<8x128xf32> to vector<8x128xbf16>
      %c0_33 = arith.constant 0 : index
      %c0_34 = arith.constant 0 : index
      %60 = vector.load %arg10[%c0_33, %c0_34] : memref<128x128xbf16, #tpu.memory_space<vmem>>, vector<128x128xbf16>
      %cst_35 = arith.constant dense<0.000000e+00> : vector<8x128xf32>
      %61 = tpu.matmul %59, %60, %cst_35 {dimension_numbers = #tpu.dot_dimension_numbers<[1], [0], [0], [1], [0, 0, 1, 1], [], []>} : vector<8x128xbf16>, vector<128x128xbf16>, vector<8x128xf32> -> vector<8x128xf32>
      %c0_36 = arith.constant 0 : index
      %c0_37 = arith.constant 0 : index
      %62 = vector.load %arg11[%c0_36, %c0_37] : memref<1x128xf32, #tpu.memory_space<vmem>>, vector<1x128xf32>
      %63 = vector.broadcast %62 : vector<1x128xf32> to vector<8x128xf32>
      %64 = arith.addf %61, %63 : vector<8x128xf32>
      %c0_38 = arith.constant 0 : index
      %c0_39 = arith.constant 0 : index
      %65 = vector.load %arg13[%c0_38, %c0_39] : memref<8x128xf32, #tpu.memory_space<vmem>>, vector<8x128xf32>
      tpu.vector_store %arg13[%c0_38, %c0_39], %64 {strides = array<i32>} : memref<8x128xf32, #tpu.memory_space<vmem>>, vector<8x128xf32>,
      %66 = tpu.iota {dimensions = array<i32: 1>} : vector<8x128xi32>
      %c2_i32 = arith.constant 2 : i32
      %67 = vector.broadcast %c2_i32 : i32 to vector<8x128xi32>
      %68 = arith.cmpi sge, %66, %67 : vector<8x128xi32>
      %c4_i32 = arith.constant 4 : i32
      %69 = vector.broadcast %c4_i32 : i32 to vector<8x128xi32>
      %70 = arith.cmpi slt, %66, %69 : vector<8x128xi32>
      %71 = arith.andi %68, %70 : vector<8x128xi1>
      %cst_40 = arith.constant 0.000000e+00 : f32
      %72 = vector.broadcast %cst_40 : f32 to vector<8x128xf32>
      %73 = arith.select %71, %64, %72 : vector<8x128xi1>, vector<8x128xf32>
      %74 = math.exp %73 : vector<8x128xf32>
      %c0_41 = arith.constant 0 : index
      %c0_42 = arith.constant 0 : index
      %75 = vector.load %arg12[%c0_41, %c0_42] : memref<8x128xf32, #tpu.memory_space<vmem>>, vector<8x128xf32>
      %76 = arith.mulf %74, %75 : vector<8x128xf32>
      %c0_43 = arith.constant 0 : index
      %c0_44 = arith.constant 0 : index
      %77 = vector.load %arg14[%c0_43, %c0_44] : memref<8x128xf32, #tpu.memory_space<vmem>>, vector<8x128xf32>
      tpu.vector_store %arg14[%c0_43, %c0_44], %76 {strides = array<i32>} : memref<8x128xf32, #tpu.memory_space<vmem>>, vector<8x128xf32>,
    } else {
    }
    return
  }
  func.func @transform_0(%arg0: i32) -> (i32, i32) {
    %c0_i32 = arith.constant 0 : i32
    %c0_i32_0 = arith.constant 0 : i32
    return %c0_i32, %arg0 : i32, i32
  }
  func.func @transform_1(%arg0: i32) -> (i32, i32) {
    %c0_i32 = arith.constant 0 : i32
    %c0_i32_0 = arith.constant 0 : i32
    return %arg0, %c0_i32 : i32, i32
  }
  func.func @transform_2(%arg0: i32) -> (i32, i32) {
    %c0_i32 = arith.constant 0 : i32
    %c0_i32_0 = arith.constant 0 : i32
    %c0_i32_1 = arith.constant 0 : i32
    return %c0_i32, %c0_i32_0 : i32, i32
  }
  func.func @transform_3(%arg0: i32) -> (i32, i32) {
    %c0_i32 = arith.constant 0 : i32
    %c0_i32_0 = arith.constant 0 : i32
    %c0_i32_1 = arith.constant 0 : i32
    return %c0_i32, %c0_i32_0 : i32, i32
  }
  func.func @transform_4(%arg0: i32) -> (i32, i32) {
    %c0_i32 = arith.constant 0 : i32
    %c0_i32_0 = arith.constant 0 : i32
    %c0_i32_1 = arith.constant 0 : i32
    return %c0_i32, %c0_i32_0 : i32, i32
  }
  func.func @transform_5(%arg0: i32) -> (i32, i32) {
    %c0_i32 = arith.constant 0 : i32
    %c0_i32_0 = arith.constant 0 : i32
    %c0_i32_1 = arith.constant 0 : i32
    return %c0_i32, %c0_i32_0 : i32, i32
  }
  func.func @transform_6(%arg0: i32) -> (i32, i32) {
    %c0_i32 = arith.constant 0 : i32
    %c0_i32_0 = arith.constant 0 : i32
    %c0_i32_1 = arith.constant 0 : i32
    return %c0_i32, %c0_i32_0 : i32, i32
  }
  func.func @transform_7(%arg0: i32) -> (i32, i32) {
    %c0_i32 = arith.constant 0 : i32
    %c0_i32_0 = arith.constant 0 : i32
    %c0_i32_1 = arith.constant 0 : i32
    return %c0_i32, %c0_i32_0 : i32, i32
  }
  func.func @transform_8(%arg0: i32) -> (i32, i32) {
    %c0_i32 = arith.constant 0 : i32
    %c0_i32_0 = arith.constant 0 : i32
    %c0_i32_1 = arith.constant 0 : i32
    return %c0_i32, %c0_i32_0 : i32, i32
  }
  func.func @transform_9(%arg0: i32) -> (i32, i32) {
    %c0_i32 = arith.constant 0 : i32
    %c0_i32_0 = arith.constant 0 : i32
    %c0_i32_1 = arith.constant 0 : i32
    return %c0_i32, %c0_i32_0 : i32, i32
  }
  func.func @transform_10(%arg0: i32) -> (i32, i32) {
    %c0_i32 = arith.constant 0 : i32
    %c0_i32_0 = arith.constant 0 : i32
    %c0_i32_1 = arith.constant 0 : i32
    return %c0_i32, %c0_i32_0 : i32, i32
  }
  func.func @transform_11(%arg0: i32) -> (i32, i32) {
    %c0_i32 = arith.constant 0 : i32
    %c0_i32_0 = arith.constant 0 : i32
    %c0_i32_1 = arith.constant 0 : i32
    return %c0_i32, %c0_i32_0 : i32, i32
  }
  func.func @transform_12(%arg0: i32) -> (i32, i32) {
    %c0_i32 = arith.constant 0 : i32
    %c0_i32_0 = arith.constant 0 : i32
    %c0_i32_1 = arith.constant 0 : i32
    return %c0_i32, %c0_i32_0 : i32, i32
  }
  func.func @transform_13(%arg0: i32) -> (i32, i32) {
    %c0_i32 = arith.constant 0 : i32
    %c0_i32_0 = arith.constant 0 : i32
    %c0_i32_1 = arith.constant 0 : i32
    return %c0_i32, %c0_i32_0 : i32, i32
  }
}

</mosaic_0001>

<bundles_post_ra>
// kernel: _encoder_forward_jit.1
= control target key start
LH: loop header
LB: loop body
LE: loop exit
PB: predicated region body
PF: predicated region fallthrough
CT: control target
= control target key end

     0   :  { %19 = vsyncpa [#allocation4], 0  ;;  %s8731_s0 = inlined_call_operand.vmem [shape: f32[8,1024], index: 0, kind: input, shape index: {}]   ;;  %s8732_s1 = inlined_call_operand.hbm [shape: bf16[1024,1024], index: 1, kind: input, shape index: {}]   ;;  %s8733_s2 = inlined_call_operand.hbm [shape: f32[1,1024], index: 2, kind: input, shape index: {}]   ;;  %s8734_s3 = inlined_call_operand.hbm [shape: bf16[1024,512], index: 3, kind: input, shape index: {}]   ;;  %s8735_s4 = inlined_call_operand.hbm [shape: f32[1,512], index: 4, kind: input, shape index: {}]   ;;  %s8736_s5 = inlined_call_operand.hbm [shape: bf16[512,128], index: 5, kind: input, shape index: {}]   ;;  %s8737_s6 = inlined_call_operand.hbm [shape: f32[1,128], index: 6, kind: input, shape index: {}]   ;;  %s8738_s7 = inlined_call_operand.hbm [shape: bf16[128,128], index: 7, kind: input, shape index: {}]   ;;  %s8739_s8 = inlined_call_operand.hbm [shape: f32[1,128], index: 8, kind: input, shape index: {}]   ;;  %s8740_s9 = inlined_call_operand.hbm [shape: bf16[128,128], index: 9, kind: input, shape index: {}]   ;;  %s8741_s10 = inlined_call_operand.hbm [shape: f32[1,128], index: 10, kind: input, shape index: {}]   ;;  %s8742_s11 = inlined_call_operand.vmem [shape: f32[8,128], index: 11, kind: input, shape index: {}]   ;;  %s8743_s12 = inlined_call_operand.vmem [shape: f32[8,128], index: 12, kind: output, shape index: {0}]   ;;  %s8744_s13 = inlined_call_operand.vmem [shape: f32[8,128], index: 13, kind: output, shape index: {1}]  }
   0x1   :  { %20 = vsyncpa [#allocation6], 0 }
   0x2   :  { %21 = vsyncpa [#allocation9], 0 }
   0x3   :  { %22 = vsyncpa [#allocation12], 0 }
   0x4   :  { %23 = vsyncpa [#allocation15], 0 }
   0x5   :  { %24 = vsyncpa [#allocation18], 0  ;;  %s8304_s25 = smov [#allocation5]   ;;  %s8305_s27 = smov [#allocation8]  }
   0x6   :  { %s45_s26 = sshll.u32 %s8304_s25, 4  ;;  %s67_s28 = sshll.u32 %s8305_s27, 4  ;;  %s46_s26 = int_to_ptr.vmem [resolvable:$true] %s45_s26  ;;  %s68_s28 = int_to_ptr.vmem [resolvable:$true] %s67_s28 }
   0x7   :  { %s8072_s14 = scalar_lea.hbm %s8733_s2, 128 }
   0x8   :  { %p8073_p0 = scmp.ne.s32.totalorder %s8733_s2, %s8072_s14  ;;  %p8076_p1 = scmp.lt.u32.totalorder %s8072_s14, %s8733_s2 }
   0xa   :  { %p8078_p2 = pnand %p8076_p1, %p8073_p0 }
   0xc   :  { %8081 = shalt.err (!%p8078_p2)
}
   0xd   :  { %s8082_s19 = scalar_lea.vmem %s46_s26, 128  ;;  %p8087_p4 = scmp.lt.s32.totalorder %s46_s26, %s46_s26 }
   0xe   :  { %p8083_p3 = scmp.ne.s32.totalorder %s46_s26, %s8082_s19  ;;  %p8088_p5 = scmp.lt.s32.totalorder %s8082_s19, %s8082_s19 }
  0x10   :  { %p8089_p6 = por %p8088_p5, %p8087_p4 }
  0x12   :  { %p8090_p7 = pnand %p8089_p6, %p8083_p3 }
  0x14   :  { %8093 = shalt.err (!%p8090_p7)
}
  0x15   :  { %48 = dma.hbm_to_vmem [thread:$0]  %s8733_s2, 128, %s46_s26, [#allocation6]  }
  0x16   :  { %s8094_s24 = scalar_lea.hbm %s8735_s4, 64 }
  0x17   :  { %p8095_p8 = scmp.ne.s32.totalorder %s8735_s4, %s8094_s24  ;;  %p8098_p9 = scmp.lt.u32.totalorder %s8094_s24, %s8735_s4 }
  0x19   :  { %p8100_p10 = pnand %p8098_p9, %p8095_p8 }
  0x1b   :  { %8103 = shalt.err (!%p8100_p10)
}
  0x1c   :  { %s8104_s14 = scalar_lea.vmem %s68_s28, 64  ;;  %p8109_p12 = scmp.lt.s32.totalorder %s68_s28, %s68_s28 }
  0x1d   :  { %p8105_p11 = scmp.ne.s32.totalorder %s68_s28, %s8104_s14  ;;  %p8110_p13 = scmp.lt.s32.totalorder %s8104_s14, %s8104_s14 }
  0x1f   :  { %p8111_p0 = por %p8110_p13, %p8109_p12 }
  0x21   :  { %p8112_p1 = pnand %p8111_p0, %p8105_p11 }
  0x23   :  { %8115 = shalt.err (!%p8112_p1)
}
  0x24   :  { %70 = dma.hbm_to_vmem [thread:$0]  %s8735_s4, 64, %s68_s28, [#allocation9]  }
  0x25   :  { %s8306_s15 = smov [#allocation11]   ;;  %s8307_s17 = smov [#allocation14]  }
  0x26   :  { %s89_s16 = sshll.u32 %s8306_s15, 4  ;;  %s111_s18 = sshll.u32 %s8307_s17, 4  ;;  %s90_s16 = int_to_ptr.vmem [resolvable:$true] %s89_s16  ;;  %s112_s18 = int_to_ptr.vmem [resolvable:$true] %s111_s18 }
  0x27   :  { %s8116_s21 = scalar_lea.hbm %s8737_s6, 16 }
  0x28   :  { %p8117_p2 = scmp.ne.s32.totalorder %s8737_s6, %s8116_s21  ;;  %p8120_p3 = scmp.lt.u32.totalorder %s8116_s21, %s8737_s6 }
  0x2a   :  { %p8122_p4 = pnand %p8120_p3, %p8117_p2 }
  0x2c   :  { %8125 = shalt.err (!%p8122_p4)
}
  0x2d   :  { %s8126_s4 = scalar_lea.vmem %s90_s16, 16  ;;  %s8130_s28 = scalar_lea.vmem %s90_s16, 32 }
  0x2e   :  { %p8127_p5 = scmp.ne.s32.totalorder %s90_s16, %s8126_s4  ;;  %p8131_p6 = scmp.lt.s32.totalorder %s90_s16, %s90_s16 }
  0x2f   :  { %p8132_p7 = scmp.lt.s32.totalorder %s8130_s28, %s8126_s4 }
  0x31   :  { %p8133_p8 = por %p8132_p7, %p8131_p6 }
  0x33   :  { %p8134_p9 = pnand %p8133_p8, %p8127_p5 }
  0x35   :  { %8137 = shalt.err (!%p8134_p9)
}
  0x36   :  { %92 = dma.hbm_to_vmem [thread:$0]  %s8737_s6, 16, %s90_s16, [#allocation12]  }
  0x37   :  { %s8138_s2 = scalar_lea.hbm %s8739_s8, 16 }
  0x38   :  { %p8139_p10 = scmp.ne.s32.totalorder %s8739_s8, %s8138_s2  ;;  %p8142_p11 = scmp.lt.u32.totalorder %s8138_s2, %s8739_s8 }
  0x3a   :  { %p8144_p12 = pnand %p8142_p11, %p8139_p10 }
  0x3c   :  { %8147 = shalt.err (!%p8144_p12)
}
  0x3d   :  { %s8148_s20 = scalar_lea.vmem %s112_s18, 16  ;;  %s8152_s21 = scalar_lea.vmem %s112_s18, 32 }
  0x3e   :  { %p8149_p13 = scmp.ne.s32.totalorder %s112_s18, %s8148_s20  ;;  %p8153_p0 = scmp.lt.s32.totalorder %s112_s18, %s112_s18 }
  0x3f   :  { %p8154_p1 = scmp.lt.s32.totalorder %s8152_s21, %s8148_s20 }
  0x41   :  { %p8155_p2 = por %p8154_p1, %p8153_p0 }
  0x43   :  { %p8156_p3 = pnand %p8155_p2, %p8149_p13 }
  0x45   :  { %8159 = shalt.err (!%p8156_p3)
}
  0x46   :  { %114 = dma.hbm_to_vmem [thread:$0]  %s8739_s8, 16, %s112_s18, [#allocation15]  }
  0x47   :  { %s8308_s22 = smov [#allocation3]   ;;  %s8160_s4 = scalar_lea.hbm %s8732_s1, 65536 }
  0x48   :  { %s32_s23 = sshll.u32 %s8308_s22, 4  ;;  %p8161_p4 = scmp.ne.s32.totalorder %s8732_s1, %s8160_s4  ;;  %s33_s23 = int_to_ptr.vmem [resolvable:$true] %s32_s23 }
  0x49   :  { %p8164_p5 = scmp.lt.u32.totalorder %s8160_s4, %s8732_s1 }
  0x4b   :  { %p8166_p6 = pnand %p8164_p5, %p8161_p4 }
  0x4d   :  { %8169 = shalt.err (!%p8166_p6)
}
  0x4e   :  { %s8170_s14 = scalar_lea.vmem %s33_s23, 65536  ;;  %p8175_p8 = scmp.lt.s32.totalorder %s33_s23, %s33_s23 }
  0x4f   :  { %p8171_p7 = scmp.ne.s32.totalorder %s33_s23, %s8170_s14  ;;  %p8176_p9 = scmp.lt.s32.totalorder %s8170_s14, %s8170_s14 }
  0x51   :  { %p8177_p10 = por %p8176_p9, %p8175_p8 }
  0x53   :  { %p8178_p11 = pnand %p8177_p10, %p8171_p7 }
  0x55   :  { %8181 = shalt.err (!%p8178_p11)
}
  0x56   :  { %s8309_s8 = smov 512   ;;  %s8310_s18 = smov 32  }
  0x57   :  { %38 = dma.hbm_to_vmem [thread:$0]  %s8732_s1, 65536, %s33_s23, [#allocation4], %s8309_s8, %s8309_s8, %s8310_s18  }
  0x58   :  { %s8311_s15 = smov [#allocation7]   ;;  %s8182_s21 = scalar_lea.hbm %s8734_s3, 32768 }
  0x59   :  { %s54_s17 = sshll.u32 %s8311_s15, 4  ;;  %p8183_p12 = scmp.ne.s32.totalorder %s8734_s3, %s8182_s21  ;;  %s55_s17 = int_to_ptr.vmem [resolvable:$true] %s54_s17 }
  0x5a   :  { %p8186_p13 = scmp.lt.u32.totalorder %s8182_s21, %s8734_s3 }
  0x5c   :  { %p8188_p0 = pnand %p8186_p13, %p8183_p12 }
  0x5e   :  { %8191 = shalt.err (!%p8188_p0)
}
  0x5f   :  { %s8192_s25 = scalar_lea.vmem %s55_s17, 32768  ;;  %p8197_p2 = scmp.lt.s32.totalorder %s55_s17, %s55_s17 }
  0x60   :  { %p8193_p1 = scmp.ne.s32.totalorder %s55_s17, %s8192_s25  ;;  %p8198_p3 = scmp.lt.s32.totalorder %s8192_s25, %s8192_s25 }
  0x62   :  { %p8199_p4 = por %p8198_p3, %p8197_p2 }
  0x64   :  { %p8200_p5 = pnand %p8199_p4, %p8193_p1 }
  0x66   :  { %8203 = shalt.err (!%p8200_p5)
}
  0x67   :  { %s8312_s1 = smov 256   ;;  %s8313_s23 = smov 16  }
  0x68   :  { %60 = dma.hbm_to_vmem [thread:$0]  %s8734_s3, 32768, %s55_s17, [#allocation6], %s8312_s1, %s8312_s1, %s8313_s23  }
  0x69   :  { %s8314_s27 = smov [#allocation10]   ;;  %s8204_s8 = scalar_lea.hbm %s8736_s5, 4096 }
  0x6a   :  { %s76_s29 = sshll.u32 %s8314_s27, 4  ;;  %p8205_p6 = scmp.ne.s32.totalorder %s8736_s5, %s8204_s8  ;;  %s77_s29 = int_to_ptr.vmem [resolvable:$true] %s76_s29 }
  0x6b   :  { %p8208_p7 = scmp.lt.u32.totalorder %s8204_s8, %s8736_s5 }
  0x6d   :  { %p8210_p8 = pnand %p8208_p7, %p8205_p6 }
  0x6f   :  { %8213 = shalt.err (!%p8210_p8)
}
  0x70   :  { %s8214_s19 = scalar_lea.vmem %s77_s29, 4096  ;;  %p8219_p10 = scmp.lt.s32.totalorder %s77_s29, %s77_s29 }
  0x71   :  { %p8215_p9 = scmp.ne.s32.totalorder %s77_s29, %s8214_s19  ;;  %p8220_p11 = scmp.lt.s32.totalorder %s8214_s19, %s8214_s19 }
  0x73   :  { %p8221_p12 = por %p8220_p11, %p8219_p10 }
  0x75   :  { %p8222_p13 = pnand %p8221_p12, %p8215_p9 }
  0x77   :  { %8225 = shalt.err (!%p8222_p13)
}
  0x78   :  { %s8315_s3 = smov 64   ;;  %s8316_s17 = smov 4  }
  0x79   :  { %82 = dma.hbm_to_vmem [thread:$0]  %s8736_s5, 4096, %s77_s29, [#allocation9], %s8315_s3, %s8315_s3, %s8316_s17  }
  0x7a   :  { %s8317_s6 = smov [#allocation13]   ;;  %s8318_s22 = smov [#allocation16]  }
  0x7b   :  { %s98_s16 = sshll.u32 %s8317_s6, 4  ;;  %s120_s24 = sshll.u32 %s8318_s22, 4  ;;  %s99_s16 = int_to_ptr.vmem [resolvable:$true] %s98_s16  ;;  %s121_s24 = int_to_ptr.vmem [resolvable:$true] %s120_s24 }
  0x7c   :  { %s8226_s23 = scalar_lea.hbm %s8738_s7, 1024 }
  0x7d   :  { %p8227_p0 = scmp.ne.s32.totalorder %s8738_s7, %s8226_s23  ;;  %p8230_p1 = scmp.lt.u32.totalorder %s8226_s23, %s8738_s7 }
  0x7f   :  { %p8232_p2 = pnand %p8230_p1, %p8227_p0 }
  0x81   :  { %8235 = shalt.err (!%p8232_p2)
}
  0x82   :  { %s8236_s5 = scalar_lea.vmem %s99_s16, 1024  ;;  %p8241_p4 = scmp.lt.s32.totalorder %s99_s16, %s99_s16 }
  0x83   :  { %p8237_p3 = scmp.ne.s32.totalorder %s99_s16, %s8236_s5  ;;  %p8242_p5 = scmp.lt.s32.totalorder %s8236_s5, %s8236_s5 }
  0x85   :  { %p8243_p6 = por %p8242_p5, %p8241_p4 }
  0x87   :  { %p8244_p7 = pnand %p8243_p6, %p8237_p3 }
  0x89   :  { %8247 = shalt.err (!%p8244_p7)
}
  0x8a   :  { %104 = dma.hbm_to_vmem [thread:$0]  %s8738_s7, 1024, %s99_s16, [#allocation12], %s8315_s3, %s8315_s3, %s8316_s17  }
  0x8b   :  { %s8248_s2 = scalar_lea.hbm %s8740_s9, 1024 }
  0x8c   :  { %p8249_p8 = scmp.ne.s32.totalorder %s8740_s9, %s8248_s2  ;;  %p8252_p9 = scmp.lt.u32.totalorder %s8248_s2, %s8740_s9 }
  0x8e   :  { %p8254_p10 = pnand %p8252_p9, %p8249_p8 }
  0x90   :  { %8257 = shalt.err (!%p8254_p10)
}
  0x91   :  { %s8258_s21 = scalar_lea.vmem %s121_s24, 1024  ;;  %p8263_p12 = scmp.lt.s32.totalorder %s121_s24, %s121_s24 }
  0x92   :  { %p8259_p11 = scmp.ne.s32.totalorder %s121_s24, %s8258_s21  ;;  %p8264_p13 = scmp.lt.s32.totalorder %s8258_s21, %s8258_s21 }
  0x94   :  { %p8265_p0 = por %p8264_p13, %p8263_p12 }
  0x96   :  { %p8266_p1 = pnand %p8265_p0, %p8259_p11 }
  0x98   :  { %8269 = shalt.err (!%p8266_p1)
}
  0x99   :  { %126 = dma.hbm_to_vmem [thread:$0]  %s8740_s9, 1024, %s121_s24, [#allocation15], %s8315_s3, %s8315_s3, %s8316_s17  }
  0x9a   :  { %s8319_s16 = smov [#allocation17]   ;;  %s8270_s23 = scalar_lea.hbm %s8741_s10, 16 }
  0x9b   :  { %s133_s22 = sshll.u32 %s8319_s16, 4  ;;  %p8271_p2 = scmp.ne.s32.totalorder %s8741_s10, %s8270_s23  ;;  %s134_s22 = int_to_ptr.vmem [resolvable:$true] %s133_s22 }
  0x9c   :  { %p8274_p3 = scmp.lt.u32.totalorder %s8270_s23, %s8741_s10 }
  0x9e   :  { %p8276_p4 = pnand %p8274_p3, %p8271_p2 }
  0xa0   :  { %8279 = shalt.err (!%p8276_p4)
}
  0xa1   :  { %s8280_s5 = scalar_lea.vmem %s134_s22, 16  ;;  %s8284_s9 = scalar_lea.vmem %s134_s22, 32 }
  0xa2   :  { %p8281_p5 = scmp.ne.s32.totalorder %s134_s22, %s8280_s5  ;;  %p8285_p6 = scmp.lt.s32.totalorder %s134_s22, %s134_s22 }
  0xa3   :  { %p8286_p7 = scmp.lt.s32.totalorder %s8284_s9, %s8280_s5 }
  0xa5   :  { %p8287_p8 = por %p8286_p7, %p8285_p6 }
  0xa7   :  { %p8288_p9 = pnand %p8287_p8, %p8281_p5 }
  0xa9   :  { %8291 = shalt.err (!%p8288_p9)
}
  0xaa   :  { %136 = dma.hbm_to_vmem [thread:$0]  %s8741_s10, 16, %s134_s22, [#allocation18]  }
  0xab   :  { %8292 = dma.done.wait [#allocation4], 65536  }
  0xac   :  { %8293 = vsyncadd [#allocation4], 4294901760 }
  0xad   :  { %8294 = dma.done.wait [#allocation6], 32896  }
  0xae   :  { %8295 = vsyncadd [#allocation6], 4294934400 }
  0xaf   :  { %8296 = dma.done.wait [#allocation9], 4160  }
  0xb0   :  { %8297 = vsyncadd [#allocation9], 4294963136 }
  0xb1   :  { %8298 = dma.done.wait [#allocation12], 1040  }
  0xb2   :  { %8299 = vsyncadd [#allocation12], 4294966256 }
  0xb3   :  { %8300 = dma.done.wait [#allocation15], 1040  }
  0xb4   :  { %8301 = vsyncadd [#allocation15], 4294966256 }
  0xb5   :  { %8302 = dma.done.wait [#allocation18], 16  }
  0xb6   :  { %8303 = vsyncadd [#allocation18], 4294967280  ;;  %v206_v0 = vld [vmem:[#allocation3] sm:$0xff]  ;;  %v191_v53 = vld [vmem:[%s8731_s0 + $0x8] sm:$0xff]  ;;  %vm8321_vm0 = vmmov 0  }
  0xb7   :  { %v210_v1 = vld [vmem:[#allocation3 + $0x20] sm:$0xff]  ;;  %v193_v54 = vld [vmem:[%s8731_s0 + $0x18] sm:$0xff]  ;;  %v8527_v58 = vpack.c.bf16 %v191_v53, %v191_v53 }
  0xb8   :  { %v334_v2 = vld [vmem:[#allocation3 + $0x400] sm:$0xff]  ;;  %v6601_v3 = vcombine.high %v206_v0, %v210_v1  ;;  %v6600_v5 = vcombine.low %v206_v0, %v210_v1  ;;  %v8529_v59 = vpack.c.bf16 %v193_v54, %v193_v54 }
  0xb9   :  { %v338_v4 = vld [vmem:[#allocation3 + $0x420] sm:$0xff]  ;;  %3310 = vmatprep.mubr.bf16.mxu0 %v8527_v58 }
  0xba   :  { %v214_v6 = vld [vmem:[#allocation3 + $0x40] sm:$0xff]  ;;  %v6729_v8 = vcombine.high %v334_v2, %v338_v4  ;;  %v6728_v9 = vcombine.low %v334_v2, %v338_v4  ;;  %3278 = vmatprep.subr.bf16.mxu0 %v6601_v3  ;;  %3351 = vmatprep.mubr.bf16.mxu1 %v8529_v59 }
  0xbb   :  { %v218_v7 = vld [vmem:[#allocation3 + $0x60] sm:$0xff]  ;;  %3279 = vmatpush1.bf16.msra.mxu0 %v6600_v5 }
  0xbc   :  { %v6609_v10 = vcombine.high %v214_v6, %v218_v7  ;;  %v342_v11 = vld [vmem:[#allocation3 + $0x440] sm:$0xff]  ;;  %3319 = vmatprep.subr.bf16.mxu1 %v6729_v8  ;;  %v6608_v18 = vcombine.low %v214_v6, %v218_v7 }
  0xbd   :  { %v346_v12 = vld [vmem:[#allocation3 + $0x460] sm:$0xff]  ;;  %3320 = vmatpush1.bf16.msra.mxu1 %v6728_v9 }
  0xbe   :  { %v222_v13 = vld [vmem:[#allocation3 + $0x80] sm:$0xff]  ;;  %v6737_v14 = vcombine.high %v342_v11, %v346_v12  ;;  %3280 = vmatprep.subr.bf16.mxu0 %v6609_v10  ;;  %v6736_v19 = vcombine.low %v342_v11, %v346_v12 }
  0xbf   :  { %v226_v15 = vld [vmem:[#allocation3 + $0xa0] sm:$0xff]  ;;  %3281 = vmatpush1.bf16.msra.mxu0 %v6608_v18 }
  0xc0   :  { %v350_v16 = vld [vmem:[#allocation3 + $0x480] sm:$0xff]  ;;  %v6617_v20 = vcombine.high %v222_v13, %v226_v15  ;;  %3321 = vmatprep.subr.bf16.mxu1 %v6737_v14  ;;  %v6616_v26 = vcombine.low %v222_v13, %v226_v15 }
  0xc1   :  { %v354_v17 = vld [vmem:[#allocation3 + $0x4a0] sm:$0xff]  ;;  %3322 = vmatpush1.bf16.msra.mxu1 %v6736_v19 }
  0xc2   :  { %v6745_v21 = vcombine.high %v350_v16, %v354_v17  ;;  %v230_v22 = vld [vmem:[#allocation3 + $0xc0] sm:$0xff]  ;;  %3282 = vmatprep.subr.bf16.mxu0 %v6617_v20  ;;  %v6744_v27 = vcombine.low %v350_v16, %v354_v17 }
  0xc3   :  { %v234_v23 = vld [vmem:[#allocation3 + $0xe0] sm:$0xff]  ;;  %3283 = vmatpush1.bf16.msra.mxu0 %v6616_v26 }
  0xc4   :  { %v358_v24 = vld [vmem:[#allocation3 + $0x4c0] sm:$0xff]  ;;  %v6625_v28 = vcombine.high %v230_v22, %v234_v23  ;;  %3323 = vmatprep.subr.bf16.mxu1 %v6745_v21  ;;  %v6624_v34 = vcombine.low %v230_v22, %v234_v23 }
  0xc5   :  { %v362_v25 = vld [vmem:[#allocation3 + $0x4e0] sm:$0xff]  ;;  %3324 = vmatpush1.bf16.msra.mxu1 %v6744_v27 }
  0xc6   :  { %v6753_v29 = vcombine.high %v358_v24, %v362_v25  ;;  %v238_v30 = vld [vmem:[#allocation3 + $0x100] sm:$0xff]  ;;  %3284 = vmatprep.subr.bf16.mxu0 %v6625_v28  ;;  %v6752_v35 = vcombine.low %v358_v24, %v362_v25 }
  0xc7   :  { %v242_v31 = vld [vmem:[#allocation3 + $0x120] sm:$0xff]  ;;  %3285 = vmatpush1.bf16.msra.mxu0 %v6624_v34 }
  0xc8   :  { %v366_v32 = vld [vmem:[#allocation3 + $0x500] sm:$0xff]  ;;  %v6633_v36 = vcombine.high %v238_v30, %v242_v31  ;;  %3325 = vmatprep.subr.bf16.mxu1 %v6753_v29  ;;  %v6632_v42 = vcombine.low %v238_v30, %v242_v31 }
  0xc9   :  { %v370_v33 = vld [vmem:[#allocation3 + $0x520] sm:$0xff]  ;;  %3326 = vmatpush1.bf16.msra.mxu1 %v6752_v35 }
  0xca   :  { %v6761_v37 = vcombine.high %v366_v32, %v370_v33  ;;  %v246_v38 = vld [vmem:[#allocation3 + $0x140] sm:$0xff]  ;;  %3286 = vmatprep.subr.bf16.mxu0 %v6633_v36  ;;  %v6760_v43 = vcombine.low %v366_v32, %v370_v33 }
  0xcb   :  { %v250_v39 = vld [vmem:[#allocation3 + $0x160] sm:$0xff]  ;;  %3287 = vmatpush1.bf16.msra.mxu0 %v6632_v42 }
  0xcc   :  { %v374_v40 = vld [vmem:[#allocation3 + $0x540] sm:$0xff]  ;;  %v6641_v44 = vcombine.high %v246_v38, %v250_v39  ;;  %3327 = vmatprep.subr.bf16.mxu1 %v6761_v37  ;;  %v6640_v50 = vcombine.low %v246_v38, %v250_v39 }
  0xcd   :  { %v378_v41 = vld [vmem:[#allocation3 + $0x560] sm:$0xff]  ;;  %3328 = vmatpush1.bf16.msra.mxu1 %v6760_v43 }
  0xce   :  { %v6769_v45 = vcombine.high %v374_v40, %v378_v41  ;;  %v254_v46 = vld [vmem:[#allocation3 + $0x180] sm:$0xff]  ;;  %3288 = vmatprep.subr.bf16.mxu0 %v6641_v44  ;;  %v6768_v51 = vcombine.low %v374_v40, %v378_v41 }
  0xcf   :  { %v258_v47 = vld [vmem:[#allocation3 + $0x1a0] sm:$0xff]  ;;  %3289 = vmatpush1.bf16.msra.mxu0 %v6640_v50 }
  0xd0   :  { %v382_v48 = vld [vmem:[#allocation3 + $0x580] sm:$0xff]  ;;  %v6649_v52 = vcombine.high %v254_v46, %v258_v47  ;;  %3329 = vmatprep.subr.bf16.mxu1 %v6769_v45  ;;  %v6648_v62 = vcombine.low %v254_v46, %v258_v47 }
  0xd1   :  { %v386_v49 = vld [vmem:[#allocation3 + $0x5a0] sm:$0xff]  ;;  %3330 = vmatpush1.bf16.msra.mxu1 %v6768_v51 }
  0xd2   :  { %v6777_v55 = vcombine.high %v382_v48, %v386_v49  ;;  %v262_v56 = vld [vmem:[#allocation3 + $0x1c0] sm:$0xff]  ;;  %3290 = vmatprep.subr.bf16.mxu0 %v6649_v52  ;;  %v6776_v63 = vcombine.low %v382_v48, %v386_v49 }
  0xd3   :  { %v266_v57 = vld [vmem:[#allocation3 + $0x1e0] sm:$0xff]  ;;  %3291 = vmatpush1.bf16.msra.mxu0 %v6648_v62 }
  0xd4   :  { %v390_v60 = vld [vmem:[#allocation3 + $0x5c0] sm:$0xff]  ;;  %v6657_v0 = vcombine.high %v262_v56, %v266_v57  ;;  %3331 = vmatprep.subr.bf16.mxu1 %v6777_v55  ;;  %v6656_v6 = vcombine.low %v262_v56, %v266_v57 }
  0xd5   :  { %v394_v61 = vld [vmem:[#allocation3 + $0x5e0] sm:$0xff]  ;;  %3332 = vmatpush1.bf16.msra.mxu1 %v6776_v63 }
  0xd6   :  { %v6785_v1 = vcombine.high %v390_v60, %v394_v61  ;;  %v270_v2 = vld [vmem:[#allocation3 + $0x200] sm:$0xff]  ;;  %3292 = vmatprep.subr.bf16.mxu0 %v6657_v0  ;;  %v6784_v7 = vcombine.low %v390_v60, %v394_v61 }
  0xd7   :  { %v274_v3 = vld [vmem:[#allocation3 + $0x220] sm:$0xff]  ;;  %3293 = vmatpush1.bf16.msra.mxu0 %v6656_v6 }
  0xd8   :  { %v398_v4 = vld [vmem:[#allocation3 + $0x600] sm:$0xff]  ;;  %v6665_v8 = vcombine.high %v270_v2, %v274_v3  ;;  %3333 = vmatprep.subr.bf16.mxu1 %v6785_v1  ;;  %v6664_v14 = vcombine.low %v270_v2, %v274_v3 }
  0xd9   :  { %v402_v5 = vld [vmem:[#allocation3 + $0x620] sm:$0xff]  ;;  %3334 = vmatpush1.bf16.msra.mxu1 %v6784_v7 }
  0xda   :  { %v6793_v9 = vcombine.high %v398_v4, %v402_v5  ;;  %v278_v10 = vld [vmem:[#allocation3 + $0x240] sm:$0xff]  ;;  %3294 = vmatprep.subr.bf16.mxu0 %v6665_v8  ;;  %v6792_v15 = vcombine.low %v398_v4, %v402_v5 }
  0xdb   :  { %v282_v11 = vld [vmem:[#allocation3 + $0x260] sm:$0xff]  ;;  %3295 = vmatpush1.bf16.msra.mxu0 %v6664_v14 }
  0xdc   :  { %v406_v12 = vld [vmem:[#allocation3 + $0x640] sm:$0xff]  ;;  %v6673_v16 = vcombine.high %v278_v10, %v282_v11  ;;  %3335 = vmatprep.subr.bf16.mxu1 %v6793_v9  ;;  %v6672_v22 = vcombine.low %v278_v10, %v282_v11  ;;  %v192_v11 = vld [vmem:[%s8731_s0 + $0x10] sm:$0xff] }
  0xdd   :  { %v410_v13 = vld [vmem:[#allocation3 + $0x660] sm:$0xff]  ;;  %3336 = vmatpush1.bf16.msra.mxu1 %v6792_v15 }
  0xde   :  { %v6801_v17 = vcombine.high %v406_v12, %v410_v13  ;;  %v286_v18 = vld [vmem:[#allocation3 + $0x280] sm:$0xff]  ;;  %3296 = vmatprep.subr.bf16.mxu0 %v6673_v16  ;;  %v6800_v23 = vcombine.low %v406_v12, %v410_v13 }
  0xdf   :  { %v290_v19 = vld [vmem:[#allocation3 + $0x2a0] sm:$0xff]  ;;  %3297 = vmatpush1.bf16.msra.mxu0 %v6672_v22  ;;  %v197_v22 = vld [vmem:[%s8731_s0 + $0x38] sm:$0xff] }
  0xe0   :  { %v414_v20 = vld [vmem:[#allocation3 + $0x680] sm:$0xff]  ;;  %v6681_v24 = vcombine.high %v286_v18, %v290_v19  ;;  %3337 = vmatprep.subr.bf16.mxu1 %v6801_v17  ;;  %v6680_v30 = vcombine.low %v286_v18, %v290_v19  ;;  %v195_v19 = vld [vmem:[%s8731_s0 + $0x28] sm:$0xff] }
  0xe1   :  { %v418_v21 = vld [vmem:[#allocation3 + $0x6a0] sm:$0xff]  ;;  %3338 = vmatpush1.bf16.msra.mxu1 %v6800_v23 }
  0xe2   :  { %v6809_v25 = vcombine.high %v414_v20, %v418_v21  ;;  %v294_v26 = vld [vmem:[#allocation3 + $0x2c0] sm:$0xff]  ;;  %3298 = vmatprep.subr.bf16.mxu0 %v6681_v24  ;;  %v6808_v31 = vcombine.low %v414_v20, %v418_v21  ;;  %v8544_v20 = vpack.c.bf16 %v192_v11, %v192_v11 }
  0xe3   :  { %v298_v27 = vld [vmem:[#allocation3 + $0x2e0] sm:$0xff]  ;;  %3299 = vmatpush1.bf16.msra.mxu0 %v6680_v30 }
  0xe4   :  { %v422_v28 = vld [vmem:[#allocation3 + $0x6c0] sm:$0xff]  ;;  %v6689_v32 = vcombine.high %v294_v26, %v298_v27  ;;  %3339 = vmatprep.subr.bf16.mxu1 %v6809_v25  ;;  %v6688_v38 = vcombine.low %v294_v26, %v298_v27 }
  0xe5   :  { %v426_v29 = vld [vmem:[#allocation3 + $0x6e0] sm:$0xff]  ;;  %3340 = vmatpush1.bf16.msra.mxu1 %v6808_v31  ;;  %v8552_v31 = vpack.c.bf16 %v197_v22, %v197_v22 }
  0xe6   :  { %v6817_v33 = vcombine.high %v422_v28, %v426_v29  ;;  %v302_v34 = vld [vmem:[#allocation3 + $0x300] sm:$0xff]  ;;  %3300 = vmatprep.subr.bf16.mxu0 %v6689_v32  ;;  %v6816_v39 = vcombine.low %v422_v28, %v426_v29  ;;  %v8549_v28 = vpack.c.bf16 %v195_v19, %v195_v19 }
  0xe7   :  { %v306_v35 = vld [vmem:[#allocation3 + $0x320] sm:$0xff]  ;;  %3301 = vmatpush1.bf16.msra.mxu0 %v6688_v38 }
  0xe8   :  { %v430_v36 = vld [vmem:[#allocation3 + $0x700] sm:$0xff]  ;;  %v6697_v40 = vcombine.high %v302_v34, %v306_v35  ;;  %3341 = vmatprep.subr.bf16.mxu1 %v6817_v33  ;;  %v6696_v46 = vcombine.low %v302_v34, %v306_v35 }
  0xe9   :  { %v434_v37 = vld [vmem:[#allocation3 + $0x720] sm:$0xff]  ;;  %3342 = vmatpush1.bf16.msra.mxu1 %v6816_v39 }
  0xea   :  { %v6825_v41 = vcombine.high %v430_v36, %v434_v37  ;;  %v310_v42 = vld [vmem:[#allocation3 + $0x340] sm:$0xff]  ;;  %3302 = vmatprep.subr.bf16.mxu0 %v6697_v40  ;;  %v6824_v47 = vcombine.low %v430_v36, %v434_v37 }
  0xeb   :  { %v314_v43 = vld [vmem:[#allocation3 + $0x360] sm:$0xff]  ;;  %3303 = vmatpush1.bf16.msra.mxu0 %v6696_v46 }
  0xec   :  { %v438_v44 = vld [vmem:[#allocation3 + $0x740] sm:$0xff]  ;;  %v6705_v48 = vcombine.high %v310_v42, %v314_v43  ;;  %3343 = vmatprep.subr.bf16.mxu1 %v6825_v41  ;;  %v6704_v54 = vcombine.low %v310_v42, %v314_v43 }
  0xed   :  { %v442_v45 = vld [vmem:[#allocation3 + $0x760] sm:$0xff]  ;;  %3344 = vmatpush1.bf16.msra.mxu1 %v6824_v47 }
  0xee   :  { %v6833_v49 = vcombine.high %v438_v44, %v442_v45  ;;  %v318_v50 = vld [vmem:[#allocation3 + $0x380] sm:$0xff]  ;;  %3304 = vmatprep.subr.bf16.mxu0 %v6705_v48  ;;  %v6832_v55 = vcombine.low %v438_v44, %v442_v45 }
  0xef   :  { %v322_v51 = vld [vmem:[#allocation3 + $0x3a0] sm:$0xff]  ;;  %3305 = vmatpush1.bf16.msra.mxu0 %v6704_v54 }
  0xf0   :  { %v446_v52 = vld [vmem:[#allocation3 + $0x780] sm:$0xff]  ;;  %v6713_v56 = vcombine.high %v318_v50, %v322_v51  ;;  %3345 = vmatprep.subr.bf16.mxu1 %v6833_v49  ;;  %v6712_v0 = vcombine.low %v318_v50, %v322_v51 }
  0xf1   :  { %v450_v53 = vld [vmem:[#allocation3 + $0x7a0] sm:$0xff]  ;;  %3346 = vmatpush1.bf16.msra.mxu1 %v6832_v55 }
  0xf2   :  { %v6841_v57 = vcombine.high %v446_v52, %v450_v53  ;;  %v326_v60 = vld [vmem:[#allocation3 + $0x3c0] sm:$0xff]  ;;  %3306 = vmatprep.subr.bf16.mxu0 %v6713_v56  ;;  %v6840_v1 = vcombine.low %v446_v52, %v450_v53 }
  0xf3   :  { %v330_v61 = vld [vmem:[#allocation3 + $0x3e0] sm:$0xff]  ;;  %3307 = vmatpush1.bf16.msra.mxu0 %v6712_v0 }
  0xf4   :  { %v454_v62 = vld [vmem:[#allocation3 + $0x7c0] sm:$0xff]  ;;  %v6721_v2 = vcombine.high %v326_v60, %v330_v61  ;;  %3347 = vmatprep.subr.bf16.mxu1 %v6841_v57  ;;  %v6720_v8 = vcombine.low %v326_v60, %v330_v61 }
  0xf5   :  { %v458_v63 = vld [vmem:[#allocation3 + $0x7e0] sm:$0xff]  ;;  %3348 = vmatpush1.bf16.msra.mxu1 %v6840_v1 }
  0xf6   :  { %v6849_v3 = vcombine.high %v454_v62, %v458_v63  ;;  %v462_v4 = vld [vmem:[#allocation3 + $0x800] sm:$0xff]  ;;  %3308 = vmatprep.subr.bf16.mxu0 %v6721_v2  ;;  %v6848_v10 = vcombine.low %v454_v62, %v458_v63 }
  0xf7   :  { %v466_v5 = vld [vmem:[#allocation3 + $0x820] sm:$0xff]  ;;  %3309 = vmatpush1.bf16.msra.mxu0 %v6720_v8 }
  0xf8   :  { %v590_v6 = vld [vmem:[#allocation3 + $0xc00] sm:$0xff]  ;;  %v6857_v12 = vcombine.high %v462_v4, %v466_v5  ;;  %3349 = vmatprep.subr.bf16.mxu1 %v6849_v3  ;;  %v6856_v21 = vcombine.low %v462_v4, %v466_v5 }
  0xf9   :  { %v594_v7 = vld [vmem:[#allocation3 + $0xc20] sm:$0xff]  ;;  %3350 = vmatpush1.bf16.msra.mxu1 %v6848_v10 }
  0xfa   :  { %v190_v9 = vld [vmem:[%s8731_s0] sm:$0xff]  ;;  %v6985_v13 = vcombine.high %v590_v6, %v594_v7  ;;  %3360 = vmatprep.subr.bf16.mxu0 %v6857_v12  ;;  %v6984_v23 = vcombine.low %v590_v6, %v594_v7 }
  0xfb   :  { %v470_v14 = vld [vmem:[#allocation3 + $0x840] sm:$0xff]  ;;  %v8539_v16 = vpack.c.bf16 %v190_v9, %v190_v9 }
  0xfc   :  { %v474_v15 = vld [vmem:[#allocation3 + $0x860] sm:$0xff]  ;;  %3401 = vmatprep.subr.bf16.mxu1 %v6985_v13  ;;  %3352 = vmatmul.mubr.bf16.vlgmr.msra.gmra.mrb[0].mxu1 %v8544_v20 }
  0xfd   :  { %v598_v17 = vld [vmem:[#allocation3 + $0xc40] sm:$0xff]  ;;  %v6865_v24 = vcombine.high %v470_v14, %v474_v15  ;;  %3311 = vmatmul.mubr.bf16.vlgmr.msra.gmra.mrb[0].mxu0 %v8539_v16  ;;  %v6864_v32 = vcombine.low %v470_v14, %v474_v15  ;;  %3402 = vmatpush1.bf16.msra.mxu1 %v6984_v23 }
  0xfe   :  { %v602_v18 = vld [vmem:[#allocation3 + $0xc60] sm:$0xff]  ;;  %3361 = vmatpush1.bf16.msra.mxu0 %v6856_v21  ;;  %3392 = vmatprep.mubr.bf16.mxu0 %v8549_v28 }
  0xff   :  { %v6993_v25 = vcombine.high %v598_v17, %v602_v18  ;;  %v478_v26 = vld [vmem:[#allocation3 + $0x880] sm:$0xff]  ;;  %3362 = vmatprep.subr.bf16.mxu0 %v6865_v24  ;;  %v6992_v33 = vcombine.low %v598_v17, %v602_v18  ;;  %3433 = vmatprep.mubr.bf16.mxu1 %v8552_v31 }
 0x100   :  { %v482_v27 = vld [vmem:[#allocation3 + $0x8a0] sm:$0xff] }
 0x101   :  { %v606_v29 = vld [vmem:[#allocation3 + $0xc80] sm:$0xff]  ;;  %v6873_v34 = vcombine.high %v478_v26, %v482_v27  ;;  %3403 = vmatprep.subr.bf16.mxu1 %v6993_v25  ;;  %v6872_v40 = vcombine.low %v478_v26, %v482_v27 }
 0x102   :  { %v610_v30 = vld [vmem:[#allocation3 + $0xca0] sm:$0xff]  ;;  %3363 = vmatpush1.bf16.msra.mxu0 %v6864_v32  ;;  %3404 = vmatpush1.bf16.msra.mxu1 %v6992_v33 }
 0x103   :  { %v486_v35 = vld [vmem:[#allocation3 + $0x8c0] sm:$0xff]  ;;  %v7001_v38 = vcombine.high %v606_v29, %v610_v30  ;;  %3364 = vmatprep.subr.bf16.mxu0 %v6873_v34  ;;  %v7000_v41 = vcombine.low %v606_v29, %v610_v30 }
 0x104   :  { %v490_v36 = vld [vmem:[#allocation3 + $0x8e0] sm:$0xff] }
 0x105   :  { %v614_v37 = vld [vmem:[#allocation3 + $0xcc0] sm:$0xff]  ;;  %v6881_v42 = vcombine.high %v486_v35, %v490_v36  ;;  %3405 = vmatprep.subr.bf16.mxu1 %v7001_v38  ;;  %v6880_v48 = vcombine.low %v486_v35, %v490_v36 }
 0x106   :  { %v618_v39 = vld [vmem:[#allocation3 + $0xce0] sm:$0xff]  ;;  %3365 = vmatpush1.bf16.msra.mxu0 %v6872_v40  ;;  %3406 = vmatpush1.bf16.msra.mxu1 %v7000_v41 }
 0x107   :  { %v494_v43 = vld [vmem:[#allocation3 + $0x900] sm:$0xff]  ;;  %v7009_v46 = vcombine.high %v614_v37, %v618_v39  ;;  %3366 = vmatprep.subr.bf16.mxu0 %v6881_v42  ;;  %v7008_v49 = vcombine.low %v614_v37, %v618_v39 }
 0x108   :  { %v498_v44 = vld [vmem:[#allocation3 + $0x920] sm:$0xff] }
 0x109   :  { %v622_v45 = vld [vmem:[#allocation3 + $0xd00] sm:$0xff]  ;;  %v6889_v50 = vcombine.high %v494_v43, %v498_v44  ;;  %3407 = vmatprep.subr.bf16.mxu1 %v7009_v46  ;;  %v6888_v56 = vcombine.low %v494_v43, %v498_v44 }
 0x10a   :  { %v626_v47 = vld [vmem:[#allocation3 + $0xd20] sm:$0xff]  ;;  %3367 = vmatpush1.bf16.msra.mxu0 %v6880_v48  ;;  %3408 = vmatpush1.bf16.msra.mxu1 %v7008_v49 }
 0x10b   :  { %v502_v51 = vld [vmem:[#allocation3 + $0x940] sm:$0xff]  ;;  %v7017_v54 = vcombine.high %v622_v45, %v626_v47  ;;  %3368 = vmatprep.subr.bf16.mxu0 %v6889_v50  ;;  %v7016_v57 = vcombine.low %v622_v45, %v626_v47 }
 0x10c   :  { %v506_v52 = vld [vmem:[#allocation3 + $0x960] sm:$0xff] }
 0x10d   :  { %v630_v53 = vld [vmem:[#allocation3 + $0xd40] sm:$0xff]  ;;  %v6897_v60 = vcombine.high %v502_v51, %v506_v52  ;;  %3409 = vmatprep.subr.bf16.mxu1 %v7017_v54  ;;  %v6896_v2 = vcombine.low %v502_v51, %v506_v52 }
 0x10e   :  { %v634_v55 = vld [vmem:[#allocation3 + $0xd60] sm:$0xff]  ;;  %3369 = vmatpush1.bf16.msra.mxu0 %v6888_v56  ;;  %3410 = vmatpush1.bf16.msra.mxu1 %v7016_v57 }
 0x10f   :  { %v510_v61 = vld [vmem:[#allocation3 + $0x980] sm:$0xff]  ;;  %v7025_v0 = vcombine.high %v630_v53, %v634_v55  ;;  %3370 = vmatprep.subr.bf16.mxu0 %v6897_v60  ;;  %v7024_v3 = vcombine.low %v630_v53, %v634_v55 }
 0x110   :  { %v514_v62 = vld [vmem:[#allocation3 + $0x9a0] sm:$0xff] }
 0x111   :  { %v638_v63 = vld [vmem:[#allocation3 + $0xd80] sm:$0xff]  ;;  %v6905_v4 = vcombine.high %v510_v61, %v514_v62  ;;  %3411 = vmatprep.subr.bf16.mxu1 %v7025_v0  ;;  %v6904_v10 = vcombine.low %v510_v61, %v514_v62 }
 0x112   :  { %v642_v1 = vld [vmem:[#allocation3 + $0xda0] sm:$0xff]  ;;  %3371 = vmatpush1.bf16.msra.mxu0 %v6896_v2  ;;  %3412 = vmatpush1.bf16.msra.mxu1 %v7024_v3 }
 0x113   :  { %v518_v5 = vld [vmem:[#allocation3 + $0x9c0] sm:$0xff]  ;;  %v7033_v8 = vcombine.high %v638_v63, %v642_v1  ;;  %3372 = vmatprep.subr.bf16.mxu0 %v6905_v4  ;;  %v7032_v11 = vcombine.low %v638_v63, %v642_v1 }
 0x114   :  { %v522_v6 = vld [vmem:[#allocation3 + $0x9e0] sm:$0xff] }
 0x115   :  { %v646_v7 = vld [vmem:[#allocation3 + $0xdc0] sm:$0xff]  ;;  %v6913_v12 = vcombine.high %v518_v5, %v522_v6  ;;  %3413 = vmatprep.subr.bf16.mxu1 %v7033_v8  ;;  %v6912_v19 = vcombine.low %v518_v5, %v522_v6 }
 0x116   :  { %v650_v9 = vld [vmem:[#allocation3 + $0xde0] sm:$0xff]  ;;  %3373 = vmatpush1.bf16.msra.mxu0 %v6904_v10  ;;  %3414 = vmatpush1.bf16.msra.mxu1 %v7032_v11 }
 0x117   :  { %v526_v13 = vld [vmem:[#allocation3 + $0xa00] sm:$0xff]  ;;  %v7041_v17 = vcombine.high %v646_v7, %v650_v9  ;;  %3374 = vmatprep.subr.bf16.mxu0 %v6913_v12  ;;  %v7040_v21 = vcombine.low %v646_v7, %v650_v9 }
 0x118   :  { %v530_v14 = vld [vmem:[#allocation3 + $0xa20] sm:$0xff] }
 0x119   :  { %v654_v15 = vld [vmem:[#allocation3 + $0xe00] sm:$0xff]  ;;  %v6921_v22 = vcombine.high %v526_v13, %v530_v14  ;;  %3415 = vmatprep.subr.bf16.mxu1 %v7041_v17  ;;  %v6920_v29 = vcombine.low %v526_v13, %v530_v14 }
 0x11a   :  { %v658_v18 = vld [vmem:[#allocation3 + $0xe20] sm:$0xff]  ;;  %3375 = vmatpush1.bf16.msra.mxu0 %v6912_v19  ;;  %3416 = vmatpush1.bf16.msra.mxu1 %v7040_v21  ;;  %v207_v21 = vld [vmem:[#allocation3 + $0x8] sm:$0xff] }
 0x11b   :  { %v534_v23 = vld [vmem:[#allocation3 + $0xa40] sm:$0xff]  ;;  %v7049_v26 = vcombine.high %v654_v15, %v658_v18  ;;  %3376 = vmatprep.subr.bf16.mxu0 %v6921_v22  ;;  %v7048_v30 = vcombine.low %v654_v15, %v658_v18  ;;  %v211_v22 = vld [vmem:[#allocation3 + $0x28] sm:$0xff] }
 0x11c   :  { %v538_v24 = vld [vmem:[#allocation3 + $0xa60] sm:$0xff] }
 0x11d   :  { %v662_v25 = vld [vmem:[#allocation3 + $0xe40] sm:$0xff]  ;;  %v6929_v32 = vcombine.high %v534_v23, %v538_v24  ;;  %3417 = vmatprep.subr.bf16.mxu1 %v7049_v26  ;;  %v6928_v38 = vcombine.low %v534_v23, %v538_v24  ;;  %v335_v23 = vld [vmem:[#allocation3 + $0x408] sm:$0xff] }
 0x11e   :  { %v666_v27 = vld [vmem:[#allocation3 + $0xe60] sm:$0xff]  ;;  %3377 = vmatpush1.bf16.msra.mxu0 %v6920_v29  ;;  %3418 = vmatpush1.bf16.msra.mxu1 %v7048_v30  ;;  %v339_v26 = vld [vmem:[#allocation3 + $0x428] sm:$0xff] }
 0x11f   :  { %v542_v33 = vld [vmem:[#allocation3 + $0xa80] sm:$0xff]  ;;  %v7057_v36 = vcombine.high %v662_v25, %v666_v27  ;;  %3378 = vmatprep.subr.bf16.mxu0 %v6929_v32  ;;  %v7056_v39 = vcombine.low %v662_v25, %v666_v27  ;;  %v196_v27 = vld [vmem:[%s8731_s0 + $0x30] sm:$0xff]  ;;  %v6603_v32 = vcombine.high %v207_v21, %v211_v22 }
 0x120   :  { %v546_v34 = vld [vmem:[#allocation3 + $0xaa0] sm:$0xff] }
 0x121   :  { %v670_v35 = vld [vmem:[#allocation3 + $0xe80] sm:$0xff]  ;;  %v6937_v40 = vcombine.high %v542_v33, %v546_v34  ;;  %3419 = vmatprep.subr.bf16.mxu1 %v7057_v36  ;;  %v6936_v46 = vcombine.low %v542_v33, %v546_v34  ;;  %v215_v33 = vld [vmem:[#allocation3 + $0x48] sm:$0xff]  ;;  %v6731_v36 = vcombine.high %v335_v23, %v339_v26 }
 0x122   :  { %v674_v37 = vld [vmem:[#allocation3 + $0xea0] sm:$0xff]  ;;  %3379 = vmatpush1.bf16.msra.mxu0 %v6928_v38  ;;  %3420 = vmatpush1.bf16.msra.mxu1 %v7056_v39  ;;  %v219_v34 = vld [vmem:[#allocation3 + $0x68] sm:$0xff]  ;;  %v8565_v39 = vpack.c.bf16 %v196_v27, %v196_v27 }
 0x123   :  { %v550_v41 = vld [vmem:[#allocation3 + $0xac0] sm:$0xff]  ;;  %v7065_v44 = vcombine.high %v670_v35, %v674_v37  ;;  %3380 = vmatprep.subr.bf16.mxu0 %v6937_v40  ;;  %v7064_v47 = vcombine.low %v670_v35, %v674_v37  ;;  %v343_v35 = vld [vmem:[#allocation3 + $0x448] sm:$0xff]  ;;  %v6602_v40 = vcombine.low %v207_v21, %v211_v22 }
 0x124   :  { %v554_v42 = vld [vmem:[#allocation3 + $0xae0] sm:$0xff]  ;;  %v347_v37 = vld [vmem:[#allocation3 + $0x468] sm:$0xff] }
 0x125   :  { %v678_v43 = vld [vmem:[#allocation3 + $0xec0] sm:$0xff]  ;;  %v6945_v48 = vcombine.high %v550_v41, %v554_v42  ;;  %3421 = vmatprep.subr.bf16.mxu1 %v7065_v44  ;;  %v6944_v54 = vcombine.low %v550_v41, %v554_v42  ;;  %v6730_v41 = vcombine.low %v335_v23, %v339_v26  ;;  %v6611_v42 = vcombine.high %v215_v33, %v219_v34  ;;  %v227_v44 = vld [vmem:[#allocation3 + $0xa8] sm:$0xff] }
 0x126   :  { %v682_v45 = vld [vmem:[#allocation3 + $0xee0] sm:$0xff]  ;;  %3381 = vmatpush1.bf16.msra.mxu0 %v6936_v46  ;;  %3422 = vmatpush1.bf16.msra.mxu1 %v7064_v47  ;;  %v6739_v46 = vcombine.high %v343_v35, %v347_v37  ;;  %v355_v47 = vld [vmem:[#allocation3 + $0x4a8] sm:$0xff] }
 0x127   :  { %v558_v49 = vld [vmem:[#allocation3 + $0xb00] sm:$0xff]  ;;  %v7073_v52 = vcombine.high %v678_v43, %v682_v45  ;;  %3382 = vmatprep.subr.bf16.mxu0 %v6945_v48  ;;  %v7072_v55 = vcombine.low %v678_v43, %v682_v45  ;;  %v223_v43 = vld [vmem:[#allocation3 + $0x88] sm:$0xff]  ;;  %v6610_v48 = vcombine.low %v215_v33, %v219_v34 }
 0x128   :  { %v562_v50 = vld [vmem:[#allocation3 + $0xb20] sm:$0xff]  ;;  %v351_v45 = vld [vmem:[#allocation3 + $0x488] sm:$0xff] }
 0x129   :  { %v686_v51 = vld [vmem:[#allocation3 + $0xf00] sm:$0xff]  ;;  %v6953_v56 = vcombine.high %v558_v49, %v562_v50  ;;  %3423 = vmatprep.subr.bf16.mxu1 %v7073_v52  ;;  %v6952_v0 = vcombine.low %v558_v49, %v562_v50  ;;  %v6738_v49 = vcombine.low %v343_v35, %v347_v37  ;;  %v6619_v50 = vcombine.high %v223_v43, %v227_v44  ;;  %v235_v52 = vld [vmem:[#allocation3 + $0xe8] sm:$0xff] }
 0x12a   :  { %v690_v53 = vld [vmem:[#allocation3 + $0xf20] sm:$0xff]  ;;  %3383 = vmatpush1.bf16.msra.mxu0 %v6944_v54  ;;  %3424 = vmatpush1.bf16.msra.mxu1 %v7072_v55  ;;  %v6747_v54 = vcombine.high %v351_v45, %v355_v47  ;;  %v363_v55 = vld [vmem:[#allocation3 + $0x4e8] sm:$0xff] }
 0x12b   :  { %v566_v57 = vld [vmem:[#allocation3 + $0xb40] sm:$0xff]  ;;  %v7081_v62 = vcombine.high %v686_v51, %v690_v53  ;;  %3384 = vmatprep.subr.bf16.mxu0 %v6953_v56  ;;  %v7080_v1 = vcombine.low %v686_v51, %v690_v53  ;;  %v231_v51 = vld [vmem:[#allocation3 + $0xc8] sm:$0xff]  ;;  %v6618_v56 = vcombine.low %v223_v43, %v227_v44 }
 0x12c   :  { %v570_v60 = vld [vmem:[#allocation3 + $0xb60] sm:$0xff]  ;;  %v359_v53 = vld [vmem:[#allocation3 + $0x4c8] sm:$0xff] }
 0x12d   :  { %v694_v61 = vld [vmem:[#allocation3 + $0xf40] sm:$0xff]  ;;  %v6961_v2 = vcombine.high %v566_v57, %v570_v60  ;;  %3425 = vmatprep.subr.bf16.mxu1 %v7081_v62  ;;  %v6960_v8 = vcombine.low %v566_v57, %v570_v60  ;;  %v6746_v57 = vcombine.low %v351_v45, %v355_v47  ;;  %v6627_v60 = vcombine.high %v231_v51, %v235_v52  ;;  %v243_v62 = vld [vmem:[#allocation3 + $0x128] sm:$0xff] }
 0x12e   :  { %v698_v63 = vld [vmem:[#allocation3 + $0xf60] sm:$0xff]  ;;  %3385 = vmatpush1.bf16.msra.mxu0 %v6952_v0  ;;  %3426 = vmatpush1.bf16.msra.mxu1 %v7080_v1  ;;  %v6755_v0 = vcombine.high %v359_v53, %v363_v55  ;;  %v371_v1 = vld [vmem:[#allocation3 + $0x528] sm:$0xff] }
 0x12f   :  { %v574_v3 = vld [vmem:[#allocation3 + $0xb80] sm:$0xff]  ;;  %v7089_v6 = vcombine.high %v694_v61, %v698_v63  ;;  %3386 = vmatprep.subr.bf16.mxu0 %v6961_v2  ;;  %v7088_v9 = vcombine.low %v694_v61, %v698_v63  ;;  %v239_v61 = vld [vmem:[#allocation3 + $0x108] sm:$0xff]  ;;  %v6626_v2 = vcombine.low %v231_v51, %v235_v52 }
 0x130   :  { %v578_v4 = vld [vmem:[#allocation3 + $0xba0] sm:$0xff]  ;;  %v367_v63 = vld [vmem:[#allocation3 + $0x508] sm:$0xff] }
 0x131   :  { %v702_v5 = vld [vmem:[#allocation3 + $0xf80] sm:$0xff]  ;;  %v6969_v10 = vcombine.high %v574_v3, %v578_v4  ;;  %3427 = vmatprep.subr.bf16.mxu1 %v7089_v6  ;;  %v6968_v17 = vcombine.low %v574_v3, %v578_v4  ;;  %v6754_v3 = vcombine.low %v359_v53, %v363_v55  ;;  %v6635_v4 = vcombine.high %v239_v61, %v243_v62  ;;  %v251_v6 = vld [vmem:[#allocation3 + $0x168] sm:$0xff] }
 0x132   :  { %v706_v7 = vld [vmem:[#allocation3 + $0xfa0] sm:$0xff]  ;;  %3387 = vmatpush1.bf16.msra.mxu0 %v6960_v8  ;;  %3428 = vmatpush1.bf16.msra.mxu1 %v7088_v9  ;;  %v6763_v8 = vcombine.high %v367_v63, %v371_v1  ;;  %v379_v9 = vld [vmem:[#allocation3 + $0x568] sm:$0xff] }
 0x133   :  { %v582_v11 = vld [vmem:[#allocation3 + $0xbc0] sm:$0xff]  ;;  %v7097_v14 = vcombine.high %v702_v5, %v706_v7  ;;  %3388 = vmatprep.subr.bf16.mxu0 %v6969_v10  ;;  %v7096_v18 = vcombine.low %v702_v5, %v706_v7  ;;  %v247_v5 = vld [vmem:[#allocation3 + $0x148] sm:$0xff]  ;;  %v6634_v10 = vcombine.low %v239_v61, %v243_v62 }
 0x134   :  { %v586_v12 = vld [vmem:[#allocation3 + $0xbe0] sm:$0xff]  ;;  %v375_v7 = vld [vmem:[#allocation3 + $0x548] sm:$0xff] }
 0x135   :  { %v710_v13 = vld [vmem:[#allocation3 + $0xfc0] sm:$0xff]  ;;  %v6977_v19 = vcombine.high %v582_v11, %v586_v12  ;;  %3429 = vmatprep.subr.bf16.mxu1 %v7097_v14  ;;  %v6976_v29 = vcombine.low %v582_v11, %v586_v12  ;;  %v6762_v11 = vcombine.low %v367_v63, %v371_v1  ;;  %v6643_v12 = vcombine.high %v247_v5, %v251_v6  ;;  %v259_v14 = vld [vmem:[#allocation3 + $0x1a8] sm:$0xff] }
 0x136   :  { %v714_v15 = vld [vmem:[#allocation3 + $0xfe0] sm:$0xff]  ;;  %3389 = vmatpush1.bf16.msra.mxu0 %v6968_v17  ;;  %3430 = vmatpush1.bf16.msra.mxu1 %v7096_v18  ;;  %v6771_v17 = vcombine.high %v375_v7, %v379_v9  ;;  %v387_v18 = vld [vmem:[#allocation3 + $0x5a8] sm:$0xff]  ;;  %v6770_v21 = vcombine.low %v375_v7, %v379_v9 }
 0x137   :  { %v7105_v24 = vcombine.high %v710_v13, %v714_v15  ;;  %v194_v25 = vld [vmem:[%s8731_s0 + $0x20] sm:$0xff]  ;;  %3390 = vmatprep.subr.bf16.mxu0 %v6977_v19  ;;  %v7104_v30 = vcombine.low %v710_v13, %v714_v15  ;;  %v255_v13 = vld [vmem:[#allocation3 + $0x188] sm:$0xff]  ;;  %v6642_v19 = vcombine.low %v247_v5, %v251_v6 }
 0x138   :  { %v8563_v38 = vpack.c.bf16 %v194_v25, %v194_v25  ;;  %v383_v15 = vld [vmem:[#allocation3 + $0x588] sm:$0xff]  ;;  %v6651_v22 = vcombine.high %v255_v13, %v259_v14 }
 0x139   :  { %3431 = vmatprep.subr.bf16.mxu1 %v7105_v24  ;;  %v263_v23 = vld [vmem:[#allocation3 + $0x1c8] sm:$0xff]  ;;  %v6779_v26 = vcombine.high %v383_v15, %v387_v18 }
 0x13a   :  { %3391 = vmatpush1.bf16.msra.mxu0 %v6976_v29  ;;  %3432 = vmatpush1.bf16.msra.mxu1 %v7104_v30  ;;  %v267_v24 = vld [vmem:[#allocation3 + $0x1e8] sm:$0xff]  ;;  %v6650_v29 = vcombine.low %v255_v13, %v259_v14  ;;  %v6778_v30 = vcombine.low %v383_v15, %v387_v18 }
 0x13b   :  { %3442 = vmatprep.subr.bf16.mxu0 %v6603_v32  ;;  %3483 = vmatprep.subr.bf16.mxu1 %v6731_v36  ;;  %v391_v25 = vld [vmem:[#allocation3 + $0x5c8] sm:$0xff]  ;;  %v6659_v32 = vcombine.high %v263_v23, %v267_v24 }
 0x13c   :  { %v395_v27 = vld [vmem:[#allocation3 + $0x5e8] sm:$0xff] }
 0x13d   :  { %3393 = vmatmul.mubr.bf16.vlgmr.msra.gmra.mrb[4].mxu0 %v8563_v38  ;;  %3434 = vmatmul.mubr.bf16.vlgmr.msra.gmra.mrb[4].mxu1 %v8565_v39  ;;  %v271_v33 = vld [vmem:[#allocation3 + $0x208] sm:$0xff]  ;;  %v6787_v36 = vcombine.high %v391_v25, %v395_v27 }
 0x13e   :  { %3443 = vmatpush1.bf16.msra.mxu0 %v6602_v40  ;;  %3484 = vmatpush1.bf16.msra.mxu1 %v6730_v41  ;;  %v275_v34 = vld [vmem:[#allocation3 + $0x228] sm:$0xff]  ;;  %v6658_v40 = vcombine.low %v263_v23, %v267_v24  ;;  %v6786_v41 = vcombine.low %v391_v25, %v395_v27 }
 0x13f   :  { %3444 = vmatprep.subr.bf16.mxu0 %v6611_v42  ;;  %3485 = vmatprep.subr.bf16.mxu1 %v6739_v46  ;;  %v399_v35 = vld [vmem:[#allocation3 + $0x608] sm:$0xff]  ;;  %v6667_v42 = vcombine.high %v271_v33, %v275_v34 }
 0x140   :  { %3474 = vmatprep.mubr.bf16.mxu0 %v8527_v58  ;;  %3515 = vmatprep.mubr.bf16.mxu1 %v8529_v59  ;;  %v403_v37 = vld [vmem:[#allocation3 + $0x628] sm:$0xff] }
 0x141   :  { %v279_v43 = vld [vmem:[#allocation3 + $0x248] sm:$0xff]  ;;  %v6795_v46 = vcombine.high %v399_v35, %v403_v37 }
 0x142   :  { %3445 = vmatpush1.bf16.msra.mxu0 %v6610_v48  ;;  %3486 = vmatpush1.bf16.msra.mxu1 %v6738_v49  ;;  %v283_v44 = vld [vmem:[#allocation3 + $0x268] sm:$0xff]  ;;  %v6666_v48 = vcombine.low %v271_v33, %v275_v34  ;;  %v6794_v49 = vcombine.low %v399_v35, %v403_v37 }
 0x143   :  { %3446 = vmatprep.subr.bf16.mxu0 %v6619_v50  ;;  %3487 = vmatprep.subr.bf16.mxu1 %v6747_v54  ;;  %v407_v45 = vld [vmem:[#allocation3 + $0x648] sm:$0xff]  ;;  %v6675_v50 = vcombine.high %v279_v43, %v283_v44 }
 0x144   :  { %v411_v47 = vld [vmem:[#allocation3 + $0x668] sm:$0xff] }
 0x145   :  { %v287_v51 = vld [vmem:[#allocation3 + $0x288] sm:$0xff]  ;;  %v6803_v54 = vcombine.high %v407_v45, %v411_v47 }
 0x146   :  { %3447 = vmatpush1.bf16.msra.mxu0 %v6618_v56  ;;  %3488 = vmatpush1.bf16.msra.mxu1 %v6746_v57  ;;  %v291_v52 = vld [vmem:[#allocation3 + $0x2a8] sm:$0xff]  ;;  %v6674_v56 = vcombine.low %v279_v43, %v283_v44  ;;  %v6802_v57 = vcombine.low %v407_v45, %v411_v47 }
 0x147   :  { %3448 = vmatprep.subr.bf16.mxu0 %v6627_v60  ;;  %3489 = vmatprep.subr.bf16.mxu1 %v6755_v0  ;;  %v415_v53 = vld [vmem:[#allocation3 + $0x688] sm:$0xff]  ;;  %v6683_v60 = vcombine.high %v287_v51, %v291_v52 }
 0x148   :  { %v419_v55 = vld [vmem:[#allocation3 + $0x6a8] sm:$0xff] }
 0x149   :  { %v295_v61 = vld [vmem:[#allocation3 + $0x2c8] sm:$0xff]  ;;  %v6811_v0 = vcombine.high %v415_v53, %v419_v55 }
 0x14a   :  { %3449 = vmatpush1.bf16.msra.mxu0 %v6626_v2  ;;  %3490 = vmatpush1.bf16.msra.mxu1 %v6754_v3  ;;  %v299_v62 = vld [vmem:[#allocation3 + $0x2e8] sm:$0xff]  ;;  %v6682_v2 = vcombine.low %v287_v51, %v291_v52  ;;  %v6810_v3 = vcombine.low %v415_v53, %v419_v55 }
 0x14b   :  { %3450 = vmatprep.subr.bf16.mxu0 %v6635_v4  ;;  %3491 = vmatprep.subr.bf16.mxu1 %v6763_v8  ;;  %v423_v63 = vld [vmem:[#allocation3 + $0x6c8] sm:$0xff]  ;;  %v6691_v4 = vcombine.high %v295_v61, %v299_v62 }
 0x14c   :  { %v427_v1 = vld [vmem:[#allocation3 + $0x6e8] sm:$0xff] }
 0x14d   :  { %v303_v5 = vld [vmem:[#allocation3 + $0x308] sm:$0xff]  ;;  %v6819_v8 = vcombine.high %v423_v63, %v427_v1 }
 0x14e   :  { %3451 = vmatpush1.bf16.msra.mxu0 %v6634_v10  ;;  %3492 = vmatpush1.bf16.msra.mxu1 %v6762_v11  ;;  %v307_v6 = vld [vmem:[#allocation3 + $0x328] sm:$0xff]  ;;  %v6690_v10 = vcombine.low %v295_v61, %v299_v62  ;;  %v6818_v11 = vcombine.low %v423_v63, %v427_v1 }
 0x14f   :  { %3452 = vmatprep.subr.bf16.mxu0 %v6643_v12  ;;  %3493 = vmatprep.subr.bf16.mxu1 %v6771_v17  ;;  %v431_v7 = vld [vmem:[#allocation3 + $0x708] sm:$0xff]  ;;  %v6699_v12 = vcombine.high %v303_v5, %v307_v6 }
 0x150   :  { %v435_v9 = vld [vmem:[#allocation3 + $0x728] sm:$0xff] }
 0x151   :  { %v311_v13 = vld [vmem:[#allocation3 + $0x348] sm:$0xff]  ;;  %v6827_v17 = vcombine.high %v431_v7, %v435_v9 }
 0x152   :  { %3453 = vmatpush1.bf16.msra.mxu0 %v6642_v19  ;;  %3494 = vmatpush1.bf16.msra.mxu1 %v6770_v21  ;;  %v315_v14 = vld [vmem:[#allocation3 + $0x368] sm:$0xff]  ;;  %v6698_v19 = vcombine.low %v303_v5, %v307_v6  ;;  %v6826_v21 = vcombine.low %v431_v7, %v435_v9 }
 0x153   :  { %3454 = vmatprep.subr.bf16.mxu0 %v6651_v22  ;;  %3495 = vmatprep.subr.bf16.mxu1 %v6779_v26  ;;  %v439_v15 = vld [vmem:[#allocation3 + $0x748] sm:$0xff]  ;;  %v6707_v22 = vcombine.high %v311_v13, %v315_v14 }
 0x154   :  { %v443_v18 = vld [vmem:[#allocation3 + $0x768] sm:$0xff] }
 0x155   :  { %v319_v23 = vld [vmem:[#allocation3 + $0x388] sm:$0xff]  ;;  %v6835_v26 = vcombine.high %v439_v15, %v443_v18 }
 0x156   :  { %3455 = vmatpush1.bf16.msra.mxu0 %v6650_v29  ;;  %3496 = vmatpush1.bf16.msra.mxu1 %v6778_v30  ;;  %v323_v24 = vld [vmem:[#allocation3 + $0x3a8] sm:$0xff]  ;;  %v6706_v29 = vcombine.low %v311_v13, %v315_v14  ;;  %v6834_v30 = vcombine.low %v439_v15, %v443_v18 }
 0x157   :  { %3456 = vmatprep.subr.bf16.mxu0 %v6659_v32  ;;  %3497 = vmatprep.subr.bf16.mxu1 %v6787_v36  ;;  %v447_v25 = vld [vmem:[#allocation3 + $0x788] sm:$0xff]  ;;  %v6715_v32 = vcombine.high %v319_v23, %v323_v24 }
 0x158   :  { %v451_v27 = vld [vmem:[#allocation3 + $0x7a8] sm:$0xff] }
 0x159   :  { %v327_v33 = vld [vmem:[#allocation3 + $0x3c8] sm:$0xff]  ;;  %v6843_v36 = vcombine.high %v447_v25, %v451_v27 }
 0x15a   :  { %3457 = vmatpush1.bf16.msra.mxu0 %v6658_v40  ;;  %3498 = vmatpush1.bf16.msra.mxu1 %v6786_v41  ;;  %v331_v34 = vld [vmem:[#allocation3 + $0x3e8] sm:$0xff]  ;;  %v6714_v40 = vcombine.low %v319_v23, %v323_v24  ;;  %v6842_v41 = vcombine.low %v447_v25, %v451_v27 }
 0x15b   :  { %3458 = vmatprep.subr.bf16.mxu0 %v6667_v42  ;;  %3499 = vmatprep.subr.bf16.mxu1 %v6795_v46  ;;  %v455_v35 = vld [vmem:[#allocation3 + $0x7c8] sm:$0xff]  ;;  %v6723_v42 = vcombine.high %v327_v33, %v331_v34 }
 0x15c   :  { %v459_v37 = vld [vmem:[#allocation3 + $0x7e8] sm:$0xff] }
 0x15d   :  { %v463_v43 = vld [vmem:[#allocation3 + $0x808] sm:$0xff]  ;;  %v6851_v46 = vcombine.high %v455_v35, %v459_v37 }
 0x15e   :  { %3459 = vmatpush1.bf16.msra.mxu0 %v6666_v48  ;;  %3500 = vmatpush1.bf16.msra.mxu1 %v6794_v49  ;;  %v467_v44 = vld [vmem:[#allocation3 + $0x828] sm:$0xff]  ;;  %v6722_v48 = vcombine.low %v327_v33, %v331_v34  ;;  %v6850_v49 = vcombine.low %v455_v35, %v459_v37 }
 0x15f   :  { %3460 = vmatprep.subr.bf16.mxu0 %v6675_v50  ;;  %3501 = vmatprep.subr.bf16.mxu1 %v6803_v54  ;;  %v591_v45 = vld [vmem:[#allocation3 + $0xc08] sm:$0xff]  ;;  %v6859_v50 = vcombine.high %v463_v43, %v467_v44 }
 0x160   :  { %v595_v47 = vld [vmem:[#allocation3 + $0xc28] sm:$0xff] }
 0x161   :  { %v471_v51 = vld [vmem:[#allocation3 + $0x848] sm:$0xff]  ;;  %v6987_v54 = vcombine.high %v591_v45, %v595_v47 }
 0x162   :  { %3461 = vmatpush1.bf16.msra.mxu0 %v6674_v56  ;;  %3502 = vmatpush1.bf16.msra.mxu1 %v6802_v57  ;;  %v475_v52 = vld [vmem:[#allocation3 + $0x868] sm:$0xff]  ;;  %v6858_v56 = vcombine.low %v463_v43, %v467_v44  ;;  %v6986_v57 = vcombine.low %v591_v45, %v595_v47 }
 0x163   :  { %3462 = vmatprep.subr.bf16.mxu0 %v6683_v60  ;;  %3503 = vmatprep.subr.bf16.mxu1 %v6811_v0  ;;  %v599_v53 = vld [vmem:[#allocation3 + $0xc48] sm:$0xff]  ;;  %v6867_v60 = vcombine.high %v471_v51, %v475_v52 }
 0x164   :  { %v603_v55 = vld [vmem:[#allocation3 + $0xc68] sm:$0xff] }
 0x165   :  { %v479_v61 = vld [vmem:[#allocation3 + $0x888] sm:$0xff]  ;;  %v6995_v0 = vcombine.high %v599_v53, %v603_v55 }
 0x166   :  { %3463 = vmatpush1.bf16.msra.mxu0 %v6682_v2  ;;  %3504 = vmatpush1.bf16.msra.mxu1 %v6810_v3  ;;  %v483_v62 = vld [vmem:[#allocation3 + $0x8a8] sm:$0xff]  ;;  %v6866_v2 = vcombine.low %v471_v51, %v475_v52  ;;  %v6994_v3 = vcombine.low %v599_v53, %v603_v55 }
 0x167   :  { %3464 = vmatprep.subr.bf16.mxu0 %v6691_v4  ;;  %3505 = vmatprep.subr.bf16.mxu1 %v6819_v8  ;;  %v607_v63 = vld [vmem:[#allocation3 + $0xc88] sm:$0xff]  ;;  %v6875_v4 = vcombine.high %v479_v61, %v483_v62 }
 0x168   :  { %v611_v1 = vld [vmem:[#allocation3 + $0xca8] sm:$0xff] }
 0x169   :  { %v487_v5 = vld [vmem:[#allocation3 + $0x8c8] sm:$0xff]  ;;  %v7003_v8 = vcombine.high %v607_v63, %v611_v1 }
 0x16a   :  { %3465 = vmatpush1.bf16.msra.mxu0 %v6690_v10  ;;  %3506 = vmatpush1.bf16.msra.mxu1 %v6818_v11  ;;  %v491_v6 = vld [vmem:[#allocation3 + $0x8e8] sm:$0xff]  ;;  %v6874_v10 = vcombine.low %v479_v61, %v483_v62  ;;  %v7002_v11 = vcombine.low %v607_v63, %v611_v1 }
 0x16b   :  { %3466 = vmatprep.subr.bf16.mxu0 %v6699_v12  ;;  %3507 = vmatprep.subr.bf16.mxu1 %v6827_v17  ;;  %v615_v7 = vld [vmem:[#allocation3 + $0xcc8] sm:$0xff]  ;;  %v6883_v12 = vcombine.high %v487_v5, %v491_v6 }
 0x16c   :  { %v619_v9 = vld [vmem:[#allocation3 + $0xce8] sm:$0xff] }
 0x16d   :  { %v495_v13 = vld [vmem:[#allocation3 + $0x908] sm:$0xff]  ;;  %v7011_v17 = vcombine.high %v615_v7, %v619_v9 }
 0x16e   :  { %3467 = vmatpush1.bf16.msra.mxu0 %v6698_v19  ;;  %3508 = vmatpush1.bf16.msra.mxu1 %v6826_v21  ;;  %v499_v14 = vld [vmem:[#allocation3 + $0x928] sm:$0xff]  ;;  %v6882_v19 = vcombine.low %v487_v5, %v491_v6  ;;  %v7010_v21 = vcombine.low %v615_v7, %v619_v9 }
 0x16f   :  { %3468 = vmatprep.subr.bf16.mxu0 %v6707_v22  ;;  %3509 = vmatprep.subr.bf16.mxu1 %v6835_v26  ;;  %v623_v15 = vld [vmem:[#allocation3 + $0xd08] sm:$0xff]  ;;  %v6891_v22 = vcombine.high %v495_v13, %v499_v14 }
 0x170   :  { %v627_v18 = vld [vmem:[#allocation3 + $0xd28] sm:$0xff] }
 0x171   :  { %v503_v23 = vld [vmem:[#allocation3 + $0x948] sm:$0xff]  ;;  %v7019_v26 = vcombine.high %v623_v15, %v627_v18 }
 0x172   :  { %3469 = vmatpush1.bf16.msra.mxu0 %v6706_v29  ;;  %3510 = vmatpush1.bf16.msra.mxu1 %v6834_v30  ;;  %v507_v24 = vld [vmem:[#allocation3 + $0x968] sm:$0xff]  ;;  %v6890_v29 = vcombine.low %v495_v13, %v499_v14  ;;  %v7018_v30 = vcombine.low %v623_v15, %v627_v18 }
 0x173   :  { %3470 = vmatprep.subr.bf16.mxu0 %v6715_v32  ;;  %3511 = vmatprep.subr.bf16.mxu1 %v6843_v36  ;;  %v631_v25 = vld [vmem:[#allocation3 + $0xd48] sm:$0xff]  ;;  %v6899_v32 = vcombine.high %v503_v23, %v507_v24 }
 0x174   :  { %v635_v27 = vld [vmem:[#allocation3 + $0xd68] sm:$0xff] }
 0x175   :  { %v511_v33 = vld [vmem:[#allocation3 + $0x988] sm:$0xff]  ;;  %v7027_v36 = vcombine.high %v631_v25, %v635_v27 }
 0x176   :  { %3471 = vmatpush1.bf16.msra.mxu0 %v6714_v40  ;;  %3512 = vmatpush1.bf16.msra.mxu1 %v6842_v41  ;;  %v515_v34 = vld [vmem:[#allocation3 + $0x9a8] sm:$0xff]  ;;  %v6898_v40 = vcombine.low %v503_v23, %v507_v24  ;;  %v7026_v41 = vcombine.low %v631_v25, %v635_v27 }
 0x177   :  { %3472 = vmatprep.subr.bf16.mxu0 %v6723_v42  ;;  %3513 = vmatprep.subr.bf16.mxu1 %v6851_v46  ;;  %v639_v35 = vld [vmem:[#allocation3 + $0xd88] sm:$0xff]  ;;  %v6907_v42 = vcombine.high %v511_v33, %v515_v34 }
 0x178   :  { %v643_v37 = vld [vmem:[#allocation3 + $0xda8] sm:$0xff] }
 0x179   :  { %v519_v43 = vld [vmem:[#allocation3 + $0x9c8] sm:$0xff]  ;;  %v7035_v46 = vcombine.high %v639_v35, %v643_v37 }
 0x17a   :  { %3473 = vmatpush1.bf16.msra.mxu0 %v6722_v48  ;;  %3514 = vmatpush1.bf16.msra.mxu1 %v6850_v49  ;;  %v523_v44 = vld [vmem:[#allocation3 + $0x9e8] sm:$0xff]  ;;  %v6906_v48 = vcombine.low %v511_v33, %v515_v34  ;;  %v7034_v49 = vcombine.low %v639_v35, %v643_v37 }
 0x17b   :  { %3524 = vmatprep.subr.bf16.mxu0 %v6859_v50  ;;  %3565 = vmatprep.subr.bf16.mxu1 %v6987_v54  ;;  %v647_v45 = vld [vmem:[#allocation3 + $0xdc8] sm:$0xff]  ;;  %v6915_v50 = vcombine.high %v519_v43, %v523_v44 }
 0x17c   :  { %v651_v47 = vld [vmem:[#allocation3 + $0xde8] sm:$0xff] }
 0x17d   :  { %3475 = vmatmul.mubr.bf16.vlgmr.msra.gmra.mrb[8].mxu0 %v8539_v16  ;;  %3516 = vmatmul.mubr.bf16.vlgmr.msra.gmra.mrb[8].mxu1 %v8544_v20  ;;  %v527_v51 = vld [vmem:[#allocation3 + $0xa08] sm:$0xff]  ;;  %v7043_v53 = vcombine.high %v647_v45, %v651_v47 }
 0x17e   :  { %3525 = vmatpush1.bf16.msra.mxu0 %v6858_v56  ;;  %3566 = vmatpush1.bf16.msra.mxu1 %v6986_v57  ;;  %v531_v52 = vld [vmem:[#allocation3 + $0xa28] sm:$0xff]  ;;  %v6914_v56 = vcombine.low %v519_v43, %v523_v44  ;;  %v7042_v57 = vcombine.low %v647_v45, %v651_v47 }
 0x17f   :  { %3526 = vmatprep.subr.bf16.mxu0 %v6867_v60  ;;  %3567 = vmatprep.subr.bf16.mxu1 %v6995_v0  ;;  %v655_v54 = vld [vmem:[#allocation3 + $0xe08] sm:$0xff]  ;;  %v6923_v60 = vcombine.high %v527_v51, %v531_v52 }
 0x180   :  { %3556 = vmatprep.mubr.bf16.mxu0 %v8549_v28  ;;  %3597 = vmatprep.mubr.bf16.mxu1 %v8552_v31  ;;  %v659_v55 = vld [vmem:[#allocation3 + $0xe28] sm:$0xff] }
 0x181   :  { %v535_v61 = vld [vmem:[#allocation3 + $0xa48] sm:$0xff]  ;;  %v7051_v0 = vcombine.high %v655_v54, %v659_v55 }
 0x182   :  { %3527 = vmatpush1.bf16.msra.mxu0 %v6866_v2  ;;  %3568 = vmatpush1.bf16.msra.mxu1 %v6994_v3  ;;  %v539_v62 = vld [vmem:[#allocation3 + $0xa68] sm:$0xff]  ;;  %v6922_v2 = vcombine.low %v527_v51, %v531_v52  ;;  %v7050_v3 = vcombine.low %v655_v54, %v659_v55 }
 0x183   :  { %3528 = vmatprep.subr.bf16.mxu0 %v6875_v4  ;;  %3569 = vmatprep.subr.bf16.mxu1 %v7003_v8  ;;  %v663_v63 = vld [vmem:[#allocation3 + $0xe48] sm:$0xff]  ;;  %v6931_v4 = vcombine.high %v535_v61, %v539_v62 }
 0x184   :  { %v667_v1 = vld [vmem:[#allocation3 + $0xe68] sm:$0xff] }
 0x185   :  { %v543_v5 = vld [vmem:[#allocation3 + $0xa88] sm:$0xff]  ;;  %v7059_v8 = vcombine.high %v663_v63, %v667_v1 }
 0x186   :  { %3529 = vmatpush1.bf16.msra.mxu0 %v6874_v10  ;;  %3570 = vmatpush1.bf16.msra.mxu1 %v7002_v11  ;;  %v547_v6 = vld [vmem:[#allocation3 + $0xaa8] sm:$0xff]  ;;  %v6930_v10 = vcombine.low %v535_v61, %v539_v62  ;;  %v7058_v11 = vcombine.low %v663_v63, %v667_v1  ;;  %v208_v62 = vld [vmem:[#allocation3 + $0x10] sm:$0xff] }
 0x187   :  { %3530 = vmatprep.subr.bf16.mxu0 %v6883_v12  ;;  %3571 = vmatprep.subr.bf16.mxu1 %v7011_v17  ;;  %v671_v7 = vld [vmem:[#allocation3 + $0xe88] sm:$0xff]  ;;  %v6939_v12 = vcombine.high %v543_v5, %v547_v6  ;;  %v212_v63 = vld [vmem:[#allocation3 + $0x30] sm:$0xff] }
 0x188   :  { %v675_v9 = vld [vmem:[#allocation3 + $0xea8] sm:$0xff]  ;;  %v340_v1 = vld [vmem:[#allocation3 + $0x430] sm:$0xff] }
 0x189   :  { %v551_v13 = vld [vmem:[#allocation3 + $0xac8] sm:$0xff]  ;;  %v7067_v17 = vcombine.high %v671_v7, %v675_v9 }
 0x18a   :  { %3531 = vmatpush1.bf16.msra.mxu0 %v6882_v19  ;;  %3572 = vmatpush1.bf16.msra.mxu1 %v7010_v21  ;;  %v555_v14 = vld [vmem:[#allocation3 + $0xae8] sm:$0xff]  ;;  %v6938_v19 = vcombine.low %v543_v5, %v547_v6  ;;  %v7066_v21 = vcombine.low %v671_v7, %v675_v9  ;;  %v216_v6 = vld [vmem:[#allocation3 + $0x50] sm:$0xff] }
 0x18b   :  { %3532 = vmatprep.subr.bf16.mxu0 %v6891_v22  ;;  %3573 = vmatprep.subr.bf16.mxu1 %v7019_v26  ;;  %v679_v15 = vld [vmem:[#allocation3 + $0xec8] sm:$0xff]  ;;  %v6947_v22 = vcombine.high %v551_v13, %v555_v14  ;;  %v220_v7 = vld [vmem:[#allocation3 + $0x70] sm:$0xff] }
 0x18c   :  { %v683_v18 = vld [vmem:[#allocation3 + $0xee8] sm:$0xff]  ;;  %v348_v9 = vld [vmem:[#allocation3 + $0x470] sm:$0xff] }
 0x18d   :  { %v559_v23 = vld [vmem:[#allocation3 + $0xb08] sm:$0xff]  ;;  %v7075_v26 = vcombine.high %v679_v15, %v683_v18 }
 0x18e   :  { %3533 = vmatpush1.bf16.msra.mxu0 %v6890_v29  ;;  %3574 = vmatpush1.bf16.msra.mxu1 %v7018_v30  ;;  %v563_v24 = vld [vmem:[#allocation3 + $0xb28] sm:$0xff]  ;;  %v6946_v29 = vcombine.low %v551_v13, %v555_v14  ;;  %v7074_v30 = vcombine.low %v679_v15, %v683_v18  ;;  %v224_v14 = vld [vmem:[#allocation3 + $0x90] sm:$0xff] }
 0x18f   :  { %3534 = vmatprep.subr.bf16.mxu0 %v6899_v32  ;;  %3575 = vmatprep.subr.bf16.mxu1 %v7027_v36  ;;  %v687_v25 = vld [vmem:[#allocation3 + $0xf08] sm:$0xff]  ;;  %v6955_v32 = vcombine.high %v559_v23, %v563_v24  ;;  %v228_v15 = vld [vmem:[#allocation3 + $0xb0] sm:$0xff] }
 0x190   :  { %v691_v27 = vld [vmem:[#allocation3 + $0xf28] sm:$0xff]  ;;  %v356_v18 = vld [vmem:[#allocation3 + $0x4b0] sm:$0xff] }
 0x191   :  { %v567_v33 = vld [vmem:[#allocation3 + $0xb48] sm:$0xff]  ;;  %v7083_v36 = vcombine.high %v687_v25, %v691_v27 }
 0x192   :  { %3535 = vmatpush1.bf16.msra.mxu0 %v6898_v40  ;;  %3576 = vmatpush1.bf16.msra.mxu1 %v7026_v41  ;;  %v571_v34 = vld [vmem:[#allocation3 + $0xb68] sm:$0xff]  ;;  %v6954_v40 = vcombine.low %v559_v23, %v563_v24  ;;  %v7082_v41 = vcombine.low %v687_v25, %v691_v27  ;;  %v232_v24 = vld [vmem:[#allocation3 + $0xd0] sm:$0xff] }
 0x193   :  { %3536 = vmatprep.subr.bf16.mxu0 %v6907_v42  ;;  %3577 = vmatprep.subr.bf16.mxu1 %v7035_v46  ;;  %v695_v35 = vld [vmem:[#allocation3 + $0xf48] sm:$0xff]  ;;  %v6963_v42 = vcombine.high %v567_v33, %v571_v34  ;;  %v236_v25 = vld [vmem:[#allocation3 + $0xf0] sm:$0xff] }
 0x194   :  { %v699_v37 = vld [vmem:[#allocation3 + $0xf68] sm:$0xff]  ;;  %v364_v27 = vld [vmem:[#allocation3 + $0x4f0] sm:$0xff] }
 0x195   :  { %v575_v43 = vld [vmem:[#allocation3 + $0xb88] sm:$0xff]  ;;  %v7091_v46 = vcombine.high %v695_v35, %v699_v37 }
 0x196   :  { %3537 = vmatpush1.bf16.msra.mxu0 %v6906_v48  ;;  %3578 = vmatpush1.bf16.msra.mxu1 %v7034_v49  ;;  %v579_v44 = vld [vmem:[#allocation3 + $0xba8] sm:$0xff]  ;;  %v6962_v48 = vcombine.low %v567_v33, %v571_v34  ;;  %v7090_v49 = vcombine.low %v695_v35, %v699_v37  ;;  %v240_v34 = vld [vmem:[#allocation3 + $0x110] sm:$0xff] }
 0x197   :  { %3538 = vmatprep.subr.bf16.mxu0 %v6915_v50  ;;  %3579 = vmatprep.subr.bf16.mxu1 %v7043_v53  ;;  %v703_v45 = vld [vmem:[#allocation3 + $0xf88] sm:$0xff]  ;;  %v6971_v50 = vcombine.high %v575_v43, %v579_v44  ;;  %v244_v35 = vld [vmem:[#allocation3 + $0x130] sm:$0xff] }
 0x198   :  { %v707_v47 = vld [vmem:[#allocation3 + $0xfa8] sm:$0xff]  ;;  %v372_v37 = vld [vmem:[#allocation3 + $0x530] sm:$0xff] }
 0x199   :  { %v7099_v51 = vcombine.high %v703_v45, %v707_v47  ;;  %v583_v52 = vld [vmem:[#allocation3 + $0xbc8] sm:$0xff] }
 0x19a   :  { %3539 = vmatpush1.bf16.msra.mxu0 %v6914_v56  ;;  %3580 = vmatpush1.bf16.msra.mxu1 %v7042_v57  ;;  %v587_v53 = vld [vmem:[#allocation3 + $0xbe8] sm:$0xff]  ;;  %v6970_v56 = vcombine.low %v575_v43, %v579_v44  ;;  %v7098_v57 = vcombine.low %v703_v45, %v707_v47  ;;  %v248_v44 = vld [vmem:[#allocation3 + $0x150] sm:$0xff] }
 0x19b   :  { %3540 = vmatprep.subr.bf16.mxu0 %v6923_v60  ;;  %3581 = vmatprep.subr.bf16.mxu1 %v7051_v0  ;;  %v711_v54 = vld [vmem:[#allocation3 + $0xfc8] sm:$0xff]  ;;  %v6979_v60 = vcombine.high %v583_v52, %v587_v53  ;;  %v336_v0 = vld [vmem:[#allocation3 + $0x410] sm:$0xff] }
 0x19c   :  { %v715_v55 = vld [vmem:[#allocation3 + $0xfe8] sm:$0xff]  ;;  %v6733_v5 = vcombine.high %v336_v0, %v340_v1  ;;  %v252_v45 = vld [vmem:[#allocation3 + $0x170] sm:$0xff] }
 0x19d   :  { %v7107_v61 = vcombine.high %v711_v54, %v715_v55  ;;  %v380_v47 = vld [vmem:[#allocation3 + $0x570] sm:$0xff] }
 0x19e   :  { %3541 = vmatpush1.bf16.msra.mxu0 %v6922_v2  ;;  %3582 = vmatpush1.bf16.msra.mxu1 %v7050_v3  ;;  %v6978_v2 = vcombine.low %v583_v52, %v587_v53  ;;  %v7106_v3 = vcombine.low %v711_v54, %v715_v55  ;;  %v256_v52 = vld [vmem:[#allocation3 + $0x190] sm:$0xff] }
 0x19f   :  { %3542 = vmatprep.subr.bf16.mxu0 %v6931_v4  ;;  %3583 = vmatprep.subr.bf16.mxu1 %v7059_v8  ;;  %v6605_v4 = vcombine.high %v208_v62, %v212_v63  ;;  %v344_v8 = vld [vmem:[#allocation3 + $0x450] sm:$0xff] }
 0x1a0   :  { %v6741_v13 = vcombine.high %v344_v8, %v348_v9  ;;  %v260_v53 = vld [vmem:[#allocation3 + $0x1b0] sm:$0xff] }
 0x1a1   :  { %v384_v54 = vld [vmem:[#allocation3 + $0x590] sm:$0xff] }
 0x1a2   :  { %3543 = vmatpush1.bf16.msra.mxu0 %v6930_v10  ;;  %3584 = vmatpush1.bf16.msra.mxu1 %v7058_v11  ;;  %v6604_v10 = vcombine.low %v208_v62, %v212_v63  ;;  %v6732_v11 = vcombine.low %v336_v0, %v340_v1  ;;  %v388_v55 = vld [vmem:[#allocation3 + $0x5b0] sm:$0xff] }
 0x1a3   :  { %3544 = vmatprep.subr.bf16.mxu0 %v6939_v12  ;;  %3585 = vmatprep.subr.bf16.mxu1 %v7067_v17  ;;  %v6613_v12 = vcombine.high %v216_v6, %v220_v7  ;;  %v352_v17 = vld [vmem:[#allocation3 + $0x490] sm:$0xff]  ;;  %v6781_v62 = vcombine.high %v384_v54, %v388_v55 }
 0x1a4   :  { %v6749_v23 = vcombine.high %v352_v17, %v356_v18  ;;  %v264_v63 = vld [vmem:[#allocation3 + $0x1d0] sm:$0xff] }
 0x1a5   :  { %v268_v0 = vld [vmem:[#allocation3 + $0x1f0] sm:$0xff] }
 0x1a6   :  { %3545 = vmatpush1.bf16.msra.mxu0 %v6938_v19  ;;  %3586 = vmatpush1.bf16.msra.mxu1 %v7066_v21  ;;  %v6612_v19 = vcombine.low %v216_v6, %v220_v7  ;;  %v6740_v21 = vcombine.low %v344_v8, %v348_v9  ;;  %v6652_v8 = vcombine.low %v256_v52, %v260_v53 }
 0x1a7   :  { %3546 = vmatprep.subr.bf16.mxu0 %v6947_v22  ;;  %3587 = vmatprep.subr.bf16.mxu1 %v7075_v26  ;;  %v6621_v22 = vcombine.high %v224_v14, %v228_v15  ;;  %v360_v26 = vld [vmem:[#allocation3 + $0x4d0] sm:$0xff] }
 0x1a8   :  { %v6757_v33 = vcombine.high %v360_v26, %v364_v27 }
 0x1aa   :  { %3547 = vmatpush1.bf16.msra.mxu0 %v6946_v29  ;;  %3588 = vmatpush1.bf16.msra.mxu1 %v7074_v30  ;;  %v6620_v29 = vcombine.low %v224_v14, %v228_v15  ;;  %v6748_v30 = vcombine.low %v352_v17, %v356_v18  ;;  %v272_v17 = vld [vmem:[#allocation3 + $0x210] sm:$0xff] }
 0x1ab   :  { %3548 = vmatprep.subr.bf16.mxu0 %v6955_v32  ;;  %3589 = vmatprep.subr.bf16.mxu1 %v7083_v36  ;;  %v6629_v32 = vcombine.high %v232_v24, %v236_v25  ;;  %v368_v36 = vld [vmem:[#allocation3 + $0x510] sm:$0xff] }
 0x1ac   :  { %v6765_v43 = vcombine.high %v368_v36, %v372_v37  ;;  %v276_v18 = vld [vmem:[#allocation3 + $0x230] sm:$0xff] }
 0x1ae   :  { %3549 = vmatpush1.bf16.msra.mxu0 %v6954_v40  ;;  %3590 = vmatpush1.bf16.msra.mxu1 %v7082_v41  ;;  %v6628_v40 = vcombine.low %v232_v24, %v236_v25  ;;  %v6756_v41 = vcombine.low %v360_v26, %v364_v27  ;;  %v6669_v24 = vcombine.high %v272_v17, %v276_v18  ;;  %v280_v26 = vld [vmem:[#allocation3 + $0x250] sm:$0xff] }
 0x1af   :  { %3550 = vmatprep.subr.bf16.mxu0 %v6963_v42  ;;  %3591 = vmatprep.subr.bf16.mxu1 %v7091_v46  ;;  %v6637_v42 = vcombine.high %v240_v34, %v244_v35  ;;  %v376_v46 = vld [vmem:[#allocation3 + $0x550] sm:$0xff] }
 0x1b0   :  { %v284_v27 = vld [vmem:[#allocation3 + $0x270] sm:$0xff] }
 0x1b2   :  { %3551 = vmatpush1.bf16.msra.mxu0 %v6962_v48  ;;  %3592 = vmatpush1.bf16.msra.mxu1 %v7090_v49  ;;  %v6636_v48 = vcombine.low %v240_v34, %v244_v35  ;;  %v6764_v49 = vcombine.low %v368_v36, %v372_v37  ;;  %v6677_v34 = vcombine.high %v280_v26, %v284_v27  ;;  %v288_v36 = vld [vmem:[#allocation3 + $0x290] sm:$0xff] }
 0x1b3   :  { %3552 = vmatprep.subr.bf16.mxu0 %v6971_v50  ;;  %3593 = vmatprep.subr.bf16.mxu1 %v7099_v51  ;;  %v6645_v50 = vcombine.high %v248_v44, %v252_v45  ;;  %v6773_v51 = vcombine.high %v376_v46, %v380_v47  ;;  %v292_v37 = vld [vmem:[#allocation3 + $0x2b0] sm:$0xff] }
 0x1b6   :  { %3553 = vmatpush1.bf16.msra.mxu0 %v6970_v56  ;;  %3594 = vmatpush1.bf16.msra.mxu1 %v7098_v57  ;;  %v6644_v56 = vcombine.low %v248_v44, %v252_v45  ;;  %v6772_v57 = vcombine.low %v376_v46, %v380_v47  ;;  %v6685_v44 = vcombine.high %v288_v36, %v292_v37  ;;  %v296_v46 = vld [vmem:[#allocation3 + $0x2d0] sm:$0xff] }
 0x1b7   :  { %3554 = vmatprep.subr.bf16.mxu0 %v6979_v60  ;;  %3595 = vmatprep.subr.bf16.mxu1 %v7107_v61  ;;  %v6653_v60 = vcombine.high %v256_v52, %v260_v53  ;;  %v300_v47 = vld [vmem:[#allocation3 + $0x2f0] sm:$0xff] }
 0x1b8   :  { %v6693_v52 = vcombine.high %v296_v46, %v300_v47 }
 0x1ba   :  { %3555 = vmatpush1.bf16.msra.mxu0 %v6978_v2  ;;  %3596 = vmatpush1.bf16.msra.mxu1 %v7106_v3  ;;  %v392_v3 = vld [vmem:[#allocation3 + $0x5d0] sm:$0xff] }
 0x1bb   :  { %3606 = vmatprep.subr.bf16.mxu0 %v6605_v4  ;;  %3647 = vmatprep.subr.bf16.mxu1 %v6733_v5  ;;  %v396_v4 = vld [vmem:[#allocation3 + $0x5f0] sm:$0xff] }
 0x1bc   :  { %v6789_v15 = vcombine.high %v392_v3, %v396_v4 }
 0x1bd   :  { %3557 = vmatmul.mubr.bf16.vlgmr.msra.gmra.mrb[12].mxu0 %v8563_v38  ;;  %3598 = vmatmul.mubr.bf16.vlgmr.msra.gmra.mrb[12].mxu1 %v8565_v39 }
 0x1be   :  { %3607 = vmatpush1.bf16.msra.mxu0 %v6604_v10  ;;  %3648 = vmatpush1.bf16.msra.mxu1 %v6732_v11 }
 0x1bf   :  { %3608 = vmatprep.subr.bf16.mxu0 %v6613_v12  ;;  %3649 = vmatprep.subr.bf16.mxu1 %v6741_v13  ;;  %v6780_v12 = vcombine.low %v384_v54, %v388_v55  ;;  %v6661_v13 = vcombine.high %v264_v63, %v268_v0  ;;  %v304_v54 = vld [vmem:[#allocation3 + $0x310] sm:$0xff] }
 0x1c0   :  { %3638 = vmatprep.mubr.bf16.mxu0 %v8527_v58  ;;  %3679 = vmatprep.mubr.bf16.mxu1 %v8529_v59  ;;  %v308_v55 = vld [vmem:[#allocation3 + $0x330] sm:$0xff] }
 0x1c2   :  { %3609 = vmatpush1.bf16.msra.mxu0 %v6612_v19  ;;  %3650 = vmatpush1.bf16.msra.mxu1 %v6740_v21  ;;  %v400_v19 = vld [vmem:[#allocation3 + $0x610] sm:$0xff] }
 0x1c3   :  { %3610 = vmatprep.subr.bf16.mxu0 %v6621_v22  ;;  %3651 = vmatprep.subr.bf16.mxu1 %v6749_v23  ;;  %v404_v21 = vld [vmem:[#allocation3 + $0x630] sm:$0xff]  ;;  %v6660_v22 = vcombine.low %v264_v63, %v268_v0  ;;  %v6788_v23 = vcombine.low %v392_v3, %v396_v4  ;;  %v6700_v4 = vcombine.low %v304_v54, %v308_v55 }
 0x1c4   :  { %v6797_v25 = vcombine.high %v400_v19, %v404_v21  ;;  %v312_v0 = vld [vmem:[#allocation3 + $0x350] sm:$0xff] }
 0x1c5   :  { %v444_v3 = vld [vmem:[#allocation3 + $0x770] sm:$0xff] }
 0x1c6   :  { %3611 = vmatpush1.bf16.msra.mxu0 %v6620_v29  ;;  %3652 = vmatpush1.bf16.msra.mxu1 %v6748_v30  ;;  %v408_v29 = vld [vmem:[#allocation3 + $0x650] sm:$0xff] }
 0x1c7   :  { %3612 = vmatprep.subr.bf16.mxu0 %v6629_v32  ;;  %3653 = vmatprep.subr.bf16.mxu1 %v6757_v33  ;;  %v412_v30 = vld [vmem:[#allocation3 + $0x670] sm:$0xff]  ;;  %v6668_v32 = vcombine.low %v272_v17, %v276_v18  ;;  %v6796_v33 = vcombine.low %v400_v19, %v404_v21 }
 0x1c8   :  { %v6805_v35 = vcombine.high %v408_v29, %v412_v30  ;;  %v328_v19 = vld [vmem:[#allocation3 + $0x3d0] sm:$0xff] }
 0x1c9   :  { %v332_v21 = vld [vmem:[#allocation3 + $0x3f0] sm:$0xff] }
 0x1ca   :  { %3613 = vmatpush1.bf16.msra.mxu0 %v6628_v40  ;;  %3654 = vmatpush1.bf16.msra.mxu1 %v6756_v41  ;;  %v416_v40 = vld [vmem:[#allocation3 + $0x690] sm:$0xff] }
 0x1cb   :  { %3614 = vmatprep.subr.bf16.mxu0 %v6637_v42  ;;  %3655 = vmatprep.subr.bf16.mxu1 %v6765_v43  ;;  %v420_v41 = vld [vmem:[#allocation3 + $0x6b0] sm:$0xff]  ;;  %v6676_v42 = vcombine.low %v280_v26, %v284_v27  ;;  %v6804_v43 = vcombine.low %v408_v29, %v412_v30  ;;  %v6725_v26 = vcombine.high %v328_v19, %v332_v21 }
 0x1cc   :  { %v6813_v45 = vcombine.high %v416_v40, %v420_v41  ;;  %v464_v29 = vld [vmem:[#allocation3 + $0x810] sm:$0xff] }
 0x1cd   :  { %v468_v30 = vld [vmem:[#allocation3 + $0x830] sm:$0xff] }
 0x1ce   :  { %3615 = vmatpush1.bf16.msra.mxu0 %v6636_v48  ;;  %3656 = vmatpush1.bf16.msra.mxu1 %v6764_v49  ;;  %v424_v48 = vld [vmem:[#allocation3 + $0x6d0] sm:$0xff] }
 0x1cf   :  { %3616 = vmatprep.subr.bf16.mxu0 %v6645_v50  ;;  %3657 = vmatprep.subr.bf16.mxu1 %v6773_v51  ;;  %v3353_v1 = vpop.f32.mrb[0].mxu1  ;;  %v428_v49 = vld [vmem:[#allocation3 + $0x6f0] sm:$0xff]  ;;  %v6684_v50 = vcombine.low %v288_v36, %v292_v37  ;;  %v6812_v51 = vcombine.low %v416_v40, %v420_v41  ;;  %v6861_v36 = vcombine.high %v464_v29, %v468_v30 }
 0x1d0   :  { %v3312_v61 = vpop.f32.mrb[0].mxu0  ;;  %v3355_v6 = vpop.f32.mrb[1].mxu1  ;;  %v6821_v53 = vcombine.high %v424_v48, %v428_v49  ;;  %v472_v40 = vld [vmem:[#allocation3 + $0x850] sm:$0xff] }
 0x1d1   :  { %v3314_v2 = vpop.f32.mrb[1].mxu0  ;;  %v8579_v5 = vadd.f32 %v3353_v1, %v3312_v61  ;;  %v3357_v10 = vpop.f32.mrb[2].mxu1  ;;  %v6820_v61 = vcombine.low %v424_v48, %v428_v49  ;;  %v316_v1 = vld [vmem:[#allocation3 + $0x370] sm:$0xff] }
 0x1d2   :  { %v3316_v7 = vpop.f32.mrb[2].mxu0  ;;  %3617 = vmatpush1.bf16.msra.mxu0 %v6644_v56  ;;  %v8581_v9 = vadd.f32 %v3355_v6, %v3314_v2  ;;  %3658 = vmatpush1.bf16.msra.mxu1 %v6772_v57  ;;  %v3358_v14 = vpop.f32.mrb[3].mxu1  ;;  %v432_v56 = vld [vmem:[#allocation3 + $0x710] sm:$0xff] }
 0x1d3   :  { %v3317_v11 = vpop.f32.mrb[3].mxu0  ;;  %3618 = vmatprep.subr.bf16.mxu0 %v6653_v60  ;;  %3659 = vmatprep.subr.bf16.mxu1 %v6781_v62  ;;  %v436_v57 = vld [vmem:[#allocation3 + $0x730] sm:$0xff]  ;;  %v6692_v60 = vcombine.low %v296_v46, %v300_v47  ;;  %v6701_v62 = vcombine.high %v304_v54, %v308_v55  ;;  %v6709_v7 = vcombine.high %v312_v0, %v316_v1 }
 0x1d4   :  { %v6829_v63 = vcombine.high %v432_v56, %v436_v57  ;;  %v440_v2 = vld [vmem:[#allocation3 + $0x750] sm:$0xff]  ;;  %v6828_v6 = vcombine.low %v432_v56, %v436_v57  ;;  %v6708_v14 = vcombine.low %v312_v0, %v316_v1 }
 0x1d5   :  { %v320_v10 = vld [vmem:[#allocation3 + $0x390] sm:$0xff] }
 0x1d6   :  { %3619 = vmatpush1.bf16.msra.mxu0 %v6652_v8  ;;  %3660 = vmatpush1.bf16.msra.mxu1 %v6780_v12  ;;  %v6837_v8 = vcombine.high %v440_v2, %v444_v3  ;;  %v324_v11 = vld [vmem:[#allocation3 + $0x3b0] sm:$0xff] }
 0x1d7   :  { %3620 = vmatprep.subr.bf16.mxu0 %v6661_v13  ;;  %3661 = vmatprep.subr.bf16.mxu1 %v6789_v15  ;;  %v448_v12 = vld [vmem:[#allocation3 + $0x790] sm:$0xff]  ;;  %v6836_v15 = vcombine.low %v440_v2, %v444_v3  ;;  %v6717_v17 = vcombine.high %v320_v10, %v324_v11 }
 0x1d8   :  { %v452_v13 = vld [vmem:[#allocation3 + $0x7b0] sm:$0xff] }
 0x1d9   :  { %v6845_v18 = vcombine.high %v448_v12, %v452_v13  ;;  %v476_v41 = vld [vmem:[#allocation3 + $0x870] sm:$0xff] }
 0x1da   :  { %3621 = vmatpush1.bf16.msra.mxu0 %v6660_v22  ;;  %3662 = vmatpush1.bf16.msra.mxu1 %v6788_v23  ;;  %v456_v22 = vld [vmem:[#allocation3 + $0x7d0] sm:$0xff]  ;;  %v6869_v46 = vcombine.high %v472_v40, %v476_v41 }
 0x1db   :  { %3622 = vmatprep.subr.bf16.mxu0 %v6669_v24  ;;  %3663 = vmatprep.subr.bf16.mxu1 %v6797_v25  ;;  %v460_v23 = vld [vmem:[#allocation3 + $0x7f0] sm:$0xff]  ;;  %v6716_v24 = vcombine.low %v320_v10, %v324_v11  ;;  %v6844_v25 = vcombine.low %v448_v12, %v452_v13 }
 0x1dc   :  { %v6853_v27 = vcombine.high %v456_v22, %v460_v23  ;;  %v480_v48 = vld [vmem:[#allocation3 + $0x890] sm:$0xff] }
 0x1dd   :  { %v484_v49 = vld [vmem:[#allocation3 + $0x8b0] sm:$0xff] }
 0x1de   :  { %3623 = vmatpush1.bf16.msra.mxu0 %v6668_v32  ;;  %3664 = vmatpush1.bf16.msra.mxu1 %v6796_v33  ;;  %v592_v32 = vld [vmem:[#allocation3 + $0xc10] sm:$0xff]  ;;  %v6877_v54 = vcombine.high %v480_v48, %v484_v49 }
 0x1df   :  { %3624 = vmatprep.subr.bf16.mxu0 %v6677_v34  ;;  %3665 = vmatprep.subr.bf16.mxu1 %v6805_v35  ;;  %v596_v33 = vld [vmem:[#allocation3 + $0xc30] sm:$0xff]  ;;  %v6724_v34 = vcombine.low %v328_v19, %v332_v21  ;;  %v6852_v35 = vcombine.low %v456_v22, %v460_v23 }
 0x1e0   :  { %v6989_v37 = vcombine.high %v592_v32, %v596_v33  ;;  %v488_v56 = vld [vmem:[#allocation3 + $0x8d0] sm:$0xff] }
 0x1e1   :  { %v492_v57 = vld [vmem:[#allocation3 + $0x8f0] sm:$0xff] }
 0x1e2   :  { %3625 = vmatpush1.bf16.msra.mxu0 %v6676_v42  ;;  %3666 = vmatpush1.bf16.msra.mxu1 %v6804_v43  ;;  %v600_v42 = vld [vmem:[#allocation3 + $0xc50] sm:$0xff]  ;;  %v6885_v0 = vcombine.high %v488_v56, %v492_v57 }
 0x1e3   :  { %3626 = vmatprep.subr.bf16.mxu0 %v6685_v44  ;;  %3667 = vmatprep.subr.bf16.mxu1 %v6813_v45  ;;  %v604_v43 = vld [vmem:[#allocation3 + $0xc70] sm:$0xff]  ;;  %v6860_v44 = vcombine.low %v464_v29, %v468_v30  ;;  %v6988_v45 = vcombine.low %v592_v32, %v596_v33 }
 0x1e4   :  { %v6997_v47 = vcombine.high %v600_v42, %v604_v43  ;;  %v496_v2 = vld [vmem:[#allocation3 + $0x910] sm:$0xff] }
 0x1e5   :  { %v500_v3 = vld [vmem:[#allocation3 + $0x930] sm:$0xff] }
 0x1e6   :  { %3627 = vmatpush1.bf16.msra.mxu0 %v6684_v50  ;;  %3668 = vmatpush1.bf16.msra.mxu1 %v6812_v51  ;;  %v608_v50 = vld [vmem:[#allocation3 + $0xc90] sm:$0xff]  ;;  %v6893_v10 = vcombine.high %v496_v2, %v500_v3 }
 0x1e7   :  { %3628 = vmatprep.subr.bf16.mxu0 %v6693_v52  ;;  %3669 = vmatprep.subr.bf16.mxu1 %v6821_v53  ;;  %v612_v51 = vld [vmem:[#allocation3 + $0xcb0] sm:$0xff]  ;;  %v6868_v52 = vcombine.low %v472_v40, %v476_v41  ;;  %v6996_v53 = vcombine.low %v600_v42, %v604_v43 }
 0x1e8   :  { %v7005_v55 = vcombine.high %v608_v50, %v612_v51  ;;  %v504_v12 = vld [vmem:[#allocation3 + $0x950] sm:$0xff] }
 0x1e9   :  { %v508_v13 = vld [vmem:[#allocation3 + $0x970] sm:$0xff] }
 0x1ea   :  { %3629 = vmatpush1.bf16.msra.mxu0 %v6692_v60  ;;  %3670 = vmatpush1.bf16.msra.mxu1 %v6820_v61  ;;  %v616_v60 = vld [vmem:[#allocation3 + $0xcd0] sm:$0xff]  ;;  %v6901_v19 = vcombine.high %v504_v12, %v508_v13 }
 0x1eb   :  { %3630 = vmatprep.subr.bf16.mxu0 %v6701_v62  ;;  %3671 = vmatprep.subr.bf16.mxu1 %v6829_v63  ;;  %v620_v61 = vld [vmem:[#allocation3 + $0xcf0] sm:$0xff]  ;;  %v6876_v62 = vcombine.low %v480_v48, %v484_v49  ;;  %v7004_v63 = vcombine.low %v608_v50, %v612_v51 }
 0x1ec   :  { %v7013_v1 = vcombine.high %v616_v60, %v620_v61  ;;  %v512_v22 = vld [vmem:[#allocation3 + $0x990] sm:$0xff] }
 0x1ed   :  { %v516_v23 = vld [vmem:[#allocation3 + $0x9b0] sm:$0xff] }
 0x1ee   :  { %3631 = vmatpush1.bf16.msra.mxu0 %v6700_v4  ;;  %3672 = vmatpush1.bf16.msra.mxu1 %v6828_v6  ;;  %v624_v4 = vld [vmem:[#allocation3 + $0xd10] sm:$0xff]  ;;  %v6909_v29 = vcombine.high %v512_v22, %v516_v23 }
 0x1ef   :  { %3632 = vmatprep.subr.bf16.mxu0 %v6709_v7  ;;  %3673 = vmatprep.subr.bf16.mxu1 %v6837_v8  ;;  %v628_v6 = vld [vmem:[#allocation3 + $0xd30] sm:$0xff]  ;;  %v6884_v7 = vcombine.low %v488_v56, %v492_v57  ;;  %v7012_v8 = vcombine.low %v616_v60, %v620_v61 }
 0x1f0   :  { %v7021_v11 = vcombine.high %v624_v4, %v628_v6  ;;  %v520_v33 = vld [vmem:[#allocation3 + $0x9d0] sm:$0xff] }
 0x1f1   :  { %v648_v40 = vld [vmem:[#allocation3 + $0xdd0] sm:$0xff] }
 0x1f2   :  { %3633 = vmatpush1.bf16.msra.mxu0 %v6708_v14  ;;  %3674 = vmatpush1.bf16.msra.mxu1 %v6836_v15  ;;  %v632_v14 = vld [vmem:[#allocation3 + $0xd50] sm:$0xff] }
 0x1f3   :  { %3634 = vmatprep.subr.bf16.mxu0 %v6717_v17  ;;  %3675 = vmatprep.subr.bf16.mxu1 %v6845_v18  ;;  %v636_v15 = vld [vmem:[#allocation3 + $0xd70] sm:$0xff]  ;;  %v6892_v17 = vcombine.low %v496_v2, %v500_v3  ;;  %v7020_v18 = vcombine.low %v624_v4, %v628_v6 }
 0x1f4   :  { %v7029_v21 = vcombine.high %v632_v14, %v636_v15  ;;  %v652_v41 = vld [vmem:[#allocation3 + $0xdf0] sm:$0xff] }
 0x1f5   :  { %v7044_v57 = vcombine.low %v648_v40, %v652_v41 }
 0x1f6   :  { %3635 = vmatpush1.bf16.msra.mxu0 %v6716_v24  ;;  %3676 = vmatpush1.bf16.msra.mxu1 %v6844_v25  ;;  %v640_v24 = vld [vmem:[#allocation3 + $0xd90] sm:$0xff] }
 0x1f7   :  { %3636 = vmatprep.subr.bf16.mxu0 %v6725_v26  ;;  %3677 = vmatprep.subr.bf16.mxu1 %v6853_v27  ;;  %v644_v25 = vld [vmem:[#allocation3 + $0xdb0] sm:$0xff]  ;;  %v6900_v26 = vcombine.low %v504_v12, %v508_v13  ;;  %v7028_v27 = vcombine.low %v632_v14, %v636_v15 }
 0x1f8   :  { %v7037_v32 = vcombine.high %v640_v24, %v644_v25  ;;  %v7036_v49 = vcombine.low %v640_v24, %v644_v25 }
 0x1fa   :  { %3637 = vmatpush1.bf16.msra.mxu0 %v6724_v34  ;;  %3678 = vmatpush1.bf16.msra.mxu1 %v6852_v35  ;;  %v524_v34 = vld [vmem:[#allocation3 + $0x9f0] sm:$0xff] }
 0x1fb   :  { %3688 = vmatprep.subr.bf16.mxu0 %v6861_v36  ;;  %3729 = vmatprep.subr.bf16.mxu1 %v6989_v37  ;;  %v6917_v50 = vcombine.high %v520_v33, %v524_v34  ;;  %v6916_v56 = vcombine.low %v520_v33, %v524_v34 }
 0x1fd   :  { %3639 = vmatmul.mubr.bf16.vlgmr.msra.gmra.mrb[16].mxu0 %v8539_v16  ;;  %3680 = vmatmul.mubr.bf16.vlgmr.msra.gmra.mrb[16].mxu1 %v8544_v20 }
 0x1fe   :  { %3689 = vmatpush1.bf16.msra.mxu0 %v6860_v44  ;;  %3730 = vmatpush1.bf16.msra.mxu1 %v6988_v45  ;;  %v6908_v45 = vcombine.low %v512_v22, %v516_v23 }
 0x1ff   :  { %3690 = vmatprep.subr.bf16.mxu0 %v6869_v46  ;;  %3731 = vmatprep.subr.bf16.mxu1 %v6997_v47 }
 0x200   :  { %3720 = vmatprep.mubr.bf16.mxu0 %v8549_v28  ;;  %3761 = vmatprep.mubr.bf16.mxu1 %v8552_v31 }
 0x202   :  { %3691 = vmatpush1.bf16.msra.mxu0 %v6868_v52  ;;  %3732 = vmatpush1.bf16.msra.mxu1 %v6996_v53  ;;  %v7045_v52 = vcombine.high %v648_v40, %v652_v41  ;;  %v528_v53 = vld [vmem:[#allocation3 + $0xa10] sm:$0xff] }
 0x203   :  { %3692 = vmatprep.subr.bf16.mxu0 %v6877_v54  ;;  %3733 = vmatprep.subr.bf16.mxu1 %v7005_v55  ;;  %v532_v54 = vld [vmem:[#allocation3 + $0xa30] sm:$0xff] }
 0x204   :  { %v660_v55 = vld [vmem:[#allocation3 + $0xe30] sm:$0xff]  ;;  %v6925_v60 = vcombine.high %v528_v53, %v532_v54  ;;  %v6924_v2 = vcombine.low %v528_v53, %v532_v54 }
 0x205   :  { %v696_v40 = vld [vmem:[#allocation3 + $0xf50] sm:$0xff] }
 0x206   :  { %3693 = vmatpush1.bf16.msra.mxu0 %v6876_v62  ;;  %3734 = vmatpush1.bf16.msra.mxu1 %v7004_v63  ;;  %v536_v62 = vld [vmem:[#allocation3 + $0xa50] sm:$0xff] }
 0x207   :  { %3694 = vmatprep.subr.bf16.mxu0 %v6885_v0  ;;  %3735 = vmatprep.subr.bf16.mxu1 %v7013_v1  ;;  %v540_v63 = vld [vmem:[#allocation3 + $0xa70] sm:$0xff] }
 0x208   :  { %v664_v0 = vld [vmem:[#allocation3 + $0xe50] sm:$0xff]  ;;  %v6933_v4 = vcombine.high %v536_v62, %v540_v63  ;;  %v6932_v12 = vcombine.low %v536_v62, %v540_v63 }
 0x209   :  { %v668_v1 = vld [vmem:[#allocation3 + $0xe70] sm:$0xff] }
 0x20a   :  { %3695 = vmatpush1.bf16.msra.mxu0 %v6884_v7  ;;  %3736 = vmatpush1.bf16.msra.mxu1 %v7012_v8  ;;  %v7061_v6 = vcombine.high %v664_v0, %v668_v1  ;;  %v544_v7 = vld [vmem:[#allocation3 + $0xa90] sm:$0xff]  ;;  %v7060_v13 = vcombine.low %v664_v0, %v668_v1  ;;  %v209_v0 = vld [vmem:[#allocation3 + $0x18] sm:$0xff] }
 0x20b   :  { %3696 = vmatprep.subr.bf16.mxu0 %v6893_v10  ;;  %3737 = vmatprep.subr.bf16.mxu1 %v7021_v11  ;;  %v548_v8 = vld [vmem:[#allocation3 + $0xab0] sm:$0xff]  ;;  %v213_v1 = vld [vmem:[#allocation3 + $0x38] sm:$0xff] }
 0x20c   :  { %v672_v10 = vld [vmem:[#allocation3 + $0xe90] sm:$0xff]  ;;  %v6941_v14 = vcombine.high %v544_v7, %v548_v8  ;;  %v6940_v22 = vcombine.low %v544_v7, %v548_v8  ;;  %v6607_v7 = vcombine.high %v209_v0, %v213_v1 }
 0x20d   :  { %v676_v11 = vld [vmem:[#allocation3 + $0xeb0] sm:$0xff] }
 0x20e   :  { %3697 = vmatpush1.bf16.msra.mxu0 %v6892_v17  ;;  %3738 = vmatpush1.bf16.msra.mxu1 %v7020_v18  ;;  %v7069_v15 = vcombine.high %v672_v10, %v676_v11  ;;  %v552_v17 = vld [vmem:[#allocation3 + $0xad0] sm:$0xff]  ;;  %v7068_v23 = vcombine.low %v672_v10, %v676_v11  ;;  %v217_v10 = vld [vmem:[#allocation3 + $0x58] sm:$0xff] }
 0x20f   :  { %3698 = vmatprep.subr.bf16.mxu0 %v6901_v19  ;;  %3739 = vmatprep.subr.bf16.mxu1 %v7029_v21  ;;  %v556_v18 = vld [vmem:[#allocation3 + $0xaf0] sm:$0xff]  ;;  %v221_v11 = vld [vmem:[#allocation3 + $0x78] sm:$0xff] }
 0x210   :  { %v3394_v30 = vpop.f32.mrb[4].mxu0  ;;  %v3435_v36 = vpop.f32.mrb[4].mxu1  ;;  %v680_v19 = vld [vmem:[#allocation3 + $0xed0] sm:$0xff]  ;;  %v6949_v24 = vcombine.high %v552_v17, %v556_v18 }
 0x211   :  { %v3395_v35 = vadd.f32 %v3394_v30, %v8579_v5  ;;  %v3396_v37 = vpop.f32.mrb[5].mxu0  ;;  %v3437_v43 = vpop.f32.mrb[5].mxu1  ;;  %v684_v21 = vld [vmem:[#allocation3 + $0xef0] sm:$0xff] }
 0x212   :  { %v3397_v42 = vadd.f32 %v3396_v37, %v8581_v9  ;;  %v3398_v44 = vpop.f32.mrb[6].mxu0  ;;  %3699 = vmatpush1.bf16.msra.mxu0 %v6900_v26  ;;  %v3439_v47 = vpop.f32.mrb[6].mxu1  ;;  %3740 = vmatpush1.bf16.msra.mxu1 %v7028_v27  ;;  %v656_v9 = vld [vmem:[#allocation3 + $0xe10] sm:$0xff]  ;;  %v7077_v25 = vcombine.high %v680_v19, %v684_v21  ;;  %v7076_v33 = vcombine.low %v680_v19, %v684_v21  ;;  %v225_v19 = vld [vmem:[#allocation3 + $0x98] sm:$0xff] }
 0x213   :  { %v8589_v46 = vadd.f32 %v3435_v36, %v3395_v35  ;;  %v3399_v48 = vpop.f32.mrb[7].mxu0  ;;  %3700 = vmatprep.subr.bf16.mxu0 %v6909_v29  ;;  %v3440_v5 = vpop.f32.mrb[7].mxu1  ;;  %3741 = vmatprep.subr.bf16.mxu1 %v7037_v32  ;;  %v7053_v61 = vcombine.high %v656_v9, %v660_v55  ;;  %v7052_v3 = vcombine.low %v656_v9, %v660_v55  ;;  %v560_v26 = vld [vmem:[#allocation3 + $0xb10] sm:$0xff]  ;;  %v229_v21 = vld [vmem:[#allocation3 + $0xb8] sm:$0xff] }
 0x214   :  { %v8591_v51 = vadd.f32 %v3437_v43, %v3397_v42  ;;  %v564_v27 = vld [vmem:[#allocation3 + $0xb30] sm:$0xff]  ;;  %v6948_v32 = vcombine.low %v552_v17, %v556_v18  ;;  %v6615_v17 = vcombine.high %v217_v10, %v221_v11 }
 0x215   :  { %v688_v29 = vld [vmem:[#allocation3 + $0xf10] sm:$0xff]  ;;  %v6957_v34 = vcombine.high %v560_v26, %v564_v27  ;;  %v6956_v42 = vcombine.low %v560_v26, %v564_v27  ;;  %v6623_v26 = vcombine.high %v225_v19, %v229_v21 }
 0x216   :  { %3701 = vmatpush1.bf16.msra.mxu0 %v6908_v45  ;;  %3742 = vmatpush1.bf16.msra.mxu1 %v7036_v49  ;;  %v692_v30 = vld [vmem:[#allocation3 + $0xf30] sm:$0xff] }
 0x217   :  { %3702 = vmatprep.subr.bf16.mxu0 %v6917_v50  ;;  %3743 = vmatprep.subr.bf16.mxu1 %v7045_v52  ;;  %v7085_v35 = vcombine.high %v688_v29, %v692_v30  ;;  %v568_v36 = vld [vmem:[#allocation3 + $0xb50] sm:$0xff]  ;;  %v7084_v43 = vcombine.low %v688_v29, %v692_v30  ;;  %v233_v29 = vld [vmem:[#allocation3 + $0xd8] sm:$0xff] }
 0x218   :  { %v572_v37 = vld [vmem:[#allocation3 + $0xb70] sm:$0xff]  ;;  %v237_v30 = vld [vmem:[#allocation3 + $0xf8] sm:$0xff] }
 0x219   :  { %v700_v41 = vld [vmem:[#allocation3 + $0xf70] sm:$0xff]  ;;  %v6965_v44 = vcombine.high %v568_v36, %v572_v37  ;;  %v6964_v5 = vcombine.low %v568_v36, %v572_v37  ;;  %v6631_v36 = vcombine.high %v233_v29, %v237_v30 }
 0x21a   :  { %3703 = vmatpush1.bf16.msra.mxu0 %v6916_v56  ;;  %3744 = vmatpush1.bf16.msra.mxu1 %v7044_v57  ;;  %v7093_v45 = vcombine.high %v696_v40, %v700_v41  ;;  %v576_v47 = vld [vmem:[#allocation3 + $0xb90] sm:$0xff]  ;;  %v7092_v52 = vcombine.low %v696_v40, %v700_v41  ;;  %v241_v40 = vld [vmem:[#allocation3 + $0x118] sm:$0xff] }
 0x21b   :  { %3704 = vmatprep.subr.bf16.mxu0 %v6925_v60  ;;  %3745 = vmatprep.subr.bf16.mxu1 %v7053_v61  ;;  %v580_v48 = vld [vmem:[#allocation3 + $0xbb0] sm:$0xff]  ;;  %v245_v41 = vld [vmem:[#allocation3 + $0x138] sm:$0xff] }
 0x21c   :  { %v704_v49 = vld [vmem:[#allocation3 + $0xf90] sm:$0xff]  ;;  %v6973_v53 = vcombine.high %v576_v47, %v580_v48  ;;  %v6972_v60 = vcombine.low %v576_v47, %v580_v48  ;;  %v249_v47 = vld [vmem:[#allocation3 + $0x158] sm:$0xff] }
 0x21d   :  { %v708_v50 = vld [vmem:[#allocation3 + $0xfb0] sm:$0xff]  ;;  %v253_v48 = vld [vmem:[#allocation3 + $0x178] sm:$0xff] }
 0x21e   :  { %3705 = vmatpush1.bf16.msra.mxu0 %v6924_v2  ;;  %3746 = vmatpush1.bf16.msra.mxu1 %v7052_v3  ;;  %v7101_v54 = vcombine.high %v704_v49, %v708_v50  ;;  %v584_v9 = vld [vmem:[#allocation3 + $0xbd0] sm:$0xff]  ;;  %v7100_v61 = vcombine.low %v704_v49, %v708_v50  ;;  %v337_v2 = vld [vmem:[#allocation3 + $0x418] sm:$0xff] }
 0x21f   :  { %3706 = vmatprep.subr.bf16.mxu0 %v6933_v4  ;;  %3747 = vmatprep.subr.bf16.mxu1 %v7061_v6  ;;  %v588_v55 = vld [vmem:[#allocation3 + $0xbf0] sm:$0xff]  ;;  %v341_v3 = vld [vmem:[#allocation3 + $0x438] sm:$0xff] }
 0x220   :  { %v712_v56 = vld [vmem:[#allocation3 + $0xfd0] sm:$0xff]  ;;  %v6981_v62 = vcombine.high %v584_v9, %v588_v55  ;;  %v6980_v4 = vcombine.low %v584_v9, %v588_v55  ;;  %v6735_v8 = vcombine.high %v337_v2, %v341_v3  ;;  %v377_v49 = vld [vmem:[#allocation3 + $0x558] sm:$0xff] }
 0x221   :  { %v716_v57 = vld [vmem:[#allocation3 + $0xff0] sm:$0xff]  ;;  %v381_v50 = vld [vmem:[#allocation3 + $0x578] sm:$0xff] }
 0x222   :  { %3707 = vmatpush1.bf16.msra.mxu0 %v6932_v12  ;;  %3748 = vmatpush1.bf16.msra.mxu1 %v7060_v13  ;;  %v7109_v63 = vcombine.high %v712_v56, %v716_v57  ;;  %v7108_v6 = vcombine.low %v712_v56, %v716_v57  ;;  %v345_v12 = vld [vmem:[#allocation3 + $0x458] sm:$0xff] }
 0x223   :  { %3708 = vmatprep.subr.bf16.mxu0 %v6941_v14  ;;  %3749 = vmatprep.subr.bf16.mxu1 %v7069_v15  ;;  %v349_v13 = vld [vmem:[#allocation3 + $0x478] sm:$0xff]  ;;  %v6606_v14 = vcombine.low %v209_v0, %v213_v1  ;;  %v6734_v15 = vcombine.low %v337_v2, %v341_v3 }
 0x224   :  { %v6743_v18 = vcombine.high %v345_v12, %v349_v13  ;;  %v257_v9 = vld [vmem:[#allocation3 + $0x198] sm:$0xff] }
 0x225   :  { %v261_v55 = vld [vmem:[#allocation3 + $0x1b8] sm:$0xff] }
 0x226   :  { %3709 = vmatpush1.bf16.msra.mxu0 %v6940_v22  ;;  %3750 = vmatpush1.bf16.msra.mxu1 %v7068_v23  ;;  %v353_v22 = vld [vmem:[#allocation3 + $0x498] sm:$0xff] }
 0x227   :  { %3710 = vmatprep.subr.bf16.mxu0 %v6949_v24  ;;  %3751 = vmatprep.subr.bf16.mxu1 %v7077_v25  ;;  %v357_v23 = vld [vmem:[#allocation3 + $0x4b8] sm:$0xff]  ;;  %v6614_v24 = vcombine.low %v217_v10, %v221_v11  ;;  %v6742_v25 = vcombine.low %v345_v12, %v349_v13  ;;  %v6654_v12 = vcombine.low %v257_v9, %v261_v55 }
 0x228   :  { %v6751_v27 = vcombine.high %v353_v22, %v357_v23  ;;  %v385_v56 = vld [vmem:[#allocation3 + $0x598] sm:$0xff] }
 0x229   :  { %v389_v57 = vld [vmem:[#allocation3 + $0x5b8] sm:$0xff] }
 0x22a   :  { %3711 = vmatpush1.bf16.msra.mxu0 %v6948_v32  ;;  %3752 = vmatpush1.bf16.msra.mxu1 %v7076_v33  ;;  %v361_v32 = vld [vmem:[#allocation3 + $0x4d8] sm:$0xff]  ;;  %v6783_v0 = vcombine.high %v385_v56, %v389_v57 }
 0x22b   :  { %3712 = vmatprep.subr.bf16.mxu0 %v6957_v34  ;;  %3753 = vmatprep.subr.bf16.mxu1 %v7085_v35  ;;  %v365_v33 = vld [vmem:[#allocation3 + $0x4f8] sm:$0xff]  ;;  %v6622_v34 = vcombine.low %v225_v19, %v229_v21  ;;  %v6750_v35 = vcombine.low %v353_v22, %v357_v23 }
 0x22c   :  { %v6759_v37 = vcombine.high %v361_v32, %v365_v33  ;;  %v265_v1 = vld [vmem:[#allocation3 + $0x1d8] sm:$0xff] }
 0x22d   :  { %v269_v2 = vld [vmem:[#allocation3 + $0x1f8] sm:$0xff] }
 0x22e   :  { %3713 = vmatpush1.bf16.msra.mxu0 %v6956_v42  ;;  %3754 = vmatpush1.bf16.msra.mxu1 %v7084_v43  ;;  %v369_v42 = vld [vmem:[#allocation3 + $0x518] sm:$0xff] }
 0x22f   :  { %3714 = vmatprep.subr.bf16.mxu0 %v6965_v44  ;;  %3755 = vmatprep.subr.bf16.mxu1 %v7093_v45  ;;  %v373_v43 = vld [vmem:[#allocation3 + $0x538] sm:$0xff]  ;;  %v6630_v44 = vcombine.low %v233_v29, %v237_v30  ;;  %v6639_v45 = vcombine.high %v241_v40, %v245_v41 }
 0x230   :  { %v273_v22 = vld [vmem:[#allocation3 + $0x218] sm:$0xff] }
 0x231   :  { %v277_v23 = vld [vmem:[#allocation3 + $0x238] sm:$0xff] }
 0x232   :  { %3715 = vmatpush1.bf16.msra.mxu0 %v6964_v5  ;;  %3756 = vmatpush1.bf16.msra.mxu1 %v7092_v52  ;;  %v6638_v5 = vcombine.low %v241_v40, %v245_v41  ;;  %v6766_v52 = vcombine.low %v369_v42, %v373_v43  ;;  %v6671_v29 = vcombine.high %v273_v22, %v277_v23 }
 0x233   :  { %3716 = vmatprep.subr.bf16.mxu0 %v6973_v53  ;;  %3757 = vmatprep.subr.bf16.mxu1 %v7101_v54  ;;  %v6647_v53 = vcombine.high %v249_v47, %v253_v48  ;;  %v6775_v54 = vcombine.high %v377_v49, %v381_v50 }
 0x236   :  { %3717 = vmatpush1.bf16.msra.mxu0 %v6972_v60  ;;  %3758 = vmatpush1.bf16.msra.mxu1 %v7100_v61  ;;  %v6646_v60 = vcombine.low %v249_v47, %v253_v48  ;;  %v6774_v61 = vcombine.low %v377_v49, %v381_v50  ;;  %v297_v49 = vld [vmem:[#allocation3 + $0x2d8] sm:$0xff] }
 0x237   :  { %3718 = vmatprep.subr.bf16.mxu0 %v6981_v62  ;;  %3759 = vmatprep.subr.bf16.mxu1 %v7109_v63  ;;  %v6655_v62 = vcombine.high %v257_v9, %v261_v55  ;;  %v301_v50 = vld [vmem:[#allocation3 + $0x2f8] sm:$0xff] }
 0x238   :  { %v6695_v9 = vcombine.high %v297_v49, %v301_v50 }
 0x23a   :  { %3719 = vmatpush1.bf16.msra.mxu0 %v6980_v4  ;;  %3760 = vmatpush1.bf16.msra.mxu1 %v7108_v6  ;;  %v393_v6 = vld [vmem:[#allocation3 + $0x5d8] sm:$0xff] }
 0x23b   :  { %3770 = vmatprep.subr.bf16.mxu0 %v6607_v7  ;;  %3811 = vmatprep.subr.bf16.mxu1 %v6735_v8  ;;  %v397_v7 = vld [vmem:[#allocation3 + $0x5f8] sm:$0xff] }
 0x23c   :  { %v6791_v21 = vcombine.high %v393_v6, %v397_v7 }
 0x23d   :  { %3721 = vmatmul.mubr.bf16.vlgmr.msra.gmra.mrb[20].mxu0 %v8563_v38  ;;  %3762 = vmatmul.mubr.bf16.vlgmr.msra.gmra.mrb[20].mxu1 %v8565_v39 }
 0x23e   :  { %3771 = vmatpush1.bf16.msra.mxu0 %v6606_v14  ;;  %3812 = vmatpush1.bf16.msra.mxu1 %v6734_v15 }
 0x23f   :  { %3772 = vmatprep.subr.bf16.mxu0 %v6615_v17  ;;  %3813 = vmatprep.subr.bf16.mxu1 %v6743_v18  ;;  %v6782_v17 = vcombine.low %v385_v56, %v389_v57  ;;  %v6663_v18 = vcombine.high %v265_v1, %v269_v2  ;;  %v305_v56 = vld [vmem:[#allocation3 + $0x318] sm:$0xff] }
 0x240   :  { %3802 = vmatprep.mubr.bf16.mxu0 %v8527_v58  ;;  %3843 = vmatprep.mubr.bf16.mxu1 %v8529_v59  ;;  %v6758_v58 = vcombine.low %v361_v32, %v365_v33  ;;  %v6767_v59 = vcombine.high %v369_v42, %v373_v43  ;;  %v281_v32 = vld [vmem:[#allocation3 + $0x258] sm:$0xff] }
 0x241   :  { %v285_v33 = vld [vmem:[#allocation3 + $0x278] sm:$0xff] }
 0x242   :  { %3773 = vmatpush1.bf16.msra.mxu0 %v6614_v24  ;;  %3814 = vmatpush1.bf16.msra.mxu1 %v6742_v25  ;;  %v401_v24 = vld [vmem:[#allocation3 + $0x618] sm:$0xff]  ;;  %v6679_v40 = vcombine.high %v281_v32, %v285_v33 }
 0x243   :  { %3774 = vmatprep.subr.bf16.mxu0 %v6623_v26  ;;  %3815 = vmatprep.subr.bf16.mxu1 %v6751_v27  ;;  %v405_v25 = vld [vmem:[#allocation3 + $0x638] sm:$0xff]  ;;  %v6662_v26 = vcombine.low %v265_v1, %v269_v2  ;;  %v6790_v27 = vcombine.low %v393_v6, %v397_v7 }
 0x244   :  { %v6799_v30 = vcombine.high %v401_v24, %v405_v25  ;;  %v289_v42 = vld [vmem:[#allocation3 + $0x298] sm:$0xff] }
 0x245   :  { %v293_v43 = vld [vmem:[#allocation3 + $0x2b8] sm:$0xff] }
 0x246   :  { %3775 = vmatpush1.bf16.msra.mxu0 %v6622_v34  ;;  %3816 = vmatpush1.bf16.msra.mxu1 %v6750_v35  ;;  %v409_v34 = vld [vmem:[#allocation3 + $0x658] sm:$0xff]  ;;  %v6687_v47 = vcombine.high %v289_v42, %v293_v43 }
 0x247   :  { %3776 = vmatprep.subr.bf16.mxu0 %v6631_v36  ;;  %3817 = vmatprep.subr.bf16.mxu1 %v6759_v37  ;;  %v413_v35 = vld [vmem:[#allocation3 + $0x678] sm:$0xff]  ;;  %v6670_v36 = vcombine.low %v273_v22, %v277_v23  ;;  %v6798_v37 = vcombine.low %v401_v24, %v405_v25 }
 0x248   :  { %v6807_v41 = vcombine.high %v409_v34, %v413_v35  ;;  %v309_v57 = vld [vmem:[#allocation3 + $0x338] sm:$0xff] }
 0x249   :  { %v313_v2 = vld [vmem:[#allocation3 + $0x358] sm:$0xff]  ;;  %v6702_v7 = vcombine.low %v305_v56, %v309_v57 }
 0x24a   :  { %3777 = vmatpush1.bf16.msra.mxu0 %v6630_v44  ;;  %3818 = vmatpush1.bf16.msra.mxu1 %v6758_v58  ;;  %v417_v44 = vld [vmem:[#allocation3 + $0x698] sm:$0xff] }
 0x24b   :  { %3778 = vmatprep.subr.bf16.mxu0 %v6639_v45  ;;  %3819 = vmatprep.subr.bf16.mxu1 %v6767_v59  ;;  %v421_v58 = vld [vmem:[#allocation3 + $0x6b8] sm:$0xff]  ;;  %v6678_v45 = vcombine.low %v281_v32, %v285_v33  ;;  %v6806_v59 = vcombine.low %v409_v34, %v413_v35 }
 0x24c   :  { %v6815_v48 = vcombine.high %v417_v44, %v421_v58  ;;  %v445_v6 = vld [vmem:[#allocation3 + $0x778] sm:$0xff] }
 0x24d   :  { %v329_v24 = vld [vmem:[#allocation3 + $0x3d8] sm:$0xff] }
 0x24e   :  { %3779 = vmatpush1.bf16.msra.mxu0 %v6638_v5  ;;  %3820 = vmatpush1.bf16.msra.mxu1 %v6766_v52  ;;  %v425_v5 = vld [vmem:[#allocation3 + $0x6d8] sm:$0xff] }
 0x24f   :  { %3780 = vmatprep.subr.bf16.mxu0 %v6647_v53  ;;  %3821 = vmatprep.subr.bf16.mxu1 %v6775_v54  ;;  %v429_v52 = vld [vmem:[#allocation3 + $0x6f8] sm:$0xff]  ;;  %v6686_v53 = vcombine.low %v289_v42, %v293_v43  ;;  %v6814_v54 = vcombine.low %v417_v44, %v421_v58 }
 0x250   :  { %v3476_v63 = vpop.f32.mrb[8].mxu0  ;;  %v3517_v3 = vpop.f32.mrb[8].mxu1  ;;  %v6823_v55 = vcombine.high %v425_v5, %v429_v52  ;;  %v333_v25 = vld [vmem:[#allocation3 + $0x3f8] sm:$0xff] }
 0x251   :  { %v3478_v4 = vpop.f32.mrb[9].mxu0  ;;  %v8597_v8 = vadd.f32 %v3517_v3, %v3476_v63  ;;  %v3519_v10 = vpop.f32.mrb[9].mxu1  ;;  %v6822_v63 = vcombine.low %v425_v5, %v429_v52  ;;  %v317_v3 = vld [vmem:[#allocation3 + $0x378] sm:$0xff]  ;;  %v6727_v32 = vcombine.high %v329_v24, %v333_v25 }
 0x252   :  { %v3480_v11 = vpop.f32.mrb[10].mxu0  ;;  %3781 = vmatpush1.bf16.msra.mxu0 %v6646_v60  ;;  %v8599_v13 = vadd.f32 %v3519_v10, %v3478_v4  ;;  %v3521_v14 = vpop.f32.mrb[10].mxu1  ;;  %3822 = vmatpush1.bf16.msra.mxu1 %v6774_v61  ;;  %v433_v60 = vld [vmem:[#allocation3 + $0x718] sm:$0xff] }
 0x253   :  { %v3481_v15 = vpop.f32.mrb[11].mxu0  ;;  %3782 = vmatprep.subr.bf16.mxu0 %v6655_v62  ;;  %v3522_v19 = vpop.f32.mrb[11].mxu1  ;;  %3823 = vmatprep.subr.bf16.mxu1 %v6783_v0  ;;  %v437_v61 = vld [vmem:[#allocation3 + $0x738] sm:$0xff]  ;;  %v6694_v62 = vcombine.low %v297_v49, %v301_v50  ;;  %v6703_v0 = vcombine.high %v305_v56, %v309_v57  ;;  %v6711_v11 = vcombine.high %v313_v2, %v317_v3 }
 0x254   :  { %v6831_v1 = vcombine.high %v433_v60, %v437_v61  ;;  %v441_v4 = vld [vmem:[#allocation3 + $0x758] sm:$0xff]  ;;  %v6830_v10 = vcombine.low %v433_v60, %v437_v61  ;;  %v6710_v19 = vcombine.low %v313_v2, %v317_v3 }
 0x255   :  { %v321_v14 = vld [vmem:[#allocation3 + $0x398] sm:$0xff] }
 0x256   :  { %3783 = vmatpush1.bf16.msra.mxu0 %v6654_v12  ;;  %3824 = vmatpush1.bf16.msra.mxu1 %v6782_v17  ;;  %v6839_v12 = vcombine.high %v441_v4, %v445_v6  ;;  %v325_v15 = vld [vmem:[#allocation3 + $0x3b8] sm:$0xff] }
 0x257   :  { %3784 = vmatprep.subr.bf16.mxu0 %v6663_v18  ;;  %3825 = vmatprep.subr.bf16.mxu1 %v6791_v21  ;;  %v449_v17 = vld [vmem:[#allocation3 + $0x798] sm:$0xff]  ;;  %v6838_v21 = vcombine.low %v441_v4, %v445_v6  ;;  %v6719_v22 = vcombine.high %v321_v14, %v325_v15 }
 0x258   :  { %v453_v18 = vld [vmem:[#allocation3 + $0x7b8] sm:$0xff] }
 0x259   :  { %v6847_v23 = vcombine.high %v449_v17, %v453_v18  ;;  %v465_v34 = vld [vmem:[#allocation3 + $0x818] sm:$0xff] }
 0x25a   :  { %3785 = vmatpush1.bf16.msra.mxu0 %v6662_v26  ;;  %3826 = vmatpush1.bf16.msra.mxu1 %v6790_v27  ;;  %v457_v26 = vld [vmem:[#allocation3 + $0x7d8] sm:$0xff] }
 0x25b   :  { %3786 = vmatprep.subr.bf16.mxu0 %v6671_v29  ;;  %3827 = vmatprep.subr.bf16.mxu1 %v6799_v30  ;;  %v461_v27 = vld [vmem:[#allocation3 + $0x7f8] sm:$0xff]  ;;  %v6718_v29 = vcombine.low %v321_v14, %v325_v15  ;;  %v6846_v30 = vcombine.low %v449_v17, %v453_v18 }
 0x25c   :  { %v6855_v33 = vcombine.high %v457_v26, %v461_v27  ;;  %v469_v35 = vld [vmem:[#allocation3 + $0x838] sm:$0xff] }
 0x25d   :  { %v6863_v42 = vcombine.high %v465_v34, %v469_v35  ;;  %v473_v44 = vld [vmem:[#allocation3 + $0x858] sm:$0xff] }
 0x25e   :  { %3787 = vmatpush1.bf16.msra.mxu0 %v6670_v36  ;;  %3828 = vmatpush1.bf16.msra.mxu1 %v6798_v37  ;;  %v593_v36 = vld [vmem:[#allocation3 + $0xc18] sm:$0xff] }
 0x25f   :  { %3788 = vmatprep.subr.bf16.mxu0 %v6679_v40  ;;  %3829 = vmatprep.subr.bf16.mxu1 %v6807_v41  ;;  %v597_v37 = vld [vmem:[#allocation3 + $0xc38] sm:$0xff]  ;;  %v6726_v40 = vcombine.low %v329_v24, %v333_v25  ;;  %v6854_v41 = vcombine.low %v457_v26, %v461_v27  ;;  %v8609_v24 = vld [vmem:[#allocation5] sm:$0xff] }
 0x260   :  { %v6991_v43 = vcombine.high %v593_v36, %v597_v37  ;;  %v477_v58 = vld [vmem:[#allocation3 + $0x878] sm:$0xff] }
 0x261   :  { %v6871_v49 = vcombine.high %v473_v44, %v477_v58  ;;  %v481_v5 = vld [vmem:[#allocation3 + $0x898] sm:$0xff] }
 0x262   :  { %3789 = vmatpush1.bf16.msra.mxu0 %v6678_v45  ;;  %3830 = vmatpush1.bf16.msra.mxu1 %v6806_v59  ;;  %v601_v45 = vld [vmem:[#allocation3 + $0xc58] sm:$0xff] }
 0x263   :  { %3790 = vmatprep.subr.bf16.mxu0 %v6687_v47  ;;  %3831 = vmatprep.subr.bf16.mxu1 %v6815_v48  ;;  %v605_v59 = vld [vmem:[#allocation3 + $0xc78] sm:$0xff]  ;;  %v6862_v47 = vcombine.low %v465_v34, %v469_v35  ;;  %v6990_v48 = vcombine.low %v593_v36, %v597_v37 }
 0x264   :  { %v6999_v50 = vcombine.high %v601_v45, %v605_v59  ;;  %v485_v52 = vld [vmem:[#allocation3 + $0x8b8] sm:$0xff] }
 0x265   :  { %v6879_v56 = vcombine.high %v481_v5, %v485_v52  ;;  %v489_v60 = vld [vmem:[#allocation3 + $0x8d8] sm:$0xff] }
 0x266   :  { %3791 = vmatpush1.bf16.msra.mxu0 %v6686_v53  ;;  %3832 = vmatpush1.bf16.msra.mxu1 %v6814_v54  ;;  %v609_v53 = vld [vmem:[#allocation3 + $0xc98] sm:$0xff] }
 0x267   :  { %3792 = vmatprep.subr.bf16.mxu0 %v6695_v9  ;;  %3833 = vmatprep.subr.bf16.mxu1 %v6823_v55  ;;  %v613_v54 = vld [vmem:[#allocation3 + $0xcb8] sm:$0xff]  ;;  %v6870_v9 = vcombine.low %v473_v44, %v477_v58  ;;  %v6998_v55 = vcombine.low %v601_v45, %v605_v59 }
 0x268   :  { %v7007_v57 = vcombine.high %v609_v53, %v613_v54  ;;  %v493_v61 = vld [vmem:[#allocation3 + $0x8f8] sm:$0xff] }
 0x269   :  { %v497_v3 = vld [vmem:[#allocation3 + $0x918] sm:$0xff] }
 0x26a   :  { %3793 = vmatpush1.bf16.msra.mxu0 %v6694_v62  ;;  %3834 = vmatpush1.bf16.msra.mxu1 %v6822_v63  ;;  %v617_v62 = vld [vmem:[#allocation3 + $0xcd8] sm:$0xff] }
 0x26b   :  { %3794 = vmatprep.subr.bf16.mxu0 %v6703_v0  ;;  %3835 = vmatprep.subr.bf16.mxu1 %v6831_v1  ;;  %v621_v63 = vld [vmem:[#allocation3 + $0xcf8] sm:$0xff]  ;;  %v3963_v0 = vlaneseq  ;;  %v6887_v1 = vcombine.high %v489_v60, %v493_v61 }
 0x26c   :  { %v7015_v2 = vcombine.high %v617_v62, %v621_v63  ;;  %v501_v4 = vld [vmem:[#allocation3 + $0x938] sm:$0xff] }
 0x26d   :  { %v625_v6 = vld [vmem:[#allocation3 + $0xd18] sm:$0xff] }
 0x26e   :  { %3795 = vmatpush1.bf16.msra.mxu0 %v6702_v7  ;;  %3836 = vmatpush1.bf16.msra.mxu1 %v6830_v10  ;;  %v629_v7 = vld [vmem:[#allocation3 + $0xd38] sm:$0xff]  ;;  %v6886_v10 = vcombine.low %v489_v60, %v493_v61 }
 0x26f   :  { %3796 = vmatprep.subr.bf16.mxu0 %v6711_v11  ;;  %3837 = vmatprep.subr.bf16.mxu1 %v6839_v12  ;;  %v6895_v11 = vcombine.high %v497_v3, %v501_v4  ;;  %v7023_v12 = vcombine.high %v625_v6, %v629_v7  ;;  %v505_v14 = vld [vmem:[#allocation3 + $0x958] sm:$0xff] }
 0x270   :  { %v509_v15 = vld [vmem:[#allocation3 + $0x978] sm:$0xff] }
 0x271   :  { %v633_v17 = vld [vmem:[#allocation3 + $0xd58] sm:$0xff] }
 0x272   :  { %3797 = vmatpush1.bf16.msra.mxu0 %v6710_v19  ;;  %3838 = vmatpush1.bf16.msra.mxu1 %v6838_v21  ;;  %v637_v18 = vld [vmem:[#allocation3 + $0xd78] sm:$0xff]  ;;  %v6894_v19 = vcombine.low %v497_v3, %v501_v4 }
 0x273   :  { %3798 = vmatprep.subr.bf16.mxu0 %v6719_v22  ;;  %3839 = vmatprep.subr.bf16.mxu1 %v6847_v23  ;;  %v7022_v22 = vcombine.low %v625_v6, %v629_v7  ;;  %v6903_v23 = vcombine.high %v505_v14, %v509_v15  ;;  %v7031_v25 = vcombine.high %v633_v17, %v637_v18  ;;  %v513_v26 = vld [vmem:[#allocation3 + $0x998] sm:$0xff] }
 0x274   :  { %v517_v27 = vld [vmem:[#allocation3 + $0x9b8] sm:$0xff]  ;;  %v7030_v34 = vcombine.low %v633_v17, %v637_v18 }
 0x275   :  { %v6911_v35 = vcombine.high %v513_v26, %v517_v27  ;;  %v649_v58 = vld [vmem:[#allocation3 + $0xdd8] sm:$0xff] }
 0x276   :  { %3799 = vmatpush1.bf16.msra.mxu0 %v6718_v29  ;;  %3840 = vmatpush1.bf16.msra.mxu1 %v6846_v30  ;;  %v641_v29 = vld [vmem:[#allocation3 + $0xd98] sm:$0xff] }
 0x277   :  { %3800 = vmatprep.subr.bf16.mxu0 %v6727_v32  ;;  %3841 = vmatprep.subr.bf16.mxu1 %v6855_v33  ;;  %v645_v30 = vld [vmem:[#allocation3 + $0xdb8] sm:$0xff]  ;;  %v6902_v32 = vcombine.low %v505_v14, %v509_v15 }
 0x278   :  { %v7039_v37 = vcombine.high %v641_v29, %v645_v30  ;;  %v653_v45 = vld [vmem:[#allocation3 + $0xdf8] sm:$0xff] }
 0x279   :  { %v657_v60 = vld [vmem:[#allocation3 + $0xe18] sm:$0xff] }
 0x27a   :  { %3801 = vmatpush1.bf16.msra.mxu0 %v6726_v40  ;;  %3842 = vmatpush1.bf16.msra.mxu1 %v6854_v41  ;;  %v521_v40 = vld [vmem:[#allocation3 + $0x9d8] sm:$0xff] }
 0x27b   :  { %3852 = vmatprep.subr.bf16.mxu0 %v6863_v42  ;;  %3893 = vmatprep.subr.bf16.mxu1 %v6991_v43  ;;  %v525_v41 = vld [vmem:[#allocation3 + $0x9f8] sm:$0xff] }
 0x27c   :  { %v661_v61 = vld [vmem:[#allocation3 + $0xe38] sm:$0xff] }
 0x27d   :  { %3803 = vmatmul.mubr.bf16.vlgmr.msra.gmra.mrb[24].mxu0 %v8539_v16  ;;  %3844 = vmatmul.mubr.bf16.vlgmr.msra.gmra.mrb[24].mxu1 %v8544_v20  ;;  %v6878_v16 = vcombine.low %v481_v5, %v485_v52  ;;  %v7006_v20 = vcombine.low %v609_v53, %v613_v54  ;;  %v665_v3 = vld [vmem:[#allocation3 + $0xe58] sm:$0xff]  ;;  %v7054_v7 = vcombine.low %v657_v60, %v661_v61 }
 0x27e   :  { %3853 = vmatpush1.bf16.msra.mxu0 %v6862_v47  ;;  %3894 = vmatpush1.bf16.msra.mxu1 %v6990_v48  ;;  %v669_v4 = vld [vmem:[#allocation3 + $0xe78] sm:$0xff] }
 0x27f   :  { %3854 = vmatprep.subr.bf16.mxu0 %v6871_v49  ;;  %3895 = vmatprep.subr.bf16.mxu1 %v6999_v50  ;;  %v6910_v49 = vcombine.low %v513_v26, %v517_v27  ;;  %v7038_v50 = vcombine.low %v641_v29, %v645_v30  ;;  %v673_v14 = vld [vmem:[#allocation3 + $0xe98] sm:$0xff]  ;;  %v7062_v18 = vcombine.low %v665_v3, %v669_v4 }
 0x280   :  { %3884 = vmatprep.mubr.bf16.mxu0 %v8549_v28  ;;  %3925 = vmatprep.mubr.bf16.mxu1 %v8552_v31  ;;  %v8606_v28 = vshrl.u32 %v3963_v0, 7  ;;  %v7014_v31 = vcombine.low %v617_v62, %v621_v63  ;;  %v6918_v62 = vcombine.low %v521_v40, %v525_v41  ;;  %v7046_v63 = vcombine.low %v649_v58, %v653_v45  ;;  %v677_v15 = vld [vmem:[#allocation3 + $0xeb8] sm:$0xff] }
 0x281   :  { %v681_v26 = vld [vmem:[#allocation3 + $0xed8] sm:$0xff]  ;;  %v7070_v30 = vcombine.low %v673_v14, %v677_v15 }
 0x282   :  { %3855 = vmatpush1.bf16.msra.mxu0 %v6870_v9  ;;  %3896 = vmatpush1.bf16.msra.mxu1 %v6998_v55  ;;  %v3969_v21 = vsub.s32 1, %v8606_v28  ;;  %v685_v27 = vld [vmem:[#allocation3 + $0xef8] sm:$0xff] }
 0x283   :  { %3856 = vmatprep.subr.bf16.mxu0 %v6879_v56  ;;  %3897 = vmatprep.subr.bf16.mxu1 %v7007_v57  ;;  %v529_v56 = vld [vmem:[#allocation3 + $0xa18] sm:$0xff] }
 0x284   :  { %v3970_v33 = vrot.slane %v8609_v24, %v3969_v21  ;;  %v533_v57 = vld [vmem:[#allocation3 + $0xa38] sm:$0xff] }
 0x285   :  { %v6926_v6 = vcombine.low %v529_v56, %v533_v57 }
 0x286   :  { %3857 = vmatpush1.bf16.msra.mxu0 %v6878_v16  ;;  %3898 = vmatpush1.bf16.msra.mxu1 %v7006_v20  ;;  %v8617_v5 = vadd.f32 %v3970_v33, %v8591_v51  ;;  %v6927_v16 = vcombine.high %v529_v56, %v533_v57  ;;  %v7055_v20 = vcombine.high %v657_v60, %v661_v61  ;;  %v709_v56 = vld [vmem:[#allocation3 + $0xfb8] sm:$0xff] }
 0x287   :  { %3858 = vmatprep.subr.bf16.mxu0 %v6887_v1  ;;  %3899 = vmatprep.subr.bf16.mxu1 %v7015_v2  ;;  %v537_v1 = vld [vmem:[#allocation3 + $0xa58] sm:$0xff]  ;;  %v7079_v33 = vcombine.high %v681_v26, %v685_v27 }
 0x288   :  { %v7113_v51 = vmul.f32 -1.442695, %v8617_v5  ;;  %v541_v2 = vld [vmem:[#allocation3 + $0xa78] sm:$0xff] }
 0x289   :  { %v6934_v17 = vcombine.low %v537_v1, %v541_v2 }
 0x28a   :  { %3859 = vmatpush1.bf16.msra.mxu0 %v6886_v10  ;;  %3900 = vmatpush1.bf16.msra.mxu1 %v7014_v31  ;;  %8013 = vpow2.f32 %v7113_v51  ;;  %v6935_v10 = vcombine.high %v537_v1, %v541_v2  ;;  %v7063_v31 = vcombine.high %v665_v3, %v669_v4  ;;  %v585_v51 = vld [vmem:[#allocation3 + $0xbd8] sm:$0xff] }
 0x28b   :  { %3860 = vmatprep.subr.bf16.mxu0 %v6895_v11  ;;  %3901 = vmatprep.subr.bf16.mxu1 %v7023_v12  ;;  %v545_v11 = vld [vmem:[#allocation3 + $0xa98] sm:$0xff] }
 0x28c   :  { %v549_v12 = vld [vmem:[#allocation3 + $0xab8] sm:$0xff] }
 0x28d   :  { %v6942_v29 = vcombine.low %v545_v11, %v549_v12 }
 0x28e   :  { %3861 = vmatpush1.bf16.msra.mxu0 %v6894_v19  ;;  %3902 = vmatpush1.bf16.msra.mxu1 %v7022_v22  ;;  %v6943_v19 = vcombine.high %v545_v11, %v549_v12  ;;  %v7071_v22 = vcombine.high %v673_v14, %v677_v15  ;;  %v7586_v11 = vld [vmem:[#allocation7 + $0xc] ss:$16 sps:$4 sm:$0xff]   ;;  %v7581_v14 = vld [vmem:[#allocation7] ss:$16 sps:$4 sm:$0xff]   ;;  %v7584_v15 = vld [vmem:[#allocation7 + $0x8] ss:$16 sps:$4 sm:$0xff]  }
 0x28f   :  { %3862 = vmatprep.subr.bf16.mxu0 %v6903_v23  ;;  %3903 = vmatprep.subr.bf16.mxu1 %v7031_v25  ;;  %v553_v23 = vld [vmem:[#allocation3 + $0xad8] sm:$0xff] }
 0x290   :  { %v3558_v36 = vpop.f32.mrb[12].mxu0  ;;  %v3599_v43 = vpop.f32.mrb[12].mxu1  ;;  %v557_v25 = vld [vmem:[#allocation3 + $0xaf8] sm:$0xff] }
 0x291   :  { %v3559_v42 = vadd.f32 %v3558_v36, %v8597_v8  ;;  %v3560_v44 = vpop.f32.mrb[13].mxu0  ;;  %v3601_v47 = vpop.f32.mrb[13].mxu1  ;;  %v6919_v8 = vcombine.high %v521_v40, %v525_v41  ;;  %v693_v40 = vld [vmem:[#allocation3 + $0xf38] sm:$0xff]  ;;  %v6950_v41 = vcombine.low %v553_v23, %v557_v25 }
 0x292   :  { %v3561_v59 = vadd.f32 %v3560_v44, %v8599_v13  ;;  %v3562_v48 = vpop.f32.mrb[14].mxu0  ;;  %3863 = vmatpush1.bf16.msra.mxu0 %v6902_v32  ;;  %v3603_v53 = vpop.f32.mrb[14].mxu1  ;;  %3904 = vmatpush1.bf16.msra.mxu1 %v7030_v34  ;;  %v7047_v13 = vcombine.high %v649_v58, %v653_v45  ;;  %v6951_v32 = vcombine.high %v553_v23, %v557_v25  ;;  %v561_v34 = vld [vmem:[#allocation3 + $0xb18] sm:$0xff]  ;;  %v7590_v23 = vld [vmem:[#allocation7 + $0x28] ss:$16 sps:$4 sm:$0xff]  }
 0x293   :  { %v8619_v52 = vadd.f32 %v3599_v43, %v3559_v42  ;;  %v3563_v54 = vpop.f32.mrb[15].mxu0  ;;  %3864 = vmatprep.subr.bf16.mxu0 %v6911_v35  ;;  %v3604_v55 = vpop.f32.mrb[15].mxu1  ;;  %3905 = vmatprep.subr.bf16.mxu1 %v7039_v37  ;;  %v565_v35 = vld [vmem:[#allocation3 + $0xb38] sm:$0xff]  ;;  %v7078_v42 = vcombine.low %v681_v26, %v685_v27  ;;  %v7596_v27 = vld [vmem:[#allocation7 + $0x48] ss:$16 sps:$4 sm:$0xff]  }
 0x294   :  { %v8621_v9 = vadd.f32 %v3601_v47, %v3561_v59  ;;  %v8014_v36 = vpop.eup %8013  ;;  %v689_v37 = vld [vmem:[#allocation3 + $0xf18] sm:$0xff]  ;;  %v6959_v43 = vcombine.high %v561_v34, %v565_v35 }
 0x295   :  { %v4036_v44 = vadd.f32 1.0, %v8014_v36  ;;  %v7087_v58 = vcombine.high %v689_v37, %v693_v40  ;;  %v569_v45 = vld [vmem:[#allocation3 + $0xb58] sm:$0xff]  ;;  %v3977_v36 = vsub.s32 3, %v8606_v28 }
 0x296   :  { %3865 = vmatpush1.bf16.msra.mxu0 %v6910_v49  ;;  %3906 = vmatpush1.bf16.msra.mxu1 %v7038_v50  ;;  %v573_v59 = vld [vmem:[#allocation3 + $0xb78] sm:$0xff]  ;;  %v6958_v49 = vcombine.low %v561_v34, %v565_v35  ;;  %v7086_v50 = vcombine.low %v689_v37, %v693_v40  ;;  %v3965_v34 = vsub.s32 0, %v8606_v28  ;;  %v7608_v37 = vld [vmem:[#allocation7 + $0x88] ss:$16 sps:$4 sm:$0xff]  }
 0x297   :  { %3866 = vmatprep.subr.bf16.mxu0 %v6919_v8  ;;  %3907 = vmatprep.subr.bf16.mxu1 %v7047_v13  ;;  %v697_v47 = vld [vmem:[#allocation3 + $0xf58] sm:$0xff]  ;;  %v6967_v53 = vcombine.high %v569_v45, %v573_v59  ;;  %8015 = vrcp.f32 %v4036_v44  ;;  %v6966_v57 = vcombine.low %v569_v45, %v573_v59  ;;  %v3978_v44 = vrot.slane %v8609_v24, %v3977_v36 }
 0x298   :  { %v701_v48 = vld [vmem:[#allocation3 + $0xf78] sm:$0xff] }
 0x299   :  { %v7095_v54 = vcombine.high %v697_v47, %v701_v48  ;;  %v577_v8 = vld [vmem:[#allocation3 + $0xb98] sm:$0xff]  ;;  %v7094_v60 = vcombine.low %v697_v47, %v701_v48  ;;  %v7622_v47 = vld [vmem:[#allocation7 + $0xcc] ss:$16 sps:$4 sm:$0xff]  }
 0x29a   :  { %3867 = vmatpush1.bf16.msra.mxu0 %v6918_v62  ;;  %3908 = vmatpush1.bf16.msra.mxu1 %v7046_v63  ;;  %v581_v55 = vld [vmem:[#allocation3 + $0xbb8] sm:$0xff] }
 0x29b   :  { %3868 = vmatprep.subr.bf16.mxu0 %v6927_v16  ;;  %3909 = vmatprep.subr.bf16.mxu1 %v7055_v20  ;;  %v705_v13 = vld [vmem:[#allocation3 + $0xf98] sm:$0xff]  ;;  %v6975_v61 = vcombine.high %v577_v8, %v581_v55  ;;  %v6974_v1 = vcombine.low %v577_v8, %v581_v55 }
 0x29c   :  { %v7103_v62 = vcombine.high %v705_v13, %v709_v56  ;;  %v589_v63 = vld [vmem:[#allocation3 + $0xbf8] sm:$0xff]  ;;  %v7102_v2 = vcombine.low %v705_v13, %v709_v56  ;;  %v8641_v13 = vadd.f32 %v3978_v44, %v8621_v9  ;;  %v7626_v9 = vld [vmem:[#allocation7 + $0xe8] ss:$16 sps:$4 sm:$0xff]  }
 0x29d   :  { %v713_v16 = vld [vmem:[#allocation3 + $0xfd8] sm:$0xff]  ;;  %v6983_v3 = vcombine.high %v585_v51, %v589_v63 }
 0x29e   :  { %3869 = vmatpush1.bf16.msra.mxu0 %v6926_v6  ;;  %3910 = vmatpush1.bf16.msra.mxu1 %v7054_v7  ;;  %v717_v20 = vld [vmem:[#allocation3 + $0xff8] sm:$0xff]  ;;  %v6982_v7 = vcombine.low %v585_v51, %v589_v63  ;;  %v7628_v51 = vld [vmem:[#allocation7 + $0xec] ss:$16 sps:$4 sm:$0xff]  }
 0x29f   :  { %3870 = vmatprep.subr.bf16.mxu0 %v6935_v10  ;;  %3911 = vmatprep.subr.bf16.mxu1 %v7063_v31  ;;  %v7111_v4 = vcombine.high %v713_v16, %v717_v20  ;;  %v7110_v10 = vcombine.low %v713_v16, %v717_v20  ;;  %v7583_v31 = vld [vmem:[#allocation7 + $0x4] ss:$16 sps:$4 sm:$0xff]   ;;  %v7593_v26 = vld [vmem:[#allocation7 + $0x40] ss:$16 sps:$4 sm:$0xff]   ;;  %v7115_v20 = vmul.f32 -1.442695, %v8641_v13 }
 0x2a0   :  { %v7595_v25 = vld [vmem:[#allocation7 + $0x44] ss:$16 sps:$4 sm:$0xff]   ;;  %v7605_v35 = vld [vmem:[#allocation7 + $0x80] ss:$16 sps:$4 sm:$0xff]  }
 0x2a1   :  { %v8016_v6 = vpop.eup %8015  ;;  %v7613_v40 = vld [vmem:[#allocation7 + $0xa4] ss:$16 sps:$4 sm:$0xff]   ;;  %v7617_v55 = vld [vmem:[#allocation7 + $0xc0] ss:$16 sps:$4 sm:$0xff]  }
 0x2a2   :  { %3871 = vmatpush1.bf16.msra.mxu0 %v6934_v17  ;;  %3912 = vmatpush1.bf16.msra.mxu1 %v7062_v18  ;;  %v4060_v12 = vmul.f32 %v8016_v6, %v8617_v5  ;;  %v7589_v17 = vld [vmem:[#allocation7 + $0x24] ss:$16 sps:$4 sm:$0xff]   ;;  %v7598_v5 = vld [vmem:[#allocation7 + $0x4c] ss:$16 sps:$4 sm:$0xff]   ;;  %v7623_v16 = vld [vmem:[#allocation7 + $0xe0] ss:$16 sps:$4 sm:$0xff]  }
 0x2a3   :  { %3872 = vmatprep.subr.bf16.mxu0 %v6943_v19  ;;  %3913 = vmatprep.subr.bf16.mxu1 %v7071_v22  ;;  %v7592_v19 = vld [vmem:[#allocation7 + $0x2c] ss:$16 sps:$4 sm:$0xff]   ;;  %v7587_v22 = vld [vmem:[#allocation7 + $0x20] ss:$16 sps:$4 sm:$0xff]   ;;  %v7619_v45 = vld [vmem:[#allocation7 + $0xc4] ss:$16 sps:$4 sm:$0xff]  }
 0x2a4   :  { %v4068_v18 = vpack.c.bf16 %v4060_v12, %v4060_v12  ;;  %v7637_v6 = vld [vmem:[#allocation7 + $0x124] ss:$16 sps:$4 sm:$0xff]   ;;  %v7646_v12 = vld [vmem:[#allocation7 + $0x14c] ss:$16 sps:$4 sm:$0xff]  }
 0x2a6   :  { %3873 = vmatpush1.bf16.msra.mxu0 %v6942_v29  ;;  %3914 = vmatpush1.bf16.msra.mxu1 %v7070_v30  ;;  %v7604_v29 = vld [vmem:[#allocation7 + $0x6c] ss:$16 sps:$4 sm:$0xff]   ;;  %v7602_v30 = vld [vmem:[#allocation7 + $0x68] ss:$16 sps:$4 sm:$0xff]  }
 0x2a7   :  { %3874 = vmatprep.subr.bf16.mxu0 %v6951_v32  ;;  %3915 = vmatprep.subr.bf16.mxu1 %v7079_v33  ;;  %v7607_v32 = vld [vmem:[#allocation7 + $0x84] ss:$16 sps:$4 sm:$0xff]   ;;  %v7610_v33 = vld [vmem:[#allocation7 + $0x8c] ss:$16 sps:$4 sm:$0xff]  }
 0x2aa   :  { %3875 = vmatpush1.bf16.msra.mxu0 %v6950_v41  ;;  %3916 = vmatpush1.bf16.msra.mxu1 %v7078_v42  ;;  %v7616_v41 = vld [vmem:[#allocation7 + $0xac] ss:$16 sps:$4 sm:$0xff]   ;;  %v3966_v42 = vrot.slane %v8609_v24, %v3965_v34 }
 0x2ab   :  { %3876 = vmatprep.subr.bf16.mxu0 %v6959_v43  ;;  %3917 = vmatprep.subr.bf16.mxu1 %v7087_v58  ;;  %v7611_v43 = vld [vmem:[#allocation7 + $0xa0] ss:$16 sps:$4 sm:$0xff]   ;;  %v7614_v58 = vld [vmem:[#allocation7 + $0xa8] ss:$16 sps:$4 sm:$0xff]  }
 0x2ac   :  { %v8636_v48 = vadd.f32 %v3966_v42, %v8589_v46  ;;  %v7625_v46 = vld [vmem:[#allocation7 + $0xe4] ss:$16 sps:$4 sm:$0xff]   ;;  %v7668_v42 = vld [vmem:[#allocation7 + $0x1c8] ss:$16 sps:$4 sm:$0xff]  }
 0x2ae   :  { %3877 = vmatpush1.bf16.msra.mxu0 %v6958_v49  ;;  %3918 = vmatpush1.bf16.msra.mxu1 %v7086_v50  ;;  %v7112_v63 = vmul.f32 -1.442695, %v8636_v48 }
 0x2af   :  { %3878 = vmatprep.subr.bf16.mxu0 %v6967_v53  ;;  %3919 = vmatprep.subr.bf16.mxu1 %v7095_v54 }
 0x2b0   :  { %8017 = vpow2.f32 %v7112_v63  ;;  %v7691_v63 = vld [vmem:[#allocation7 + $0x244] ss:$16 sps:$4 sm:$0xff]  }
 0x2b1   :  { %8019 = vpow2.f32 %v7115_v20  ;;  %v7692_v20 = vld [vmem:[#allocation7 + $0x248] ss:$16 sps:$4 sm:$0xff]  }
 0x2b2   :  { %3879 = vmatpush1.bf16.msra.mxu0 %v6966_v57  ;;  %3920 = vmatpush1.bf16.msra.mxu1 %v7094_v60 }
 0x2b3   :  { %3880 = vmatprep.subr.bf16.mxu0 %v6975_v61  ;;  %3921 = vmatprep.subr.bf16.mxu1 %v7103_v62  ;;  %v7620_v61 = vld [vmem:[#allocation7 + $0xc8] ss:$16 sps:$4 sm:$0xff]  }
 0x2b6   :  { %3881 = vmatpush1.bf16.msra.mxu0 %v6974_v1  ;;  %3922 = vmatpush1.bf16.msra.mxu1 %v7102_v2  ;;  %v7631_v1 = vld [vmem:[#allocation7 + $0x104] ss:$16 sps:$4 sm:$0xff]   ;;  %v7634_v2 = vld [vmem:[#allocation7 + $0x10c] ss:$16 sps:$4 sm:$0xff]  }
 0x2b7   :  { %3882 = vmatprep.subr.bf16.mxu0 %v6983_v3  ;;  %3923 = vmatprep.subr.bf16.mxu1 %v7111_v4  ;;  %v7629_v3 = vld [vmem:[#allocation7 + $0x100] ss:$16 sps:$4 sm:$0xff]   ;;  %v7632_v4 = vld [vmem:[#allocation7 + $0x108] ss:$16 sps:$4 sm:$0xff]  }
 0x2ba   :  { %3883 = vmatpush1.bf16.msra.mxu0 %v6982_v7  ;;  %3924 = vmatpush1.bf16.msra.mxu1 %v7110_v10  ;;  %v7640_v7 = vld [vmem:[#allocation7 + $0x12c] ss:$16 sps:$4 sm:$0xff]   ;;  %v7635_v10 = vld [vmem:[#allocation7 + $0x120] ss:$16 sps:$4 sm:$0xff]  }
 0x2bb   :  { %5633 = vmatprep.subr.bf16.mxu0 %v7583_v31  ;;  %5797 = vmatprep.subr.bf16.mxu1 %v7586_v11  ;;  %v7638_v31 = vld [vmem:[#allocation7 + $0x128] ss:$16 sps:$4 sm:$0xff]   ;;  %v7643_v11 = vld [vmem:[#allocation7 + $0x144] ss:$16 sps:$4 sm:$0xff]  }
 0x2bd   :  { %3885 = vmatmul.mubr.bf16.vlgmr.msra.gmra.mrb[28].mxu0 %v8563_v38  ;;  %3926 = vmatmul.mubr.bf16.vlgmr.msra.gmra.mrb[28].mxu1 %v8565_v39  ;;  %v7601_v38 = vld [vmem:[#allocation7 + $0x64] ss:$16 sps:$4 sm:$0xff]   ;;  %v7599_v39 = vld [vmem:[#allocation7 + $0x60] ss:$16 sps:$4 sm:$0xff]  }
 0x2be   :  { %5634 = vmatpush1.bf16.msra.mxu0 %v7581_v14  ;;  %5665 = vmatprep.mubr.bf16.mxu0 %v4068_v18  ;;  %v7641_v14 = vld [vmem:[#allocation7 + $0x140] ss:$16 sps:$4 sm:$0xff]  }
 0x2bf   :  { %5798 = vmatpush1.bf16.msra.mxu1 %v7584_v15  ;;  %5829 = vmatprep.mubr.bf16.mxu1 %v4068_v18  ;;  %v8018_v15 = vpop.eup %8017  ;;  %v7649_v18 = vld [vmem:[#allocation7 + $0x164] ss:$16 sps:$4 sm:$0xff]  }
 0x2c0   :  { %5635 = vmatprep.subr.bf16.mxu0 %v7589_v17  ;;  %5799 = vmatprep.subr.bf16.mxu1 %v7592_v19  ;;  %v7644_v17 = vld [vmem:[#allocation7 + $0x148] ss:$16 sps:$4 sm:$0xff]   ;;  %v7652_v19 = vld [vmem:[#allocation7 + $0x16c] ss:$16 sps:$4 sm:$0xff]  }
 0x2c2   :  { %5636 = vmatpush1.bf16.msra.mxu0 %v7587_v22  ;;  %v8020_v22 = vpop.eup %8019 }
 0x2c3   :  { %5800 = vmatpush1.bf16.msra.mxu1 %v7590_v23  ;;  %5637 = vmatprep.subr.bf16.mxu0 %v7595_v25  ;;  %v4035_v23 = vadd.f32 1.0, %v8018_v15  ;;  %v7647_v25 = vld [vmem:[#allocation7 + $0x160] ss:$16 sps:$4 sm:$0xff]   ;;  %v3985_v15 = vsub.s32 5, %v8606_v28 }
 0x2c4   :  { %5801 = vmatprep.subr.bf16.mxu1 %v7598_v5  ;;  %v7650_v5 = vld [vmem:[#allocation7 + $0x168] ss:$16 sps:$4 sm:$0xff]  }
 0x2c5   :  { %8021 = vrcp.f32 %v4035_v23  ;;  %v7718_v23 = vld [vmem:[#allocation7 + $0x2cc] ss:$16 sps:$4 sm:$0xff]  }
 0x2c6   :  { %5638 = vmatpush1.bf16.msra.mxu0 %v7593_v26  ;;  %v7655_v26 = vld [vmem:[#allocation7 + $0x184] ss:$16 sps:$4 sm:$0xff]  }
 0x2c7   :  { %5802 = vmatpush1.bf16.msra.mxu1 %v7596_v27  ;;  %5639 = vmatprep.subr.bf16.mxu0 %v7601_v38  ;;  %v4038_v27 = vadd.f32 1.0, %v8020_v22  ;;  %v7658_v38 = vld [vmem:[#allocation7 + $0x18c] ss:$16 sps:$4 sm:$0xff]  }
 0x2c8   :  { %5803 = vmatprep.subr.bf16.mxu1 %v7604_v29  ;;  %v7653_v29 = vld [vmem:[#allocation7 + $0x180] ss:$16 sps:$4 sm:$0xff]  }
 0x2c9   :  { %8023 = vrcp.f32 %v4038_v27 }
 0x2ca   :  { %5640 = vmatpush1.bf16.msra.mxu0 %v7599_v39  ;;  %v7656_v39 = vld [vmem:[#allocation7 + $0x188] ss:$16 sps:$4 sm:$0xff]  }
 0x2cb   :  { %5804 = vmatpush1.bf16.msra.mxu1 %v7602_v30  ;;  %5641 = vmatprep.subr.bf16.mxu0 %v7607_v32  ;;  %v7661_v30 = vld [vmem:[#allocation7 + $0x1a4] ss:$16 sps:$4 sm:$0xff]   ;;  %v7664_v32 = vld [vmem:[#allocation7 + $0x1ac] ss:$16 sps:$4 sm:$0xff]  }
 0x2cc   :  { %5805 = vmatprep.subr.bf16.mxu1 %v7610_v33  ;;  %v7659_v33 = vld [vmem:[#allocation7 + $0x1a0] ss:$16 sps:$4 sm:$0xff]  }
 0x2ce   :  { %5642 = vmatpush1.bf16.msra.mxu0 %v7605_v35  ;;  %v7662_v35 = vld [vmem:[#allocation7 + $0x1a8] ss:$16 sps:$4 sm:$0xff]  }
 0x2cf   :  { %5806 = vmatpush1.bf16.msra.mxu1 %v7608_v37  ;;  %5643 = vmatprep.subr.bf16.mxu0 %v7613_v40  ;;  %v7667_v37 = vld [vmem:[#allocation7 + $0x1c4] ss:$16 sps:$4 sm:$0xff]   ;;  %v7670_v40 = vld [vmem:[#allocation7 + $0x1cc] ss:$16 sps:$4 sm:$0xff]   ;;  %v8022_v44 = vpop.eup %8021 }
 0x2d0   :  { %v3640_v59 = vpop.f32.mrb[16].mxu0  ;;  %5807 = vmatprep.subr.bf16.mxu1 %v7616_v41  ;;  %v3681_v49 = vpop.f32.mrb[16].mxu1  ;;  %v7665_v41 = vld [vmem:[#allocation7 + $0x1c0] ss:$16 sps:$4 sm:$0xff]  }
 0x2d1   :  { %v3642_v50 = vpop.f32.mrb[17].mxu0  ;;  %v8638_v53 = vadd.f32 %v3681_v49, %v3640_v59  ;;  %v3683_v54 = vpop.f32.mrb[17].mxu1  ;;  %v7671_v59 = vld [vmem:[#allocation7 + $0x1e0] ss:$16 sps:$4 sm:$0xff]   ;;  %v7674_v49 = vld [vmem:[#allocation7 + $0x1e8] ss:$16 sps:$4 sm:$0xff]  }
 0x2d2   :  { %v3644_v8 = vpop.f32.mrb[18].mxu0  ;;  %5644 = vmatpush1.bf16.msra.mxu0 %v7611_v43  ;;  %v8643_v56 = vadd.f32 %v3683_v54, %v3642_v50  ;;  %v3685_v57 = vpop.f32.mrb[18].mxu1  ;;  %v7673_v43 = vld [vmem:[#allocation7 + $0x1e4] ss:$16 sps:$4 sm:$0xff]   ;;  %v7682_v54 = vld [vmem:[#allocation7 + $0x20c] ss:$16 sps:$4 sm:$0xff]  }
 0x2d3   :  { %5808 = vmatpush1.bf16.msra.mxu1 %v7614_v58  ;;  %v3645_v60 = vpop.f32.mrb[19].mxu0  ;;  %5645 = vmatprep.subr.bf16.mxu0 %v7619_v45  ;;  %v3686_v62 = vpop.f32.mrb[19].mxu1  ;;  %v7676_v58 = vld [vmem:[#allocation7 + $0x1ec] ss:$16 sps:$4 sm:$0xff]   ;;  %v7679_v50 = vld [vmem:[#allocation7 + $0x204] ss:$16 sps:$4 sm:$0xff]  }
 0x2d4   :  { %5809 = vmatprep.subr.bf16.mxu1 %v7622_v47  ;;  %v8024_v45 = vpop.eup %8023  ;;  %v4059_v47 = vmul.f32 %v8022_v44, %v8636_v48  ;;  %v7680_v60 = vld [vmem:[#allocation7 + $0x208] ss:$16 sps:$4 sm:$0xff]   ;;  %v7688_v62 = vld [vmem:[#allocation7 + $0x22c] ss:$16 sps:$4 sm:$0xff]   ;;  %v7683_v48 = vld [vmem:[#allocation7 + $0x220] ss:$16 sps:$4 sm:$0xff]  }
 0x2d5   :  { %v4062_v8 = vmul.f32 %v8024_v45, %v8641_v13  ;;  %v7694_v13 = vld [vmem:[#allocation7 + $0x24c] ss:$16 sps:$4 sm:$0xff]   ;;  %v7722_v44 = vld [vmem:[#allocation7 + $0x2e8] ss:$16 sps:$4 sm:$0xff]  }
 0x2d6   :  { %5646 = vmatpush1.bf16.msra.mxu0 %v7617_v55  ;;  %v7677_v55 = vld [vmem:[#allocation7 + $0x200] ss:$16 sps:$4 sm:$0xff]   ;;  %v4067_v57 = vpack.c.bf16 %v4059_v47, %v4059_v47 }
 0x2d7   :  { %5810 = vmatpush1.bf16.msra.mxu1 %v7620_v61  ;;  %5647 = vmatprep.subr.bf16.mxu0 %v7625_v46  ;;  %v7685_v61 = vld [vmem:[#allocation7 + $0x224] ss:$16 sps:$4 sm:$0xff]   ;;  %v4070_v46 = vpack.c.bf16 %v4062_v8, %v4062_v8  ;;  %v7725_v47 = vld [vmem:[#allocation7 + $0x300] ss:$16 sps:$4 sm:$0xff]  }
 0x2d8   :  { %5811 = vmatprep.subr.bf16.mxu1 %v7628_v51  ;;  %v7686_v51 = vld [vmem:[#allocation7 + $0x228] ss:$16 sps:$4 sm:$0xff]   ;;  %v7731_v8 = vld [vmem:[#allocation7 + $0x320] ss:$16 sps:$4 sm:$0xff]  }
 0x2da   :  { %5648 = vmatpush1.bf16.msra.mxu0 %v7623_v16  ;;  %v7689_v16 = vld [vmem:[#allocation7 + $0x240] ss:$16 sps:$4 sm:$0xff]  }
 0x2db   :  { %5812 = vmatpush1.bf16.msra.mxu1 %v7626_v9  ;;  %5649 = vmatprep.subr.bf16.mxu0 %v7631_v1  ;;  %v7697_v9 = vld [vmem:[#allocation7 + $0x264] ss:$16 sps:$4 sm:$0xff]   ;;  %v7700_v1 = vld [vmem:[#allocation7 + $0x26c] ss:$16 sps:$4 sm:$0xff]  }
 0x2dc   :  { %5813 = vmatprep.subr.bf16.mxu1 %v7634_v2  ;;  %v7695_v2 = vld [vmem:[#allocation7 + $0x260] ss:$16 sps:$4 sm:$0xff]  }
 0x2de   :  { %5650 = vmatpush1.bf16.msra.mxu0 %v7629_v3  ;;  %v7698_v3 = vld [vmem:[#allocation7 + $0x268] ss:$16 sps:$4 sm:$0xff]  }
 0x2df   :  { %5814 = vmatpush1.bf16.msra.mxu1 %v7632_v4  ;;  %5651 = vmatprep.subr.bf16.mxu0 %v7637_v6  ;;  %v7703_v4 = vld [vmem:[#allocation7 + $0x284] ss:$16 sps:$4 sm:$0xff]   ;;  %v7706_v6 = vld [vmem:[#allocation7 + $0x28c] ss:$16 sps:$4 sm:$0xff]  }
 0x2e0   :  { %5815 = vmatprep.subr.bf16.mxu1 %v7640_v7  ;;  %v3973_v7 = vsub.s32 2, %v8606_v28 }
 0x2e2   :  { %5652 = vmatpush1.bf16.msra.mxu0 %v7635_v10  ;;  %v7701_v10 = vld [vmem:[#allocation7 + $0x280] ss:$16 sps:$4 sm:$0xff]  }
 0x2e3   :  { %5816 = vmatpush1.bf16.msra.mxu1 %v7638_v31  ;;  %5653 = vmatprep.subr.bf16.mxu0 %v7643_v11  ;;  %v7704_v31 = vld [vmem:[#allocation7 + $0x288] ss:$16 sps:$4 sm:$0xff]   ;;  %v7709_v11 = vld [vmem:[#allocation7 + $0x2a4] ss:$16 sps:$4 sm:$0xff]  }
 0x2e4   :  { %5817 = vmatprep.subr.bf16.mxu1 %v7646_v12  ;;  %v7712_v12 = vld [vmem:[#allocation7 + $0x2ac] ss:$16 sps:$4 sm:$0xff]  }
 0x2e6   :  { %5654 = vmatpush1.bf16.msra.mxu0 %v7641_v14  ;;  %v3974_v14 = vrot.slane %v8609_v24, %v3973_v7 }
 0x2e7   :  { %5818 = vmatpush1.bf16.msra.mxu1 %v7644_v17  ;;  %5655 = vmatprep.subr.bf16.mxu0 %v7649_v18  ;;  %v7707_v17 = vld [vmem:[#allocation7 + $0x2a0] ss:$16 sps:$4 sm:$0xff]   ;;  %v7710_v18 = vld [vmem:[#allocation7 + $0x2a8] ss:$16 sps:$4 sm:$0xff]  }
 0x2e8   :  { %5819 = vmatprep.subr.bf16.mxu1 %v7652_v19  ;;  %v7715_v19 = vld [vmem:[#allocation7 + $0x2c4] ss:$16 sps:$4 sm:$0xff]  }
 0x2ea   :  { %5656 = vmatpush1.bf16.msra.mxu0 %v7647_v25  ;;  %v8655_v25 = vadd.f32 %v3974_v14, %v8619_v52  ;;  %v7716_v52 = vld [vmem:[#allocation7 + $0x2c8] ss:$16 sps:$4 sm:$0xff]   ;;  %v7766_v14 = vld [vmem:[#allocation7 + $0x3cc] ss:$16 sps:$4 sm:$0xff]  }
 0x2eb   :  { %5820 = vmatpush1.bf16.msra.mxu1 %v7650_v5  ;;  %5657 = vmatprep.subr.bf16.mxu0 %v7655_v26 }
 0x2ec   :  { %5821 = vmatprep.subr.bf16.mxu1 %v7658_v38 }
 0x2ee   :  { %5658 = vmatpush1.bf16.msra.mxu0 %v7653_v29 }
 0x2ef   :  { %5822 = vmatpush1.bf16.msra.mxu1 %v7656_v39  ;;  %5659 = vmatprep.subr.bf16.mxu0 %v7661_v30  ;;  %v3986_v39 = vrot.slane %v8609_v24, %v3985_v15  ;;  %v7719_v24 = vld [vmem:[#allocation7 + $0x2e0] ss:$16 sps:$4 sm:$0xff]  }
 0x2f0   :  { %5823 = vmatprep.subr.bf16.mxu1 %v7664_v32  ;;  %v7713_v32 = vld [vmem:[#allocation7 + $0x2c0] ss:$16 sps:$4 sm:$0xff]  }
 0x2f1   :  { %v7761_v15 = vld [vmem:[#allocation7 + $0x3c0] ss:$16 sps:$4 sm:$0xff]  }
 0x2f2   :  { %5660 = vmatpush1.bf16.msra.mxu0 %v7659_v33 }
 0x2f3   :  { %5824 = vmatpush1.bf16.msra.mxu1 %v7662_v35  ;;  %5661 = vmatprep.subr.bf16.mxu0 %v7667_v37 }
 0x2f4   :  { %5825 = vmatprep.subr.bf16.mxu1 %v7670_v40  ;;  %v7721_v40 = vld [vmem:[#allocation7 + $0x2e4] ss:$16 sps:$4 sm:$0xff]  }
 0x2f6   :  { %5662 = vmatpush1.bf16.msra.mxu0 %v7665_v41 }
 0x2f7   :  { %5826 = vmatpush1.bf16.msra.mxu1 %v7668_v42  ;;  %5663 = vmatprep.subr.bf16.mxu0 %v7673_v43  ;;  %v7724_v42 = vld [vmem:[#allocation7 + $0x2ec] ss:$16 sps:$4 sm:$0xff]  }
 0x2f8   :  { %5827 = vmatprep.subr.bf16.mxu1 %v7676_v58  ;;  %v7727_v58 = vld [vmem:[#allocation7 + $0x304] ss:$16 sps:$4 sm:$0xff]  }
 0x2fa   :  { %5664 = vmatpush1.bf16.msra.mxu0 %v7671_v59  ;;  %v7730_v59 = vld [vmem:[#allocation7 + $0x30c] ss:$16 sps:$4 sm:$0xff]  }
 0x2fb   :  { %5828 = vmatpush1.bf16.msra.mxu1 %v7674_v49  ;;  %5674 = vmatprep.subr.bf16.mxu0 %v7679_v50  ;;  %v7728_v49 = vld [vmem:[#allocation7 + $0x308] ss:$16 sps:$4 sm:$0xff]   ;;  %v7733_v50 = vld [vmem:[#allocation7 + $0x324] ss:$16 sps:$4 sm:$0xff]  }
 0x2fc   :  { %5838 = vmatprep.subr.bf16.mxu1 %v7682_v54  ;;  %v7736_v54 = vld [vmem:[#allocation7 + $0x32c] ss:$16 sps:$4 sm:$0xff]  }
 0x2fd   :  { %5666 = vmatmul.mubr.bf16.vlgmr.msra.gmra.mrb[32].mxu0 %v4067_v57 }
 0x2fe   :  { %5830 = vmatmul.mubr.bf16.vlgmr.msra.gmra.mrb[32].mxu1 %v4067_v57  ;;  %5675 = vmatpush1.bf16.msra.mxu0 %v7677_v55  ;;  %v7734_v55 = vld [vmem:[#allocation7 + $0x328] ss:$16 sps:$4 sm:$0xff]   ;;  %v7739_v57 = vld [vmem:[#allocation7 + $0x344] ss:$16 sps:$4 sm:$0xff]  }
 0x2ff   :  { %5706 = vmatprep.mubr.bf16.mxu0 %v4070_v46  ;;  %5839 = vmatpush1.bf16.msra.mxu1 %v7680_v60  ;;  %v7742_v60 = vld [vmem:[#allocation7 + $0x34c] ss:$16 sps:$4 sm:$0xff]  }
 0x300   :  { %5870 = vmatprep.mubr.bf16.mxu1 %v4070_v46  ;;  %5676 = vmatprep.subr.bf16.mxu0 %v7685_v61  ;;  %v7737_v61 = vld [vmem:[#allocation7 + $0x340] ss:$16 sps:$4 sm:$0xff]  }
 0x301   :  { %5840 = vmatprep.subr.bf16.mxu1 %v7688_v62  ;;  %v7740_v62 = vld [vmem:[#allocation7 + $0x348] ss:$16 sps:$4 sm:$0xff]  }
 0x302   :  { %5677 = vmatpush1.bf16.msra.mxu0 %v7683_v48  ;;  %v7745_v48 = vld [vmem:[#allocation7 + $0x364] ss:$16 sps:$4 sm:$0xff]  }
 0x303   :  { %5841 = vmatpush1.bf16.msra.mxu1 %v7686_v51  ;;  %5678 = vmatprep.subr.bf16.mxu0 %v7691_v63  ;;  %v7748_v51 = vld [vmem:[#allocation7 + $0x36c] ss:$16 sps:$4 sm:$0xff]  }
 0x304   :  { %5842 = vmatprep.subr.bf16.mxu1 %v7694_v13 }
 0x306   :  { %5679 = vmatpush1.bf16.msra.mxu0 %v7689_v16  ;;  %v7743_v16 = vld [vmem:[#allocation7 + $0x360] ss:$16 sps:$4 sm:$0xff]  }
 0x307   :  { %5843 = vmatpush1.bf16.msra.mxu1 %v7692_v20  ;;  %5680 = vmatprep.subr.bf16.mxu0 %v7697_v9  ;;  %v7746_v20 = vld [vmem:[#allocation7 + $0x368] ss:$16 sps:$4 sm:$0xff]   ;;  %v7751_v9 = vld [vmem:[#allocation7 + $0x384] ss:$16 sps:$4 sm:$0xff]  }
 0x308   :  { %5844 = vmatprep.subr.bf16.mxu1 %v7700_v1 }
 0x30a   :  { %5681 = vmatpush1.bf16.msra.mxu0 %v7695_v2  ;;  %v7754_v2 = vld [vmem:[#allocation7 + $0x38c] ss:$16 sps:$4 sm:$0xff]  }
 0x30b   :  { %5845 = vmatpush1.bf16.msra.mxu1 %v7698_v3  ;;  %5682 = vmatprep.subr.bf16.mxu0 %v7703_v4  ;;  %v7749_v3 = vld [vmem:[#allocation7 + $0x380] ss:$16 sps:$4 sm:$0xff]   ;;  %v7752_v4 = vld [vmem:[#allocation7 + $0x388] ss:$16 sps:$4 sm:$0xff]  }
 0x30c   :  { %5846 = vmatprep.subr.bf16.mxu1 %v7706_v6  ;;  %v7757_v6 = vld [vmem:[#allocation7 + $0x3a4] ss:$16 sps:$4 sm:$0xff]  }
 0x30e   :  { %5683 = vmatpush1.bf16.msra.mxu0 %v7701_v10  ;;  %v7760_v10 = vld [vmem:[#allocation7 + $0x3ac] ss:$16 sps:$4 sm:$0xff]  }
 0x30f   :  { %5847 = vmatpush1.bf16.msra.mxu1 %v7704_v31  ;;  %5684 = vmatprep.subr.bf16.mxu0 %v7709_v11  ;;  %v7755_v31 = vld [vmem:[#allocation7 + $0x3a0] ss:$16 sps:$4 sm:$0xff]   ;;  %v7758_v11 = vld [vmem:[#allocation7 + $0x3a8] ss:$16 sps:$4 sm:$0xff]  }
 0x310   :  { %v3722_v22 = vpop.f32.mrb[20].mxu0  ;;  %5848 = vmatprep.subr.bf16.mxu1 %v7712_v12  ;;  %v3763_v26 = vpop.f32.mrb[20].mxu1  ;;  %v7763_v12 = vld [vmem:[#allocation7 + $0x3c4] ss:$16 sps:$4 sm:$0xff]  }
 0x311   :  { %v3723_v5 = vadd.f32 %v3722_v22, %v8638_v53  ;;  %v3724_v27 = vpop.f32.mrb[21].mxu0  ;;  %v3765_v29 = vpop.f32.mrb[21].mxu1  ;;  %v7772_v22 = vld [vmem:[#allocation7 + $0x3ec] ss:$16 sps:$4 sm:$0xff]  }
 0x312   :  { %v3725_v38 = vadd.f32 %v3724_v27, %v8643_v56  ;;  %v3726_v30 = vpop.f32.mrb[22].mxu0  ;;  %5685 = vmatpush1.bf16.msra.mxu0 %v7707_v17  ;;  %v3767_v35 = vpop.f32.mrb[22].mxu1  ;;  %v7114_v56 = vmul.f32 -1.442695, %v8655_v25  ;;  %v7764_v17 = vld [vmem:[#allocation7 + $0x3c8] ss:$16 sps:$4 sm:$0xff]  }
 0x313   :  { %v8660_v33 = vadd.f32 %v3763_v26, %v3723_v5  ;;  %5849 = vmatpush1.bf16.msra.mxu1 %v7710_v18  ;;  %v3727_v37 = vpop.f32.mrb[23].mxu0  ;;  %5686 = vmatprep.subr.bf16.mxu0 %v7715_v19  ;;  %v3768_v53 = vpop.f32.mrb[23].mxu1  ;;  %v7769_v18 = vld [vmem:[#allocation7 + $0x3e4] ss:$16 sps:$4 sm:$0xff]   ;;  %v7767_v5 = vld [vmem:[#allocation7 + $0x3e0] ss:$16 sps:$4 sm:$0xff]  }
 0x314   :  { %v3766_v41 = vadd.f32 %v3765_v29, %v3725_v38  ;;  %5850 = vmatprep.subr.bf16.mxu1 %v7718_v23  ;;  %8025 = vpow2.f32 %v7114_v56  ;;  %v7770_v27 = vld [vmem:[#allocation7 + $0x3e8] ss:$16 sps:$4 sm:$0xff]   ;;  %v7775_v38 = vld [vmem:[#allocation7 + $0x404] ss:$16 sps:$4 sm:$0xff]   ;;  %v7778_v29 = vld [vmem:[#allocation7 + $0x40c] ss:$16 sps:$4 sm:$0xff]  }
 0x315   :  { %v7773_v30 = vld [vmem:[#allocation7 + $0x400] ss:$16 sps:$4 sm:$0xff]   ;;  %v7776_v35 = vld [vmem:[#allocation7 + $0x408] ss:$16 sps:$4 sm:$0xff]   ;;  %v7781_v37 = vld [vmem:[#allocation7 + $0x424] ss:$16 sps:$4 sm:$0xff]  }
 0x316   :  { %v8663_v43 = vadd.f32 %v3986_v39, %v3766_v41  ;;  %5687 = vmatpush1.bf16.msra.mxu0 %v7713_v32  ;;  %v7782_v41 = vld [vmem:[#allocation7 + $0x428] ss:$16 sps:$4 sm:$0xff]   ;;  %v7787_v53 = vld [vmem:[#allocation7 + $0x444] ss:$16 sps:$4 sm:$0xff]   ;;  %v7785_v56 = vld [vmem:[#allocation7 + $0x440] ss:$16 sps:$4 sm:$0xff]  }
 0x317   :  { %5851 = vmatpush1.bf16.msra.mxu1 %v7716_v52  ;;  %5688 = vmatprep.subr.bf16.mxu0 %v7721_v40  ;;  %v7784_v40 = vld [vmem:[#allocation7 + $0x42c] ss:$16 sps:$4 sm:$0xff]  }
 0x318   :  { %v7117_v45 = vmul.f32 -1.442695, %v8663_v43  ;;  %5852 = vmatprep.subr.bf16.mxu1 %v7724_v42  ;;  %v7790_v42 = vld [vmem:[#allocation7 + $0x44c] ss:$16 sps:$4 sm:$0xff]  }
 0x31a   :  { %5689 = vmatpush1.bf16.msra.mxu0 %v7719_v24  ;;  %8027 = vpow2.f32 %v7117_v45  ;;  %v7793_v24 = vld [vmem:[#allocation7 + $0x464] ss:$16 sps:$4 sm:$0xff]   ;;  %v7794_v45 = vld [vmem:[#allocation7 + $0x468] ss:$16 sps:$4 sm:$0xff]  }
 0x31b   :  { %5853 = vmatpush1.bf16.msra.mxu1 %v7722_v44  ;;  %5690 = vmatprep.subr.bf16.mxu0 %v7727_v58  ;;  %v7796_v44 = vld [vmem:[#allocation7 + $0x46c] ss:$16 sps:$4 sm:$0xff]   ;;  %v7791_v58 = vld [vmem:[#allocation7 + $0x460] ss:$16 sps:$4 sm:$0xff]  }
 0x31c   :  { %5854 = vmatprep.subr.bf16.mxu1 %v7730_v59  ;;  %v7799_v59 = vld [vmem:[#allocation7 + $0x484] ss:$16 sps:$4 sm:$0xff]  }
 0x31e   :  { %5691 = vmatpush1.bf16.msra.mxu0 %v7725_v47  ;;  %v8026_v46 = vpop.eup %8025  ;;  %v7802_v47 = vld [vmem:[#allocation7 + $0x48c] ss:$16 sps:$4 sm:$0xff]  }
 0x31f   :  { %5855 = vmatpush1.bf16.msra.mxu1 %v7728_v49  ;;  %5692 = vmatprep.subr.bf16.mxu0 %v7733_v50  ;;  %v4037_v13 = vadd.f32 1.0, %v8026_v46  ;;  %v3981_v49 = vsub.s32 4, %v8606_v28  ;;  %v7797_v50 = vld [vmem:[#allocation7 + $0x480] ss:$16 sps:$4 sm:$0xff]   ;;  %v7806_v46 = vld [vmem:[#allocation7 + $0x4a8] ss:$16 sps:$4 sm:$0xff]  }
 0x320   :  { %5856 = vmatprep.subr.bf16.mxu1 %v7736_v54  ;;  %v7800_v54 = vld [vmem:[#allocation7 + $0x488] ss:$16 sps:$4 sm:$0xff]  }
 0x321   :  { %8029 = vrcp.f32 %v4037_v13 }
 0x322   :  { %5693 = vmatpush1.bf16.msra.mxu0 %v7731_v8  ;;  %v7805_v8 = vld [vmem:[#allocation7 + $0x4a4] ss:$16 sps:$4 sm:$0xff]  }
 0x323   :  { %5857 = vmatpush1.bf16.msra.mxu1 %v7734_v55  ;;  %5694 = vmatprep.subr.bf16.mxu0 %v7739_v57  ;;  %v7808_v55 = vld [vmem:[#allocation7 + $0x4ac] ss:$16 sps:$4 sm:$0xff]  }
 0x324   :  { %5858 = vmatprep.subr.bf16.mxu1 %v7742_v60  ;;  %v8028_v63 = vpop.eup %8027  ;;  %v8669_v57 = vld [vmem:[#allocation5] sm:$0xff] }
 0x325   :  { %v4040_v1 = vadd.f32 1.0, %v8028_v63  ;;  %v3982_v60 = vrot.slane %v8669_v57, %v3981_v49  ;;  %v7860_v49 = vld [vmem:[#allocation7 + $0x5c8] ss:$16 sps:$4 sm:$0xff]  }
 0x326   :  { %5695 = vmatpush1.bf16.msra.mxu0 %v7737_v61  ;;  %v7803_v61 = vld [vmem:[#allocation7 + $0x4a0] ss:$16 sps:$4 sm:$0xff]  }
 0x327   :  { %5859 = vmatpush1.bf16.msra.mxu1 %v7740_v62  ;;  %5696 = vmatprep.subr.bf16.mxu0 %v7745_v48  ;;  %8031 = vrcp.f32 %v4040_v1  ;;  %v7811_v62 = vld [vmem:[#allocation7 + $0x4c4] ss:$16 sps:$4 sm:$0xff]   ;;  %v8673_v63 = vadd.f32 %v3982_v60, %v8660_v33  ;;  %v7820_v33 = vld [vmem:[#allocation7 + $0x4ec] ss:$16 sps:$4 sm:$0xff]  }
 0x328   :  { %5860 = vmatprep.subr.bf16.mxu1 %v7748_v51  ;;  %v7814_v51 = vld [vmem:[#allocation7 + $0x4cc] ss:$16 sps:$4 sm:$0xff]  }
 0x32a   :  { %5697 = vmatpush1.bf16.msra.mxu0 %v7743_v16 }
 0x32b   :  { %5861 = vmatpush1.bf16.msra.mxu1 %v7746_v20  ;;  %5698 = vmatprep.subr.bf16.mxu0 %v7751_v9  ;;  %v8030_v19 = vpop.eup %8029 }
 0x32c   :  { %5862 = vmatprep.subr.bf16.mxu1 %v7754_v2  ;;  %v4061_v26 = vmul.f32 %v8030_v19, %v8655_v25  ;;  %v7779_v25 = vld [vmem:[#allocation7 + $0x420] ss:$16 sps:$4 sm:$0xff]  }
 0x32d   :  { %v7809_v2 = vld [vmem:[#allocation7 + $0x4c0] ss:$16 sps:$4 sm:$0xff]  }
 0x32e   :  { %5699 = vmatpush1.bf16.msra.mxu0 %v7749_v3  ;;  %v4069_v32 = vpack.c.bf16 %v4061_v26, %v4061_v26  ;;  %v7821_v19 = vld [vmem:[#allocation7 + $0x500] ss:$16 sps:$4 sm:$0xff]  }
 0x32f   :  { %5863 = vmatpush1.bf16.msra.mxu1 %v7752_v4  ;;  %5700 = vmatprep.subr.bf16.mxu0 %v7757_v6  ;;  %v7827_v26 = vld [vmem:[#allocation7 + $0x520] ss:$16 sps:$4 sm:$0xff]  }
 0x330   :  { %5864 = vmatprep.subr.bf16.mxu1 %v7760_v10  ;;  %v7812_v10 = vld [vmem:[#allocation7 + $0x4c8] ss:$16 sps:$4 sm:$0xff]  }
 0x331   :  { %v8032_v23 = vpop.eup %8031 }
 0x332   :  { %5701 = vmatpush1.bf16.msra.mxu0 %v7755_v31  ;;  %v4064_v39 = vmul.f32 %v8032_v23, %v8663_v43  ;;  %v7788_v43 = vld [vmem:[#allocation7 + $0x448] ss:$16 sps:$4 sm:$0xff]   ;;  %v7817_v31 = vld [vmem:[#allocation7 + $0x4e4] ss:$16 sps:$4 sm:$0xff]  }
 0x333   :  { %5865 = vmatpush1.bf16.msra.mxu1 %v7758_v11  ;;  %5702 = vmatprep.subr.bf16.mxu0 %v7763_v12  ;;  %v7116_v12 = vmul.f32 -1.442695, %v8673_v63  ;;  %v7829_v23 = vld [vmem:[#allocation7 + $0x524] ss:$16 sps:$4 sm:$0xff]  }
 0x334   :  { %5866 = vmatprep.subr.bf16.mxu1 %v7766_v14  ;;  %v4072_v52 = vpack.c.bf16 %v4064_v39, %v4064_v39  ;;  %v7815_v14 = vld [vmem:[#allocation7 + $0x4e0] ss:$16 sps:$4 sm:$0xff]  }
 0x335   :  { %8033 = vpow2.f32 %v7116_v12  ;;  %v7833_v39 = vld [vmem:[#allocation7 + $0x540] ss:$16 sps:$4 sm:$0xff]   ;;  %v7890_v12 = vld [vmem:[#allocation7 + $0x668] ss:$16 sps:$4 sm:$0xff]  }
 0x336   :  { %5703 = vmatpush1.bf16.msra.mxu0 %v7761_v15  ;;  %v7818_v15 = vld [vmem:[#allocation7 + $0x4e8] ss:$16 sps:$4 sm:$0xff]  }
 0x337   :  { %5867 = vmatpush1.bf16.msra.mxu1 %v7764_v17  ;;  %5704 = vmatprep.subr.bf16.mxu0 %v7769_v18  ;;  %v7823_v17 = vld [vmem:[#allocation7 + $0x504] ss:$16 sps:$4 sm:$0xff]   ;;  %v7826_v18 = vld [vmem:[#allocation7 + $0x50c] ss:$16 sps:$4 sm:$0xff]  }
 0x338   :  { %5868 = vmatprep.subr.bf16.mxu1 %v7772_v22  ;;  %v7824_v22 = vld [vmem:[#allocation7 + $0x508] ss:$16 sps:$4 sm:$0xff]  }
 0x33a   :  { %5705 = vmatpush1.bf16.msra.mxu0 %v7767_v5  ;;  %v7832_v5 = vld [vmem:[#allocation7 + $0x52c] ss:$16 sps:$4 sm:$0xff]  }
 0x33b   :  { %5869 = vmatpush1.bf16.msra.mxu1 %v7770_v27  ;;  %5715 = vmatprep.subr.bf16.mxu0 %v7775_v38  ;;  %v7830_v27 = vld [vmem:[#allocation7 + $0x528] ss:$16 sps:$4 sm:$0xff]   ;;  %v7835_v38 = vld [vmem:[#allocation7 + $0x544] ss:$16 sps:$4 sm:$0xff]  }
 0x33c   :  { %5879 = vmatprep.subr.bf16.mxu1 %v7778_v29  ;;  %v7838_v29 = vld [vmem:[#allocation7 + $0x54c] ss:$16 sps:$4 sm:$0xff]  }
 0x33d   :  { %5707 = vmatmul.mubr.bf16.vlgmr.msra.gmra.mrb[32].mxu0 %v4069_v32 }
 0x33e   :  { %5871 = vmatmul.mubr.bf16.vlgmr.msra.gmra.mrb[32].mxu1 %v4069_v32  ;;  %5716 = vmatpush1.bf16.msra.mxu0 %v7773_v30  ;;  %v7836_v32 = vld [vmem:[#allocation7 + $0x548] ss:$16 sps:$4 sm:$0xff]  }
 0x33f   :  { %5747 = vmatprep.mubr.bf16.mxu0 %v4072_v52  ;;  %5880 = vmatpush1.bf16.msra.mxu1 %v7776_v35  ;;  %v8034_v30 = vpop.eup %8033  ;;  %v7841_v35 = vld [vmem:[#allocation7 + $0x564] ss:$16 sps:$4 sm:$0xff]  }
 0x340   :  { %5911 = vmatprep.mubr.bf16.mxu1 %v4072_v52  ;;  %5717 = vmatprep.subr.bf16.mxu0 %v7781_v37  ;;  %v7844_v37 = vld [vmem:[#allocation7 + $0x56c] ss:$16 sps:$4 sm:$0xff]   ;;  %v4039_v52 = vadd.f32 1.0, %v8034_v30 }
 0x341   :  { %5881 = vmatprep.subr.bf16.mxu1 %v7784_v40  ;;  %v7839_v40 = vld [vmem:[#allocation7 + $0x560] ss:$16 sps:$4 sm:$0xff]  }
 0x342   :  { %5718 = vmatpush1.bf16.msra.mxu0 %v7779_v25  ;;  %v7842_v25 = vld [vmem:[#allocation7 + $0x568] ss:$16 sps:$4 sm:$0xff]   ;;  %8035 = vrcp.f32 %v4039_v52 }
 0x343   :  { %5882 = vmatpush1.bf16.msra.mxu1 %v7782_v41  ;;  %5719 = vmatprep.subr.bf16.mxu0 %v7787_v53  ;;  %v7847_v41 = vld [vmem:[#allocation7 + $0x584] ss:$16 sps:$4 sm:$0xff]   ;;  %v7850_v53 = vld [vmem:[#allocation7 + $0x58c] ss:$16 sps:$4 sm:$0xff]  }
 0x344   :  { %5883 = vmatprep.subr.bf16.mxu1 %v7790_v42  ;;  %v7845_v42 = vld [vmem:[#allocation7 + $0x580] ss:$16 sps:$4 sm:$0xff]  }
 0x346   :  { %5720 = vmatpush1.bf16.msra.mxu0 %v7785_v56  ;;  %v7848_v56 = vld [vmem:[#allocation7 + $0x588] ss:$16 sps:$4 sm:$0xff]  }
 0x347   :  { %5884 = vmatpush1.bf16.msra.mxu1 %v7788_v43  ;;  %5721 = vmatprep.subr.bf16.mxu0 %v7793_v24  ;;  %v7853_v43 = vld [vmem:[#allocation7 + $0x5a4] ss:$16 sps:$4 sm:$0xff]   ;;  %v7856_v24 = vld [vmem:[#allocation7 + $0x5ac] ss:$16 sps:$4 sm:$0xff]  }
 0x348   :  { %5885 = vmatprep.subr.bf16.mxu1 %v7796_v44  ;;  %v7851_v44 = vld [vmem:[#allocation7 + $0x5a0] ss:$16 sps:$4 sm:$0xff]  }
 0x34a   :  { %5722 = vmatpush1.bf16.msra.mxu0 %v7791_v58  ;;  %v7854_v58 = vld [vmem:[#allocation7 + $0x5a8] ss:$16 sps:$4 sm:$0xff]  }
 0x34b   :  { %5886 = vmatpush1.bf16.msra.mxu1 %v7794_v45  ;;  %5723 = vmatprep.subr.bf16.mxu0 %v7799_v59  ;;  %v7859_v45 = vld [vmem:[#allocation7 + $0x5c4] ss:$16 sps:$4 sm:$0xff]   ;;  %v7862_v59 = vld [vmem:[#allocation7 + $0x5cc] ss:$16 sps:$4 sm:$0xff]  }
 0x34c   :  { %5887 = vmatprep.subr.bf16.mxu1 %v7802_v47  ;;  %v7857_v47 = vld [vmem:[#allocation7 + $0x5c0] ss:$16 sps:$4 sm:$0xff]  }
 0x34e   :  { %5724 = vmatpush1.bf16.msra.mxu0 %v7797_v50  ;;  %v7865_v50 = vld [vmem:[#allocation7 + $0x5e4] ss:$16 sps:$4 sm:$0xff]  }
 0x34f   :  { %5888 = vmatpush1.bf16.msra.mxu1 %v7800_v54  ;;  %5725 = vmatprep.subr.bf16.mxu0 %v7805_v8  ;;  %v8036_v54 = vpop.eup %8035  ;;  %v7868_v8 = vld [vmem:[#allocation7 + $0x5ec] ss:$16 sps:$4 sm:$0xff]  }
 0x350   :  { %v3804_v48 = vpop.f32.mrb[24].mxu0  ;;  %5889 = vmatprep.subr.bf16.mxu1 %v7808_v55  ;;  %v3845_v13 = vpop.f32.mrb[24].mxu1  ;;  %v7863_v55 = vld [vmem:[#allocation7 + $0x5e0] ss:$16 sps:$4 sm:$0xff]   ;;  %v4063_v60 = vmul.f32 %v8036_v54, %v8673_v63  ;;  %v7878_v63 = vld [vmem:[#allocation7 + $0x628] ss:$16 sps:$4 sm:$0xff]  }
 0x351   :  { %v3806_v16 = vpop.f32.mrb[25].mxu0  ;;  %v8675_v20 = vadd.f32 %v3845_v13, %v3804_v48  ;;  %v3847_v9 = vpop.f32.mrb[25].mxu1  ;;  %v7869_v48 = vld [vmem:[#allocation7 + $0x600] ss:$16 sps:$4 sm:$0xff]   ;;  %v7872_v13 = vld [vmem:[#allocation7 + $0x608] ss:$16 sps:$4 sm:$0xff]  }
 0x352   :  { %v3808_v1 = vpop.f32.mrb[26].mxu0  ;;  %5726 = vmatpush1.bf16.msra.mxu0 %v7803_v61  ;;  %v8677_v3 = vadd.f32 %v3847_v9, %v3806_v16  ;;  %v3849_v4 = vpop.f32.mrb[26].mxu1  ;;  %v7866_v61 = vld [vmem:[#allocation7 + $0x5e8] ss:$16 sps:$4 sm:$0xff]   ;;  %v7877_v16 = vld [vmem:[#allocation7 + $0x624] ss:$16 sps:$4 sm:$0xff]  }
 0x353   :  { %5890 = vmatpush1.bf16.msra.mxu1 %v7806_v46  ;;  %v3809_v6 = vpop.f32.mrb[27].mxu0  ;;  %5727 = vmatprep.subr.bf16.mxu0 %v7811_v62  ;;  %v3850_v11 = vpop.f32.mrb[27].mxu1  ;;  %v7871_v46 = vld [vmem:[#allocation7 + $0x604] ss:$16 sps:$4 sm:$0xff]   ;;  %v7874_v62 = vld [vmem:[#allocation7 + $0x60c] ss:$16 sps:$4 sm:$0xff]  }
 0x354   :  { %5891 = vmatprep.subr.bf16.mxu1 %v7814_v51  ;;  %v4071_v51 = vpack.c.bf16 %v4063_v60, %v4063_v60  ;;  %v7880_v9 = vld [vmem:[#allocation7 + $0x62c] ss:$16 sps:$4 sm:$0xff]   ;;  %v7875_v1 = vld [vmem:[#allocation7 + $0x620] ss:$16 sps:$4 sm:$0xff]   ;;  %v7920_v60 = vld [vmem:[#allocation7 + $0x708] ss:$16 sps:$4 sm:$0xff]  }
 0x355   :  { %v7886_v4 = vld [vmem:[#allocation7 + $0x64c] ss:$16 sps:$4 sm:$0xff]   ;;  %v7881_v6 = vld [vmem:[#allocation7 + $0x640] ss:$16 sps:$4 sm:$0xff]  }
 0x356   :  { %5728 = vmatpush1.bf16.msra.mxu0 %v7809_v2  ;;  %v7883_v2 = vld [vmem:[#allocation7 + $0x644] ss:$16 sps:$4 sm:$0xff]   ;;  %v7892_v11 = vld [vmem:[#allocation7 + $0x66c] ss:$16 sps:$4 sm:$0xff]  }
 0x357   :  { %5892 = vmatpush1.bf16.msra.mxu1 %v7812_v10  ;;  %5729 = vmatprep.subr.bf16.mxu0 %v7817_v31  ;;  %v7884_v10 = vld [vmem:[#allocation7 + $0x648] ss:$16 sps:$4 sm:$0xff]   ;;  %v7889_v31 = vld [vmem:[#allocation7 + $0x664] ss:$16 sps:$4 sm:$0xff]  }
 0x358   :  { %5893 = vmatprep.subr.bf16.mxu1 %v7820_v33  ;;  %v7887_v33 = vld [vmem:[#allocation7 + $0x660] ss:$16 sps:$4 sm:$0xff]  }
 0x35a   :  { %5730 = vmatpush1.bf16.msra.mxu0 %v7815_v14  ;;  %v7895_v14 = vld [vmem:[#allocation7 + $0x684] ss:$16 sps:$4 sm:$0xff]  }
 0x35b   :  { %5894 = vmatpush1.bf16.msra.mxu1 %v7818_v15  ;;  %5731 = vmatprep.subr.bf16.mxu0 %v7823_v17  ;;  %v7898_v15 = vld [vmem:[#allocation7 + $0x68c] ss:$16 sps:$4 sm:$0xff]   ;;  %v7893_v17 = vld [vmem:[#allocation7 + $0x680] ss:$16 sps:$4 sm:$0xff]  }
 0x35c   :  { %5895 = vmatprep.subr.bf16.mxu1 %v7826_v18  ;;  %v7896_v18 = vld [vmem:[#allocation7 + $0x688] ss:$16 sps:$4 sm:$0xff]  }
 0x35e   :  { %5732 = vmatpush1.bf16.msra.mxu0 %v7821_v19  ;;  %v7901_v19 = vld [vmem:[#allocation7 + $0x6a4] ss:$16 sps:$4 sm:$0xff]  }
 0x35f   :  { %5896 = vmatpush1.bf16.msra.mxu1 %v7824_v22  ;;  %5733 = vmatprep.subr.bf16.mxu0 %v7829_v23  ;;  %v7904_v22 = vld [vmem:[#allocation7 + $0x6ac] ss:$16 sps:$4 sm:$0xff]   ;;  %v3989_v23 = vsub.s32 6, %v8606_v28 }
 0x360   :  { %5897 = vmatprep.subr.bf16.mxu1 %v7832_v5  ;;  %v3993_v5 = vsub.s32 7, %v8606_v28 }
 0x362   :  { %5734 = vmatpush1.bf16.msra.mxu0 %v7827_v26  ;;  %v7899_v26 = vld [vmem:[#allocation7 + $0x6a0] ss:$16 sps:$4 sm:$0xff]  }
 0x363   :  { %5898 = vmatpush1.bf16.msra.mxu1 %v7830_v27  ;;  %5735 = vmatprep.subr.bf16.mxu0 %v7835_v38  ;;  %v7902_v27 = vld [vmem:[#allocation7 + $0x6a8] ss:$16 sps:$4 sm:$0xff]   ;;  %v7907_v38 = vld [vmem:[#allocation7 + $0x6c4] ss:$16 sps:$4 sm:$0xff]  }
 0x364   :  { %5899 = vmatprep.subr.bf16.mxu1 %v7838_v29 }
 0x366   :  { %5736 = vmatpush1.bf16.msra.mxu0 %v7833_v39  ;;  %v7910_v39 = vld [vmem:[#allocation7 + $0x6cc] ss:$16 sps:$4 sm:$0xff]  }
 0x367   :  { %5900 = vmatpush1.bf16.msra.mxu1 %v7836_v32  ;;  %5737 = vmatprep.subr.bf16.mxu0 %v7841_v35  ;;  %v3990_v35 = vrot.slane %v8669_v57, %v3989_v23  ;;  %v7955_v23 = vld [vmem:[#allocation7 + $0x7c4] ss:$16 sps:$4 sm:$0xff]  }
 0x368   :  { %5901 = vmatprep.subr.bf16.mxu1 %v7844_v37 }
 0x36a   :  { %5738 = vmatpush1.bf16.msra.mxu0 %v7839_v40 }
 0x36b   :  { %5902 = vmatpush1.bf16.msra.mxu1 %v7842_v25  ;;  %5739 = vmatprep.subr.bf16.mxu0 %v7847_v41  ;;  %v3994_v25 = vrot.slane %v8669_v57, %v3993_v5  ;;  %v7911_v57 = vld [vmem:[#allocation7 + $0x6e0] ss:$16 sps:$4 sm:$0xff]   ;;  %v7958_v5 = vld [vmem:[#allocation7 + $0x7cc] ss:$16 sps:$4 sm:$0xff]  }
 0x36c   :  { %5903 = vmatprep.subr.bf16.mxu1 %v7850_v53  ;;  %v7905_v53 = vld [vmem:[#allocation7 + $0x6c0] ss:$16 sps:$4 sm:$0xff]  }
 0x36e   :  { %5740 = vmatpush1.bf16.msra.mxu0 %v7845_v42 }
 0x36f   :  { %5904 = vmatpush1.bf16.msra.mxu1 %v7848_v56  ;;  %5741 = vmatprep.subr.bf16.mxu0 %v7853_v43 }
 0x370   :  { %5905 = vmatprep.subr.bf16.mxu1 %v7856_v24  ;;  %v7908_v24 = vld [vmem:[#allocation7 + $0x6c8] ss:$16 sps:$4 sm:$0xff]  }
 0x372   :  { %5742 = vmatpush1.bf16.msra.mxu0 %v7851_v44  ;;  %v7913_v44 = vld [vmem:[#allocation7 + $0x6e4] ss:$16 sps:$4 sm:$0xff]  }
 0x373   :  { %5906 = vmatpush1.bf16.msra.mxu1 %v7854_v58  ;;  %5743 = vmatprep.subr.bf16.mxu0 %v7859_v45  ;;  %v7916_v45 = vld [vmem:[#allocation7 + $0x6ec] ss:$16 sps:$4 sm:$0xff]  }
 0x374   :  { %5907 = vmatprep.subr.bf16.mxu1 %v7862_v59 }
 0x376   :  { %5744 = vmatpush1.bf16.msra.mxu0 %v7857_v47 }
 0x377   :  { %5908 = vmatpush1.bf16.msra.mxu1 %v7860_v49  ;;  %5745 = vmatprep.subr.bf16.mxu0 %v7865_v50  ;;  %v7914_v49 = vld [vmem:[#allocation7 + $0x6e8] ss:$16 sps:$4 sm:$0xff]   ;;  %v7919_v50 = vld [vmem:[#allocation7 + $0x704] ss:$16 sps:$4 sm:$0xff]  }
 0x378   :  { %5909 = vmatprep.subr.bf16.mxu1 %v7868_v8  ;;  %v7922_v8 = vld [vmem:[#allocation7 + $0x70c] ss:$16 sps:$4 sm:$0xff]  }
 0x37a   :  { %5746 = vmatpush1.bf16.msra.mxu0 %v7863_v55  ;;  %v7917_v55 = vld [vmem:[#allocation7 + $0x700] ss:$16 sps:$4 sm:$0xff]  }
 0x37b   :  { %5910 = vmatpush1.bf16.msra.mxu1 %v7866_v61  ;;  %5756 = vmatprep.subr.bf16.mxu0 %v7871_v46  ;;  %v7925_v61 = vld [vmem:[#allocation7 + $0x724] ss:$16 sps:$4 sm:$0xff]   ;;  %v7928_v46 = vld [vmem:[#allocation7 + $0x72c] ss:$16 sps:$4 sm:$0xff]  }
 0x37c   :  { %5920 = vmatprep.subr.bf16.mxu1 %v7874_v62  ;;  %v7923_v62 = vld [vmem:[#allocation7 + $0x720] ss:$16 sps:$4 sm:$0xff]  }
 0x37d   :  { %5748 = vmatmul.mubr.bf16.vlgmr.msra.gmra.mrb[32].mxu0 %v4071_v51 }
 0x37e   :  { %5912 = vmatmul.mubr.bf16.vlgmr.msra.gmra.mrb[32].mxu1 %v4071_v51  ;;  %5757 = vmatpush1.bf16.msra.mxu0 %v7869_v48  ;;  %v7926_v48 = vld [vmem:[#allocation7 + $0x728] ss:$16 sps:$4 sm:$0xff]   ;;  %v7931_v51 = vld [vmem:[#allocation7 + $0x744] ss:$16 sps:$4 sm:$0xff]  }
 0x37f   :  { %5921 = vmatpush1.bf16.msra.mxu1 %v7872_v13  ;;  %5758 = vmatprep.subr.bf16.mxu0 %v7877_v16  ;;  %v7934_v13 = vld [vmem:[#allocation7 + $0x74c] ss:$16 sps:$4 sm:$0xff]   ;;  %v7929_v16 = vld [vmem:[#allocation7 + $0x740] ss:$16 sps:$4 sm:$0xff]  }
 0x380   :  { %5922 = vmatprep.subr.bf16.mxu1 %v7880_v9 }
 0x382   :  { %5759 = vmatpush1.bf16.msra.mxu0 %v7875_v1  ;;  %v7932_v1 = vld [vmem:[#allocation7 + $0x748] ss:$16 sps:$4 sm:$0xff]  }
 0x383   :  { %5923 = vmatpush1.bf16.msra.mxu1 %v7878_v63  ;;  %5760 = vmatprep.subr.bf16.mxu0 %v7883_v2  ;;  %v7937_v63 = vld [vmem:[#allocation7 + $0x764] ss:$16 sps:$4 sm:$0xff]  }
 0x384   :  { %5924 = vmatprep.subr.bf16.mxu1 %v7886_v4  ;;  %v7940_v4 = vld [vmem:[#allocation7 + $0x76c] ss:$16 sps:$4 sm:$0xff]  }
 0x386   :  { %5761 = vmatpush1.bf16.msra.mxu0 %v7881_v6 }
 0x387   :  { %5925 = vmatpush1.bf16.msra.mxu1 %v7884_v10  ;;  %5762 = vmatprep.subr.bf16.mxu0 %v7889_v31  ;;  %v7935_v31 = vld [vmem:[#allocation7 + $0x760] ss:$16 sps:$4 sm:$0xff]  }
 0x388   :  { %5926 = vmatprep.subr.bf16.mxu1 %v7892_v11  ;;  %v7938_v11 = vld [vmem:[#allocation7 + $0x768] ss:$16 sps:$4 sm:$0xff]  }
 0x38a   :  { %5763 = vmatpush1.bf16.msra.mxu0 %v7887_v33  ;;  %v7943_v33 = vld [vmem:[#allocation7 + $0x784] ss:$16 sps:$4 sm:$0xff]  }
 0x38b   :  { %5927 = vmatpush1.bf16.msra.mxu1 %v7890_v12  ;;  %5764 = vmatprep.subr.bf16.mxu0 %v7895_v14  ;;  %v7946_v12 = vld [vmem:[#allocation7 + $0x78c] ss:$16 sps:$4 sm:$0xff]   ;;  %v7941_v14 = vld [vmem:[#allocation7 + $0x780] ss:$16 sps:$4 sm:$0xff]  }
 0x38c   :  { %5928 = vmatprep.subr.bf16.mxu1 %v7898_v15  ;;  %v7944_v15 = vld [vmem:[#allocation7 + $0x788] ss:$16 sps:$4 sm:$0xff]  }
 0x38e   :  { %5765 = vmatpush1.bf16.msra.mxu0 %v7893_v17  ;;  %v7949_v17 = vld [vmem:[#allocation7 + $0x7a4] ss:$16 sps:$4 sm:$0xff]  }
 0x38f   :  { %5929 = vmatpush1.bf16.msra.mxu1 %v7896_v18  ;;  %5766 = vmatprep.subr.bf16.mxu0 %v7901_v19  ;;  %v7952_v18 = vld [vmem:[#allocation7 + $0x7ac] ss:$16 sps:$4 sm:$0xff]   ;;  %v7947_v19 = vld [vmem:[#allocation7 + $0x7a0] ss:$16 sps:$4 sm:$0xff]  }
 0x390   :  { %v3886_v29 = vpop.f32.mrb[28].mxu0  ;;  %5930 = vmatprep.subr.bf16.mxu1 %v7904_v22  ;;  %v3927_v32 = vpop.f32.mrb[28].mxu1  ;;  %v7950_v22 = vld [vmem:[#allocation7 + $0x7a8] ss:$16 sps:$4 sm:$0xff]  }
 0x391   :  { %v3887_v30 = vadd.f32 %v3886_v29, %v8675_v20  ;;  %v3888_v37 = vpop.f32.mrb[29].mxu0  ;;  %v3929_v40 = vpop.f32.mrb[29].mxu1  ;;  %v7956_v29 = vld [vmem:[#allocation7 + $0x7c8] ss:$16 sps:$4 sm:$0xff]  }
 0x392   :  { %v3889_v52 = vadd.f32 %v3888_v37, %v8677_v3  ;;  %v3890_v41 = vpop.f32.mrb[30].mxu0  ;;  %5767 = vmatpush1.bf16.msra.mxu0 %v7899_v26  ;;  %v3931_v56 = vpop.f32.mrb[30].mxu1  ;;  %v7959_v37 = vld [vmem:[#allocation7 + $0x7e0] ss:$16 sps:$4 sm:$0xff]  }
 0x393   :  { %v3928_v42 = vadd.f32 %v3927_v32, %v3887_v30  ;;  %5931 = vmatpush1.bf16.msra.mxu1 %v7902_v27  ;;  %v3891_v43 = vpop.f32.mrb[31].mxu0  ;;  %5768 = vmatprep.subr.bf16.mxu0 %v7907_v38  ;;  %v3932_v58 = vpop.f32.mrb[31].mxu1  ;;  %v7953_v27 = vld [vmem:[#allocation7 + $0x7c0] ss:$16 sps:$4 sm:$0xff]   ;;  %v7961_v32 = vld [vmem:[#allocation7 + $0x7e4] ss:$16 sps:$4 sm:$0xff]  }
 0x394   :  { %v3930_v20 = vadd.f32 %v3929_v40, %v3889_v52  ;;  %5932 = vmatprep.subr.bf16.mxu1 %v7910_v39  ;;  %v7962_v40 = vld [vmem:[#allocation7 + $0x7e8] ss:$16 sps:$4 sm:$0xff]   ;;  %v7969_v43 = vld [vmem:[#allocation10 + $0x48] sm:$0xff]  }
 0x395   :  { %v8687_v59 = vadd.f32 %v3990_v35, %v3928_v42  ;;  %v7964_v35 = vld [vmem:[#allocation7 + $0x7ec] ss:$16 sps:$4 sm:$0xff]   ;;  %v7965_v41 = vld [vmem:[#allocation10 + $0x40] sm:$0xff]   ;;  %v7973_v58 = vld [vmem:[#allocation10 + $0x50] sm:$0xff]  }
 0x396   :  { %v8689_v3 = vadd.f32 %v3994_v25, %v3930_v20  ;;  %5769 = vmatpush1.bf16.msra.mxu0 %v7905_v53  ;;  %v7966_v53 = vld [vmem:[#allocation10 + $0xc0] sm:$0xff]   ;;  %v7972_v20 = vld [vmem:[#allocation10 + $0x88] sm:$0xff]  }
 0x397   :  { %v7118_v47 = vmul.f32 -1.442695, %v8687_v59  ;;  %5933 = vmatpush1.bf16.msra.mxu1 %v7908_v24  ;;  %5770 = vmatprep.subr.bf16.mxu0 %v7913_v44  ;;  %v7967_v42 = vld [vmem:[#allocation10] sm:$0xff]   ;;  %v7970_v24 = vld [vmem:[#allocation10 + $0xc8] sm:$0xff]  }
 0x398   :  { %v7119_v54 = vmul.f32 -1.442695, %v8689_v3  ;;  %5934 = vmatprep.subr.bf16.mxu1 %v7916_v45  ;;  %v7968_v56 = vld [vmem:[#allocation10 + $0x80] sm:$0xff]   ;;  %v7971_v44 = vld [vmem:[#allocation10 + $0x8] sm:$0xff]   ;;  %v7974_v45 = vld [vmem:[#allocation10 + $0xd0] sm:$0xff]  }
 0x399   :  { %8037 = vpow2.f32 %v7118_v47  ;;  %v7978_v47 = vld [vmem:[#allocation10 + $0xd8] sm:$0xff]  }
 0x39a   :  { %8039 = vpow2.f32 %v7119_v54  ;;  %5771 = vmatpush1.bf16.msra.mxu0 %v7911_v57  ;;  %v7977_v57 = vld [vmem:[#allocation10 + $0x58] sm:$0xff]   ;;  %v7981_v54 = vld [vmem:[#allocation10 + $0x60] sm:$0xff]  }
 0x39b   :  { %5935 = vmatpush1.bf16.msra.mxu1 %v7914_v49  ;;  %5772 = vmatprep.subr.bf16.mxu0 %v7919_v50  ;;  %v7979_v49 = vld [vmem:[#allocation10 + $0x18] sm:$0xff]  }
 0x39c   :  { %5936 = vmatprep.subr.bf16.mxu1 %v7922_v8  ;;  %v7980_v50 = vld [vmem:[#allocation10 + $0x98] sm:$0xff]   ;;  %v7982_v8 = vld [vmem:[#allocation10 + $0xe0] sm:$0xff]  }
 0x39e   :  { %5773 = vmatpush1.bf16.msra.mxu0 %v7917_v55  ;;  %v7983_v55 = vld [vmem:[#allocation10 + $0x20] sm:$0xff]  }
 0x39f   :  { %5937 = vmatpush1.bf16.msra.mxu1 %v7920_v60  ;;  %5774 = vmatprep.subr.bf16.mxu0 %v7925_v61  ;;  %v7984_v60 = vld [vmem:[#allocation10 + $0xa0] sm:$0xff]   ;;  %v7985_v61 = vld [vmem:[#allocation10 + $0x68] sm:$0xff]  }
 0x3a0   :  { %5938 = vmatprep.subr.bf16.mxu1 %v7928_v46  ;;  %v7986_v46 = vld [vmem:[#allocation10 + $0xe8] sm:$0xff]  }
 0x3a2   :  { %5775 = vmatpush1.bf16.msra.mxu0 %v7923_v62  ;;  %v7987_v62 = vld [vmem:[#allocation10 + $0x28] sm:$0xff]  }
 0x3a3   :  { %v8038_v9 = vpop.eup %8037  ;;  %5939 = vmatpush1.bf16.msra.mxu1 %v7926_v48  ;;  %5776 = vmatprep.subr.bf16.mxu0 %v7931_v51  ;;  %v7988_v48 = vld [vmem:[#allocation10 + $0xa8] sm:$0xff]   ;;  %v7989_v51 = vld [vmem:[#allocation10 + $0x70] sm:$0xff]  }
 0x3a4   :  { %v8040_v2 = vpop.eup %8039  ;;  %5940 = vmatprep.subr.bf16.mxu1 %v7934_v13  ;;  %v4041_v10 = vadd.f32 1.0, %v8038_v9  ;;  %v7990_v13 = vld [vmem:[#allocation10 + $0xf0] sm:$0xff]  }
 0x3a5   :  { %v4042_v6 = vadd.f32 1.0, %v8040_v2  ;;  %v7992_v9 = vld [vmem:[#allocation10 + $0xb0] sm:$0xff]   ;;  %v7995_v2 = vld [vmem:[#allocation10 + $0x38] sm:$0xff]  }
 0x3a6   :  { %5777 = vmatpush1.bf16.msra.mxu0 %v7929_v16  ;;  %v7991_v16 = vld [vmem:[#allocation10 + $0x30] sm:$0xff]  }
 0x3a7   :  { %8041 = vrcp.f32 %v4042_v6  ;;  %5941 = vmatpush1.bf16.msra.mxu1 %v7932_v1  ;;  %5778 = vmatprep.subr.bf16.mxu0 %v7937_v63  ;;  %v7993_v1 = vld [vmem:[#allocation10 + $0x78] sm:$0xff]  }
 0x3a8   :  { %5942 = vmatprep.subr.bf16.mxu1 %v7940_v4  ;;  %8043 = vrcp.f32 %v4041_v10  ;;  %v7994_v63 = vld [vmem:[#allocation10 + $0xf8] sm:$0xff]  }
 0x3a9   :  { %v7996_v4 = vld [vmem:[#allocation10 + $0xb8] sm:$0xff]  }
 0x3aa   :  { %5779 = vmatpush1.bf16.msra.mxu0 %v7935_v31  ;;  %v4331_v6 = vld [vmem:[#allocation8] sm:$0xf] }
 0x3ab   :  { %5943 = vmatpush1.bf16.msra.mxu1 %v7938_v11  ;;  %5780 = vmatprep.subr.bf16.mxu0 %v7943_v33  ;;  %v4336_v10 = vrot.slane %v4331_v6, %v3965_v34  ;;  %v4344_v31 = vrot.slane %v4331_v6, %v3973_v7  ;;  %v4340_v11 = vrot.slane %v4331_v6, %v3969_v21 }
 0x3ac   :  { %5944 = vmatprep.subr.bf16.mxu1 %v7946_v12  ;;  %v4348_v33 = vrot.slane %v4331_v6, %v3977_v36 }
 0x3ae   :  { %5781 = vmatpush1.bf16.msra.mxu0 %v7941_v14 }
 0x3af   :  { %5945 = vmatpush1.bf16.msra.mxu1 %v7944_v15  ;;  %5782 = vmatprep.subr.bf16.mxu0 %v7949_v17 }
 0x3b0   :  { %5946 = vmatprep.subr.bf16.mxu1 %v7952_v18 }
 0x3b1   :  { %v8042_v26 = vpop.eup %8041 }
 0x3b2   :  { %5783 = vmatpush1.bf16.msra.mxu0 %v7947_v19  ;;  %v4066_v38 = vmul.f32 %v8042_v26, %v8689_v3  ;;  %v8044_v39 = vpop.eup %8043  ;;  %v7976_v3 = vld [vmem:[#allocation10 + $0x90] sm:$0xff]  }
 0x3b3   :  { %5947 = vmatpush1.bf16.msra.mxu1 %v7950_v22  ;;  %5784 = vmatprep.subr.bf16.mxu0 %v7955_v23  ;;  %v4065_v52 = vmul.f32 %v8044_v39, %v8687_v59  ;;  %v7975_v59 = vld [vmem:[#allocation10 + $0x10] sm:$0xff]  }
 0x3b4   :  { %5948 = vmatprep.subr.bf16.mxu1 %v7958_v5  ;;  %v4074_v30 = vpack.c.bf16 %v4066_v38, %v4066_v38 }
 0x3b5   :  { %v4073_v25 = vpack.c.bf16 %v4065_v52, %v4065_v52 }
 0x3b6   :  { %5785 = vmatpush1.bf16.msra.mxu0 %v7953_v27  ;;  %5788 = vmatprep.mubr.bf16.mxu0 %v4074_v30 }
 0x3b7   :  { %5949 = vmatpush1.bf16.msra.mxu1 %v7956_v29  ;;  %5952 = vmatprep.mubr.bf16.mxu1 %v4074_v30 }
 0x3b8   :  { %5786 = vmatprep.subr.bf16.mxu0 %v7961_v32  ;;  %5950 = vmatprep.subr.bf16.mxu1 %v7964_v35 }
 0x3ba   :  { %5787 = vmatpush1.bf16.msra.mxu0 %v7959_v37 }
 0x3bb   :  { %5951 = vmatpush1.bf16.msra.mxu1 %v7962_v40  ;;  %7433 = vmatprep.subr.bf16.mxu0 %v7965_v41 }
 0x3bc   :  { %7455 = vmatprep.subr.bf16.mxu1 %v7966_v53 }
 0x3bd   :  { %5789 = vmatmul.mubr.bf16.vlgmr.msra.gmra.mrb[32].mxu0 %v4073_v25 }
 0x3be   :  { %5953 = vmatmul.mubr.bf16.vlgmr.msra.gmra.mrb[32].mxu1 %v4073_v25  ;;  %7434 = vmatpush3.bf16.msra.mxu0 %v7967_v42 }
 0x3bf   :  { %7456 = vmatpush3.bf16.msra.mxu1 %v7968_v56  ;;  %7435 = vmatprep.subr.bf16.mxu0 %v7969_v43 }
 0x3c0   :  { %7457 = vmatprep.subr.bf16.mxu1 %v7970_v24 }
 0x3c2   :  { %7436 = vmatpush3.bf16.msra.mxu0 %v7971_v44 }
 0x3c3   :  { %7458 = vmatpush3.bf16.msra.mxu1 %v7972_v20  ;;  %7437 = vmatprep.subr.bf16.mxu0 %v7973_v58 }
 0x3c4   :  { %7459 = vmatprep.subr.bf16.mxu1 %v7974_v45 }
 0x3c6   :  { %7438 = vmatpush3.bf16.msra.mxu0 %v7975_v59  ;;  %v7997_v59 = vld [vmem:[#allocation13] sm:$0xff]  }
 0x3c7   :  { %7460 = vmatpush3.bf16.msra.mxu1 %v7976_v3  ;;  %7439 = vmatprep.subr.bf16.mxu0 %v7977_v57  ;;  %v8320_v3 = vmov 0.0   ;;  %v7998_v57 = vld [vmem:[#allocation13 + $0x8] sm:$0xff]  }
 0x3c8   :  { %7461 = vmatprep.subr.bf16.mxu1 %v7978_v47  ;;  %v7999_v47 = vld [vmem:[#allocation13 + $0x10] sm:$0xff]  }
 0x3ca   :  { %7440 = vmatpush3.bf16.msra.mxu0 %v7979_v49  ;;  %v8000_v49 = vld [vmem:[#allocation13 + $0x18] sm:$0xff]  }
 0x3cb   :  { %7462 = vmatpush3.bf16.msra.mxu1 %v7980_v50  ;;  %7441 = vmatprep.subr.bf16.mxu0 %v7981_v54  ;;  %v8001_v50 = vld [vmem:[#allocation13 + $0x20] sm:$0xff]   ;;  %v8002_v54 = vld [vmem:[#allocation13 + $0x28] sm:$0xff]  }
 0x3cc   :  { %7463 = vmatprep.subr.bf16.mxu1 %v7982_v8  ;;  %v8003_v8 = vld [vmem:[#allocation13 + $0x30] sm:$0xff]  }
 0x3ce   :  { %7442 = vmatpush3.bf16.msra.mxu0 %v7983_v55  ;;  %v8004_v55 = vld [vmem:[#allocation13 + $0x38] sm:$0xff]  }
 0x3cf   :  { %7464 = vmatpush3.bf16.msra.mxu1 %v7984_v60  ;;  %7443 = vmatprep.subr.bf16.mxu0 %v7985_v61 }
 0x3d0   :  { %7465 = vmatprep.subr.bf16.mxu1 %v7986_v46  ;;  %v7380_v46 = vld [vmem:[#allocation11] ss:$0 sm:$0xff] }
 0x3d2   :  { %7444 = vmatpush3.bf16.msra.mxu0 %v7987_v62 }
 0x3d3   :  { %7466 = vmatpush3.bf16.msra.mxu1 %v7988_v48  ;;  %7445 = vmatprep.subr.bf16.mxu0 %v7989_v51 }
 0x3d4   :  { %7467 = vmatprep.subr.bf16.mxu1 %v7990_v13 }
 0x3d6   :  { %7446 = vmatpush3.bf16.msra.mxu0 %v7991_v16 }
 0x3d7   :  { %7468 = vmatpush3.bf16.msra.mxu1 %v7992_v9  ;;  %7447 = vmatprep.subr.bf16.mxu0 %v7993_v1 }
 0x3d8   :  { %7469 = vmatprep.subr.bf16.mxu1 %v7994_v63 }
 0x3da   :  { %7448 = vmatpush3.bf16.msra.mxu0 %v7995_v2 }
 0x3db   :  { %7470 = vmatpush3.bf16.msra.mxu1 %v7996_v4  ;;  %7495 = vmatprep.subr.bf16.mxu0 %v8320_v3 }
 0x3dc   :  { %7515 = vmatprep.subr.bf16.mxu1 %v8320_v3 }
 0x490   :  { %v5790_v12 = vpop.f32.mrb[32].mxu0 }
 0x491   :  { %v7535_v14 = vadd.f32 %v5790_v12, %v4336_v10  ;;  %v5954_v15 = vpop.f32.mrb[32].mxu1  ;;  %v5792_v17 = vpop.f32.mrb[33].mxu0 }
 0x492   :  { %v7537_v18 = vadd.f32 %v5954_v15, %v4344_v31  ;;  %v7536_v19 = vadd.f32 %v5792_v17, %v4340_v11  ;;  %v5956_v22 = vpop.f32.mrb[33].mxu1  ;;  %v5794_v23 = vpop.f32.mrb[34].mxu0  ;;  %v8006_v15 = vld [vmem:[#allocation16 + $0x8] sm:$0xff]   ;;  %v8007_v17 = vld [vmem:[#allocation16 + $0x10] sm:$0xff]  }
 0x493   :  { %v7376_v5 = vmul.f32 -1.442695, %v7535_v14  ;;  %v7538_v26 = vadd.f32 %v5956_v22, %v4348_v33  ;;  %v5958_v34 = vpop.f32.mrb[34].mxu1  ;;  %v5795_v27 = vpop.f32.mrb[35].mxu0  ;;  %v8010_v22 = vld [vmem:[#allocation16 + $0x28] sm:$0xff]   ;;  %v8011_v23 = vld [vmem:[#allocation16 + $0x30] sm:$0xff]  }
 0x494   :  { %v7378_v38 = vmul.f32 -1.442695, %v7537_v18  ;;  %v7377_v7 = vmul.f32 -1.442695, %v7536_v19  ;;  %v5959_v29 = vpop.f32.mrb[35].mxu1 }
 0x495   :  { %8045 = vpow2.f32 %v7376_v5  ;;  %v7379_v21 = vmul.f32 -1.442695, %v7538_v26  ;;  %v8012_v5 = vld [vmem:[#allocation16 + $0x38] sm:$0xff]  }
 0x496   :  { %8047 = vpow2.f32 %v7378_v38 }
 0x497   :  { %8049 = vpow2.f32 %v7377_v7 }
 0x498   :  { %8051 = vpow2.f32 %v7379_v21 }
 0x49f   :  { %v8046_v28 = vpop.eup %8045 }
 0x4a0   :  { %v8048_v36 = vpop.eup %8047  ;;  %v5973_v39 = vadd.f32 1.0, %v8046_v28 }
 0x4a1   :  { %v8050_v30 = vpop.eup %8049  ;;  %v5975_v32 = vadd.f32 1.0, %v8048_v36 }
 0x4a2   :  { %v8052_v35 = vpop.eup %8051  ;;  %8053 = vrcp.f32 %v5973_v39  ;;  %v5974_v37 = vadd.f32 1.0, %v8050_v30 }
 0x4a3   :  { %8055 = vrcp.f32 %v5975_v32  ;;  %v5976_v52 = vadd.f32 1.0, %v8052_v35  ;;  %v6576_v35 = vand.u32 127, %v3963_v0  ;;  %v6583_v0 = vld [vmem:[%s8742_s11] sm:$0xff] }
 0x4a4   :  { %8057 = vrcp.f32 %v5974_v37  ;;  %v7424_v37 = vld [vmem:[#allocation17] ss:$0 sm:$0xff] }
 0x4a5   :  { %8059 = vrcp.f32 %v5976_v52  ;;  %vm6577_vm1 = vcmp.ge.s32.totalorder %v6576_v35, 2  ;;  %vm6578_vm2 = vcmp.lt.s32.totalorder %v6576_v35, 4 }
 0x4a6   :  { %vm6579_vm3 = vmand %vm6577_vm1, %vm6578_vm2 }
 0x4ac   :  { %v8054_v40 = vpop.eup %8053 }
 0x4ad   :  { %v8056_v25 = vpop.eup %8055  ;;  %v5985_v53 = vmul.f32 %v8054_v40, %v7535_v14  ;;  %v8005_v14 = vld [vmem:[#allocation16] sm:$0xff]  }
 0x4ae   :  { %v8058_v41 = vpop.eup %8057  ;;  %v5987_v56 = vmul.f32 %v8056_v25, %v7537_v18  ;;  %v8008_v18 = vld [vmem:[#allocation16 + $0x18] sm:$0xff]  }
 0x4af   :  { %v8060_v42 = vpop.eup %8059  ;;  %v5986_v43 = vmul.f32 %v8058_v41, %v7536_v19  ;;  %v5989_v20 = vpack.c.bf16 %v5985_v53, %v5985_v53  ;;  %v8009_v19 = vld [vmem:[#allocation16 + $0x20] sm:$0xff]  }
 0x4b0   :  { %v5988_v24 = vmul.f32 %v8060_v42, %v7538_v26  ;;  %v5991_v45 = vpack.c.bf16 %v5987_v56, %v5987_v56  ;;  %v7414_v26 = vld [vmem:[#allocation14] ss:$0 sm:$0xff] }
 0x4b1   :  { %v5990_v44 = vpack.c.bf16 %v5986_v43, %v5986_v43 }
 0x4b2   :  { %v5992_v58 = vpack.c.bf16 %v5988_v24, %v5988_v24 }
 0x4b3   :  { %6288 = vmatprep.mubr.bf16.mxu0 %v5990_v44 }
 0x4b4   :  { %6328 = vmatprep.mubr.bf16.mxu1 %v5992_v58  ;;  %6289 = vmatmul.mubr.bf16.vlgmr.msra.gmra.mrb[36].mxu0 %v5989_v20 }
 0x4b5   :  { %6329 = vmatmul.mubr.bf16.vlgmr.msra.gmra.mrb[36].mxu1 %v5991_v45  ;;  %7496 = vmatpush3.bf16.msra.mxu0 %v7997_v59 }
 0x4b6   :  { %7497 = vmatprep.subr.bf16.mxu0 %v8320_v3  ;;  %7511 = vmatprep.mubr.msk.bf16.mxu0 %vm8321_vm0, %v8320_v3 }
 0x4b7   :  { %7531 = vmatprep.mubr.msk.bf16.mxu1 %vm8321_vm0, %v8320_v3  ;;  %7516 = vmatpush3.bf16.msra.mxu1 %v8005_v14 }
 0x4b8   :  { %7517 = vmatprep.subr.bf16.mxu1 %v8320_v3 }
 0x4b9   :  { %7498 = vmatpush3.bf16.msra.mxu0 %v7998_v57 }
 0x4ba   :  { %7499 = vmatprep.subr.bf16.mxu0 %v8320_v3 }
 0x4bb   :  { %7518 = vmatpush3.bf16.msra.mxu1 %v8006_v15 }
 0x4bc   :  { %7519 = vmatprep.subr.bf16.mxu1 %v8320_v3 }
 0x4bd   :  { %7500 = vmatpush3.bf16.msra.mxu0 %v7999_v47 }
 0x4be   :  { %7501 = vmatprep.subr.bf16.mxu0 %v8320_v3 }
 0x4bf   :  { %7520 = vmatpush3.bf16.msra.mxu1 %v8007_v17 }
 0x4c0   :  { %7521 = vmatprep.subr.bf16.mxu1 %v8320_v3 }
 0x4c1   :  { %7502 = vmatpush3.bf16.msra.mxu0 %v8000_v49 }
 0x4c2   :  { %7503 = vmatprep.subr.bf16.mxu0 %v8320_v3 }
 0x4c3   :  { %7522 = vmatpush3.bf16.msra.mxu1 %v8008_v18 }
 0x4c4   :  { %7523 = vmatprep.subr.bf16.mxu1 %v8320_v3 }
 0x4c5   :  { %7504 = vmatpush3.bf16.msra.mxu0 %v8001_v50 }
 0x4c6   :  { %7505 = vmatprep.subr.bf16.mxu0 %v8320_v3 }
 0x4c7   :  { %7524 = vmatpush3.bf16.msra.mxu1 %v8009_v19 }
 0x4c8   :  { %7525 = vmatprep.subr.bf16.mxu1 %v8320_v3 }
 0x4c9   :  { %7506 = vmatpush3.bf16.msra.mxu0 %v8002_v54 }
 0x4ca   :  { %7507 = vmatprep.subr.bf16.mxu0 %v8320_v3 }
 0x4cb   :  { %7526 = vmatpush3.bf16.msra.mxu1 %v8010_v22 }
 0x4cc   :  { %7527 = vmatprep.subr.bf16.mxu1 %v8320_v3 }
 0x4cd   :  { %7508 = vmatpush3.bf16.msra.mxu0 %v8003_v8 }
 0x4ce   :  { %7509 = vmatprep.subr.bf16.mxu0 %v8320_v3 }
 0x4cf   :  { %7528 = vmatpush3.bf16.msra.mxu1 %v8011_v23 }
 0x4d0   :  { %7529 = vmatprep.subr.bf16.mxu1 %v8320_v3 }
 0x4d1   :  { %7510 = vmatpush3.bf16.msra.mxu0 %v8004_v55 }
 0x4d3   :  { %7530 = vmatpush3.bf16.msra.mxu1 %v8012_v5 }
 0x587   :  { %v7449_v60 = vpop.f32.mrb[36].mxu0 }
 0x588   :  { %v7471_v61 = vpop.f32.mrb[36].mxu1  ;;  %v7450_v62 = vpop.f32.mrb[37].mxu0 }
 0x589   :  { %v7451_v48 = vadd.f32 %v7450_v62, %v7449_v60  ;;  %v7472_v51 = vpop.f32.mrb[37].mxu1  ;;  %v7452_v13 = vpop.f32.mrb[38].mxu0 }
 0x58a   :  { %v7473_v16 = vadd.f32 %v7472_v51, %v7471_v61  ;;  %v7474_v9 = vpop.f32.mrb[38].mxu1  ;;  %v7453_v1 = vpop.f32.mrb[39].mxu0 }
 0x58b   :  { %v6291_v63 = vadd.f32 %v7451_v48, %v7380_v46  ;;  %v7475_v2 = vpop.f32.mrb[39].mxu1 }
 0x58d   :  { %v6331_v4 = vadd.f32 %v7473_v16, %v6291_v63 }
 0x58f   :  { %v7413_v6 = vmul.f32 -1.442695, %v6331_v4 }
 0x591   :  { %8061 = vpow2.f32 %v7413_v6 }
 0x59b   :  { %v8062_v10 = vpop.eup %8061 }
 0x59c   :  { %v6339_v31 = vadd.f32 1.0, %v8062_v10 }
 0x59e   :  { %8063 = vrcp.f32 %v6339_v31 }
 0x5a8   :  { %v8064_v11 = vpop.eup %8063 }
 0x5a9   :  { %v6342_v33 = vmul.f32 %v8064_v11, %v6331_v4 }
 0x5ab   :  { %v6343_v12 = vpack.c.bf16 %v6342_v33, %v6342_v33 }
 0x5ad   :  { %7512 = vmatmul.mubr.bf16.vlgmr.msra.gmra.mrb[40].mxu0 %v6343_v12 }
 0x680   :  { %v6449_v34 = vpop.f32.mrb[40].mxu0 }
 0x681   :  { %v6450_v27 = vadd.f32 %v7414_v26, %v6449_v34  ;;  %v7513_v38 = vpop.f32.mrb[41].mxu0 }
 0x682   :  { %v6452_v7 = vpop.f32.mrb[42].mxu0 }
 0x683   :  { %v7423_v29 = vmul.f32 -1.442695, %v6450_v27  ;;  %v7514_v21 = vpop.f32.mrb[43].mxu0 }
 0x685   :  { %8065 = vpow2.f32 %v7423_v29 }
 0x68f   :  { %v8066_v28 = vpop.eup %8065 }
 0x690   :  { %v6458_v36 = vadd.f32 1.0, %v8066_v28 }
 0x692   :  { %8067 = vrcp.f32 %v6458_v36 }
 0x69c   :  { %v8068_v39 = vpop.eup %8067 }
 0x69d   :  { %v6461_v30 = vmul.f32 %v8068_v39, %v6450_v27 }
 0x69f   :  { %v6462_v32 = vpack.c.bf16 %v6461_v30, %v6461_v30 }
 0x6a1   :  { %7532 = vmatmul.mubr.bf16.vlgmr.msra.gmra.mrb[40].mxu1 %v6462_v32 }
 0x774   :  { %v6568_v52 = vpop.f32.mrb[40].mxu1 }
 0x775   :  { %v6569_v40 = vadd.f32 %v7424_v37, %v6568_v52  ;;  %v7533_v25 = vpop.f32.mrb[41].mxu1 }
 0x776   :  { %v6571_v41 = vpop.f32.mrb[42].mxu1 }
 0x777   :  { %6574 = vst [vmem:[%s8743_s12] sm:$0xff] %v6569_v40  ;;  %v6580_v53 = vsel %vm6579_vm3, %v6569_v40, 0.0  ;;  %v7534_v42 = vpop.f32.mrb[43].mxu1 }
 0x778   :  { %v6581_v56 = vmul.f32 1.442695, %v6580_v53 }
 0x77a   :  { %8069 = vpow2.f32 %v6581_v56 }
 0x784   :  { %v8070_v43 = vpop.eup %8069 }
 0x785   :  { %v6584_v24 = vmul.f32 %v8070_v43, %v6583_v0 }
 0x787   :  { %6585 = vst [vmem:[%s8744_s13] sm:$0xff] %v6584_v24 }
 0x788   :  { %6594 = vsyncpa [#allocation4], 1 }
 0x789   :  { %6595 = vsyncpa [#allocation6], 1 }
 0x78a   :  { %6596 = vsyncpa [#allocation9], 1 }
 0x78b   :  { %6597 = vsyncpa [#allocation12], 1 }
 0x78c   :  { %6598 = vsyncpa [#allocation15], 1 }
 0x78d   :  { %6599 = vsyncpa [#allocation18], 1 }

</bundles_post_ra>
